<compile_context>
chip_gen: v5e
topology: v5e:2x2
jax: 0.10.0
libtpu: 0.0.40
codegen_flags: <defaults>
</compile_context>

<pallas_src>
import jax
import jax.numpy as jnp
from jax.experimental import pallas as pl
from jax.experimental.pallas import tpu as pltpu

NEG_SLOPE = 0.2  # nn.LeakyReLU(negative_slope=0.2) inside ResBlock


def _leaky(x):
    # for slope < 1: max(x, slope*x) == leaky_relu(x)
    return jnp.maximum(x, NEG_SLOPE * x)


def _bn_affine(bn, eps=1e-5):
    gamma, beta, mean, var = bn
    s = gamma / jnp.sqrt(var + eps)
    t = beta - mean * s
    return s, t


def _round_up(n, m):
    return ((n + m - 1) // m) * m


class _Packer:
    """Packs same-width 2-D parameter arrays into one consolidated HBM operand per width."""

    def __init__(self, kind, row_align=16):
        self.kind = kind
        self.row_align = row_align
        self._groups = {}  # width -> [list of row-padded arrays, next row offset]

    def add(self, arr):
        arr = jnp.asarray(arr)
        rows, width = arr.shape
        grp = self._groups.setdefault(width, [[], 0])
        off = grp[1]
        pad = (-rows) % self.row_align          # keep every segment sublane-aligned
        if pad:
            arr = jnp.pad(arr, ((0, pad), (0, 0)))
        grp[0].append(arr)
        grp[1] = off + rows + pad
        return (self.kind, width, off, rows)    # static handle used at trace time

    def finalize(self, dtype):
        widths = sorted(self._groups)
        packs = [jnp.concatenate(self._groups[w][0], axis=0).astype(dtype)
                 for w in widths]
        index = {w: i for i, w in enumerate(widths)}
        return packs, index


def _build_kernel(net, nw, nv, w_index, v_index, mxu_dtype, in_sea, out_seq, tb):
    """net: static dict of packer handles describing the folded network."""

    def kernel(x_ref, *rest):
        w_refs = rest[:nw]
        v_refs = rest[nw:nw + nv]
        o_ref = rest[nw + nv]

        def get(handle):
            kind, width, off, rows = handle      # all Python ints -> static slice
            ref = w_refs[w_index[width]] if kind == "w" else v_refs[v_index[width]]
            return ref[off:off + rows, :]

        def matmuls(inputs, w_handles, b_handle):
            acc = None
            for a, hw in zip(inputs, w_handles):
                y = jnp.dot(a.astype(mxu_dtype), get(hw),
                            preferred_element_type=jnp.float32)
                acc = y if acc is None else acc + y
            return acc + get(b_handle).astype(jnp.float32)

        # ---- self.conv (three folded 1x1 convs) + dec_bn1: pure VPU broadcast, no MXU ----
        # Row ordering inside the tile is (o, b):  X0[o*TB + b, :] is sample b, conv output
        # channel o, after the dec_bn1 eval-mode affine.
        x0 = get(net["conv_shift"]).astype(jnp.float32)[:, None, :]      # (out_seq, 1, dim_in)
        for i in range(in_sea):                                          # in_sea is tiny (1)
            xi = x_ref[i].astype(jnp.float32)[None, :, :]                # (1, TB, dim_in)
            sc = get(net["conv_scale"][i]).astype(jnp.float32)[:, None, :]
            x0 = x0 + sc * xi                                            # (out_seq, TB, dim_in)
        dim_in = x0.shape[-1]
        X0 = x0.reshape(out_seq * tb, dim_in)    # layout-preserving: TB % 8 == 0

        def resblock(inputs, blk):
            hh = _leaky(matmuls(inputs, blk["w1"], blk["b1"]))           # fc1 (+bn1 folded)
            hh = matmuls([hh], blk["w2"], blk["b2"])                     # fc2 (+bn2 folded)
            if blk["w3"] is not None:                                    # skip projection
                xin = _leaky(matmuls(inputs, blk["w3"], blk["b3"]))
            else:
                xin = inputs[0]
            out = xin + hh
            return _leaky(out) if blk["final_nl"] else out

        b1, b2, b3, b4 = net["blocks"]
        X = resblock([X0], b1)           # dec_rb1  (dropout = identity in eval mode)
        X = resblock([X0, X], b2)        # dec_rb2  (cat([X0, X]) via pre-split weights)
        X = resblock([X], b3)            # dec_rb3
        X = resblock([X], b4)            # dec_rb4

        pose = matmuls([X], [net["pose_w"]], net["pose_b"])              # dec_pose (lane-padded)
        o_ref[...] = pose.astype(o_ref.dtype)

    return kernel


def res_decoder_pallas(x, params, *, block_batch=64, mxu_dtype=jnp.bfloat16,
                       vmem_limit_bytes=48 * 1024 * 1024):
    """Eval-mode forward. x: (bs, in_sea, dim_in) -> (bs, out_seq, dim_out)."""
    bs, in_sea, dim_in = x.shape
    out_seq = params["conv"][-1][0].shape[0]
    dim_out = params["pose"][0].shape[0]
    dpad = _round_up(dim_out, 128)               # lane-dense output; sliced back below

    # Batch tile: one tile for small batches, otherwise block_batch samples per grid step.
    # (On v7x prefer block_batch ~= round_up(bs/2, 8) so both TensorCores get a balanced step.)
    TB = max(8, min(_round_up(block_batch, 8), _round_up(bs, 8)))
    nb = pl.cdiv(bs, TB)
    bs_pad = nb * TB

    wpack = _Packer("w")      # matmul weights (stored in mxu_dtype)
    vpack = _Packer("v")      # bias / affine / conv-broadcast tensors (kept f32)

    # ---- fold the three 1x1 convs into one composed (out_seq, in_sea) weight + bias ----
    Wc, bc = None, None
    for w, b in params["conv"]:
        if Wc is None:
            Wc, bc = w, b
        else:
            Wc, bc = w @ Wc, w @ bc + b
    s0, t0 = _bn_affine(params["bn1"])           # dec_bn1 (eval) per-feature affine
    # conv + bn1 as per-channel broadcast operands (no kron, no TB tiling):
    conv_scale = [vpack.add(Wc[:, i:i + 1] * s0[None, :]) for i in range(in_sea)]
    conv_shift = vpack.add(bc[:, None] * s0[None, :] + t0[None, :])     # (out_seq, dim_in)

    def fold_fc_bn(fc, bn):
        # (x @ W^T + b) followed by eval-mode BN  ==  x @ (W^T * s) + (b * s + t)
        w, b = fc
        s, t = _bn_affine(bn)
        return w.T * s[None, :], (b * s + t).reshape(1, -1)

    def add_block(rb, final_nl, split=None):
        w1, b1 = fold_fc_bn(rb["fc1"], rb["bn1"])
        w2, b2 = fold_fc_bn(rb["fc2"], rb["bn2"])
        blk = dict(
            final_nl=final_nl,
            w1=[wpack.add(w1)] if split is None
               else [wpack.add(w1[:split]), wpack.add(w1[split:])],
            b1=vpack.add(b1),
            w2=[wpack.add(w2)],
            b2=vpack.add(b2),
        )
        if rb["fc3"] is not None:
            w3, b3 = rb["fc3"]
            w3 = w3.T
            blk["w3"] = ([wpack.add(w3)] if split is None
                         else [wpack.add(w3[:split]), wpack.add(w3[split:])])
            blk["b3"] = vpack.add(b3.reshape(1, -1))
        else:
            blk["w3"], blk["b3"] = None, None
        return blk

    wp, bp = params["pose"]
    pose_w = jnp.pad(wp.T, ((0, 0), (0, dpad - dim_out)))               # lane-dense pose
    pose_b = jnp.pad(bp.reshape(1, -1), ((0, 0), (0, dpad - dim_out)))

    net = dict(
        conv_scale=conv_scale, conv_shift=conv_shift,
        blocks=[add_block(params["rb1"], True),
                add_block(params["rb2"], True, split=dim_in),   # cat([X0, X]) order
                add_block(params["rb3"], False),
                add_block(params["rb4"], False)],
        pose_w=wpack.add(pose_w),
        pose_b=vpack.add(pose_b),
    )

    w_packs, w_index = wpack.finalize(mxu_dtype)
    v_packs, v_index = vpack.finalize(jnp.float32)
    kernel = _build_kernel(net, len(w_packs), len(v_packs), w_index, v_index,
                           mxu_dtype, in_sea, out_seq, TB)

    # x as (in_sea, bs_pad, dim_in), already in mxu_dtype (halves input DMA when bf16).
    xt = jnp.transpose(x, (1, 0, 2)).astype(mxu_dtype)
    if bs_pad != bs:
        xt = jnp.pad(xt, ((0, 0), (0, bs_pad - bs), (0, 0)))

    def call(single_buffer):
        def const(p):
            idx = lambda b: (0,) * p.ndim
            if single_buffer:
                # constant index_map -> double buffering only doubles VMEM with no overlap win
                return pl.BlockSpec(p.shape, idx, pipeline_mode=pl.Buffered(1))
            return pl.BlockSpec(p.shape, idx)

        return pl.pallas_call(
            kernel,
            out_shape=jax.ShapeDtypeStruct((nb * out_seq * TB, dpad), jnp.float32),
            grid=(nb,),
            in_specs=[pl.BlockSpec((in_sea, TB, dim_in), lambda b: (0, b, 0))]
                     + [const(p) for p in w_packs]
                     + [const(p) for p in v_packs],
            out_specs=pl.BlockSpec((out_seq * TB, dpad), lambda b: (b, 0)),
            compiler_params=pltpu.CompilerParams(
                dimension_semantics=("parallel",),
                vmem_limit_bytes=vmem_limit_bytes),
        )(xt, *w_packs, *v_packs)

    try:
        out = call(single_buffer=True)
    except Exception:   # pl.Buffered(1) unsupported on this JAX version -> default buffering
        out = call(single_buffer=False)

    # undo the (o, b) row ordering inside each tile and drop batch / lane padding
    out = out.reshape(nb, out_seq, TB, dpad).transpose(0, 2, 1, 3)
    out = out.reshape(bs_pad, out_seq, dpad)
    return out[:bs, :, :dim_out]


# -------------------- deterministic parameter construction (torch-layout) --------------------
def make_params(key, *, dim_in, dim_out, in_sea, out_seq, n_neurons):
    keys = iter(jax.random.split(key, 128))

    def linear(fin, fout):
        w = jax.random.normal(next(keys), (fout, fin), jnp.float32) / jnp.sqrt(fin)
        b = 0.1 * jax.random.normal(next(keys), (fout,), jnp.float32)
        return w, b

    def conv1x1(cin, cout):
        w = jax.random.normal(next(keys), (cout, cin), jnp.float32) / jnp.sqrt(cin)
        b = 0.1 * jax.random.normal(next(keys), (cout,), jnp.float32)
        return w, b

    def bn(n):
        gamma = 1.0 + 0.1 * jax.random.normal(next(keys), (n,), jnp.float32)
        beta = 0.1 * jax.random.normal(next(keys), (n,), jnp.float32)
        mean = 0.1 * jax.random.normal(next(keys), (n,), jnp.float32)
        var = 1.0 + 0.1 * jnp.abs(jax.random.normal(next(keys), (n,), jnp.float32))
        return (gamma, beta, mean, var)

    def resblock(fin, fout, hid):
        return dict(fc1=linear(fin, hid), bn1=bn(hid),
                    fc2=linear(hid, fout), bn2=bn(fout),
                    fc3=linear(fin, fout) if fin != fout else None)

    return dict(
        conv=[conv1x1(in_sea, out_seq // 2),
              conv1x1(out_seq // 2, out_seq // 2),
              conv1x1(out_seq // 2, out_seq)],
        bn1=bn(dim_in),
        rb1=resblock(dim_in, n_neurons, n_neurons * 2),
        rb2=resblock(n_neurons + dim_in, n_neurons // 2, n_neurons),
        rb3=resblock(n_neurons // 2, n_neurons // 2, n_neurons),
        rb4=resblock(n_neurons // 2, n_neurons, n_neurons),
        pose=linear(n_neurons, dim_out),
    )


# -------------------- pure-JAX reference mirroring the PyTorch forward (eval mode) ------------
def reference(x, params):
    h = x.astype(jnp.float32)                      # (bs, in_sea, dim_in)
    for w, b in params["conv"]:
        h = jnp.einsum("oi,bif->bof", w, h) + b[None, :, None]
    bs, seq, dim_in = h.shape
    X0 = h.reshape(bs * seq, dim_in)
    s, t = _bn_affine(params["bn1"])
    X0 = X0 * s[None] + t[None]

    def rb(block, xx, final_nl):
        w1, b1 = block["fc1"]
        s1, t1 = _bn_affine(block["bn1"])
        w2, b2 = block["fc2"]
        s2, t2 = _bn_affine(block["bn2"])
        if block["fc3"] is not None:
            w3, b3 = block["fc3"]
            xin = _leaky(xx @ w3.T + b3)
        else:
            xin = xx
        hh = xx @ w1.T + b1
        hh = _leaky(hh * s1 + t1)
        hh = hh @ w2.T + b2
        hh = hh * s2 + t2
        out = xin + hh
        return _leaky(out) if final_nl else out

    X = rb(params["rb1"], X0, True)
    X = rb(params["rb2"], jnp.concatenate([X0, X], axis=-1), True)
    X = rb(params["rb3"], X, False)
    X = rb(params["rb4"], X, False)
    wp, bp = params["pose"]
    pose = X @ wp.T + bp
    return pose.reshape(bs, seq, -1)


if __name__ == "__main__":
    # small shapes consistent with the module (real defaults: dim_in=256, out=99, seq=20, n=512)
    bs, in_sea, dim_in = 10, 1, 32
    out_seq, n_neurons, dim_out = 8, 64, 16

    key = jax.random.PRNGKey(0)
    kx, kp = jax.random.split(key)
    x = jax.random.normal(kx, (bs, in_sea, dim_in), jnp.float32)
    params = make_params(kp, dim_in=dim_in, dim_out=dim_out, in_sea=in_sea,
                         out_seq=out_seq, n_neurons=n_neurons)

    ref = jax.block_until_ready(reference(x, params))

    def max_rel_err(a, b):
        return float(jnp.max(jnp.abs(a - b)) / (jnp.max(jnp.abs(b)) + 1e-9))

    # single grid step (tile covers the whole padded batch), f32 MXU operands
    out_f32 = jax.block_until_ready(
        res_decoder_pallas(x, params, block_batch=64, mxu_dtype=jnp.float32))
    assert out_f32.shape == (bs, out_seq, dim_out), out_f32.shape
    assert max_rel_err(out_f32, ref) < 3e-2, max_rel_err(out_f32, ref)

    # two grid steps (exercises batch tiling + padding), bf16 MXU operands / f32 accumulation
    out_bf16 = jax.block_until_ready(
        res_decoder_pallas(x, params, block_batch=8, mxu_dtype=jnp.bfloat16))
    assert out_bf16.shape == (bs, out_seq, dim_out), out_bf16.shape
    assert max_rel_err(out_bf16, ref) < 1e-1, max_rel_err(out_bf16, ref)

    print("KERNEL_OK")
</pallas_src>

<mosaic_0001>
module attributes {stable_mosaic.version = 11 : i64} {
  func.func @kernel(%arg0: i32, %arg1: memref<1x16x32xf32, #tpu.memory_space<vmem>>, %arg2: memref<224x32xf32, #tpu.memory_space<vmem>>, %arg3: memref<416x64xf32, #tpu.memory_space<vmem>>, %arg4: memref<96x128xf32, #tpu.memory_space<vmem>>, %arg5: memref<80x32xf32, #tpu.memory_space<vmem>>, %arg6: memref<112x64xf32, #tpu.memory_space<vmem>>, %arg7: memref<32x128xf32, #tpu.memory_space<vmem>>, %arg8: memref<128x128xf32, #tpu.memory_space<vmem>>) attributes {dimension_semantics = [#tpu.dimension_semantics<parallel>], iteration_bounds = array<i64: 1>, scalar_prefetch = 0 : i64, scratch_operands = 0 : i64, tpu.core_type = #tpu.core_type<tc>, window_params = [{transform_indices = @transform_0, window_bounds = array<i64: 1, 16, 32>}, {pipeline_mode = #tpu.pipeline_mode<synchronous>, transform_indices = @transform_1, window_bounds = array<i64: 224, 32>}, {pipeline_mode = #tpu.pipeline_mode<synchronous>, transform_indices = @transform_2, window_bounds = array<i64: 416, 64>}, {pipeline_mode = #tpu.pipeline_mode<synchronous>, transform_indices = @transform_3, window_bounds = array<i64: 96, 128>}, {pipeline_mode = #tpu.pipeline_mode<synchronous>, transform_indices = @transform_4, window_bounds = array<i64: 80, 32>}, {pipeline_mode = #tpu.pipeline_mode<synchronous>, transform_indices = @transform_5, window_bounds = array<i64: 112, 64>}, {pipeline_mode = #tpu.pipeline_mode<synchronous>, transform_indices = @transform_6, window_bounds = array<i64: 32, 128>}, {transform_indices = @transform_7, window_bounds = array<i64: 128, 128>}]} {
    %c16 = arith.constant 16 : index
    %c0 = arith.constant 0 : index
    %0 = vector.load %arg5[%c16, %c0] : memref<80x32xf32, #tpu.memory_space<vmem>>, vector<8x32xf32>
    %1 = vector.shape_cast %0 : vector<8x32xf32> to vector<8x1x32xf32>
    %c0_0 = arith.constant 0 : index
    %c0_1 = arith.constant 0 : index
    %c0_2 = arith.constant 0 : index
    %2 = vector.load %arg1[%c0_0, %c0_1, %c0_2] : memref<1x16x32xf32, #tpu.memory_space<vmem>>, vector<1x16x32xf32>
    %3 = vector.shape_cast %2 : vector<1x16x32xf32> to vector<16x32xf32>
    %4 = vector.shape_cast %3 : vector<16x32xf32> to vector<1x16x32xf32>
    %c0_3 = arith.constant 0 : index
    %c0_4 = arith.constant 0 : index
    %5 = vector.load %arg5[%c0_3, %c0_4] : memref<80x32xf32, #tpu.memory_space<vmem>>, vector<8x32xf32>
    %6 = vector.shape_cast %5 : vector<8x32xf32> to vector<8x1x32xf32>
    %7 = vector.broadcast %6 : vector<8x1x32xf32> to vector<8x16x32xf32>
    %8 = vector.broadcast %4 : vector<1x16x32xf32> to vector<8x16x32xf32>
    %9 = arith.mulf %7, %8 : vector<8x16x32xf32>
    %10 = vector.broadcast %1 : vector<8x1x32xf32> to vector<8x16x32xf32>
    %11 = arith.addf %10, %9 : vector<8x16x32xf32>
    %12 = vector.shape_cast %11 : vector<8x16x32xf32> to vector<128x32xf32>
    %c0_5 = arith.constant 0 : index
    %c0_6 = arith.constant 0 : index
    %13 = vector.load %arg4[%c0_5, %c0_6] : memref<96x128xf32, #tpu.memory_space<vmem>>, vector<32x128xf32>
    %cst = arith.constant dense<0.000000e+00> : vector<128x128xf32>
    %14 = tpu.matmul %12, %13, %cst {dimension_numbers = #tpu.dot_dimension_numbers<[1], [0], [0], [1], [0, 0, 1, 1], [], []>} : vector<128x32xf32>, vector<32x128xf32>, vector<128x128xf32> -> vector<128x128xf32>
    %c0_7 = arith.constant 0 : index
    %c0_8 = arith.constant 0 : index
    %15 = vector.load %arg7[%c0_7, %c0_8] : memref<32x128xf32, #tpu.memory_space<vmem>>, vector<1x128xf32>
    %16 = vector.broadcast %15 : vector<1x128xf32> to vector<128x128xf32>
    %17 = arith.addf %14, %16 : vector<128x128xf32>
    %cst_9 = arith.constant 2.000000e-01 : f32
    %18 = vector.broadcast %cst_9 : f32 to vector<128x128xf32>
    %19 = arith.mulf %18, %17 : vector<128x128xf32>
    %20 = arith.maximumf %17, %19 : vector<128x128xf32>
    %c0_10 = arith.constant 0 : index
    %c0_11 = arith.constant 0 : index
    %21 = vector.load %arg3[%c0_10, %c0_11] : memref<416x64xf32, #tpu.memory_space<vmem>>, vector<128x64xf32>
    %cst_12 = arith.constant dense<0.000000e+00> : vector<128x64xf32>
    %22 = tpu.matmul %20, %21, %cst_12 {dimension_numbers = #tpu.dot_dimension_numbers<[1], [0], [0], [1], [0, 0, 1, 1], [], []>} : vector<128x128xf32>, vector<128x64xf32>, vector<128x64xf32> -> vector<128x64xf32>
    %c0_13 = arith.constant 0 : index
    %c0_14 = arith.constant 0 : index
    %23 = vector.load %arg6[%c0_13, %c0_14] : memref<112x64xf32, #tpu.memory_space<vmem>>, vector<1x64xf32>
    %24 = vector.broadcast %23 : vector<1x64xf32> to vector<128x64xf32>
    %25 = arith.addf %22, %24 : vector<128x64xf32>
    %c128 = arith.constant 128 : index
    %c0_15 = arith.constant 0 : index
    %26 = vector.load %arg3[%c128, %c0_15] : memref<416x64xf32, #tpu.memory_space<vmem>>, vector<32x64xf32>
    %cst_16 = arith.constant dense<0.000000e+00> : vector<128x64xf32>
    %27 = tpu.matmul %12, %26, %cst_16 {dimension_numbers = #tpu.dot_dimension_numbers<[1], [0], [0], [1], [0, 0, 1, 1], [], []>} : vector<128x32xf32>, vector<32x64xf32>, vector<128x64xf32> -> vector<128x64xf32>
    %c16_17 = arith.constant 16 : index
    %c0_18 = arith.constant 0 : index
    %28 = vector.load %arg6[%c16_17, %c0_18] : memref<112x64xf32, #tpu.memory_space<vmem>>, vector<1x64xf32>
    %29 = vector.broadcast %28 : vector<1x64xf32> to vector<128x64xf32>
    %30 = arith.addf %27, %29 : vector<128x64xf32>
    %cst_19 = arith.constant 2.000000e-01 : f32
    %31 = vector.broadcast %cst_19 : f32 to vector<128x64xf32>
    %32 = arith.mulf %31, %30 : vector<128x64xf32>
    %33 = arith.maximumf %30, %32 : vector<128x64xf32>
    %34 = arith.addf %33, %25 : vector<128x64xf32>
    %cst_20 = arith.constant 2.000000e-01 : f32
    %35 = vector.broadcast %cst_20 : f32 to vector<128x64xf32>
    %36 = arith.mulf %35, %34 : vector<128x64xf32>
    %37 = arith.maximumf %34, %36 : vector<128x64xf32>
    %c160 = arith.constant 160 : index
    %c0_21 = arith.constant 0 : index
    %38 = vector.load %arg3[%c160, %c0_21] : memref<416x64xf32, #tpu.memory_space<vmem>>, vector<32x64xf32>
    %cst_22 = arith.constant dense<0.000000e+00> : vector<128x64xf32>
    %39 = tpu.matmul %12, %38, %cst_22 {dimension_numbers = #tpu.dot_dimension_numbers<[1], [0], [0], [1], [0, 0, 1, 1], [], []>} : vector<128x32xf32>, vector<32x64xf32>, vector<128x64xf32> -> vector<128x64xf32>
    %c192 = arith.constant 192 : index
    %c0_23 = arith.constant 0 : index
    %40 = vector.load %arg3[%c192, %c0_23] : memref<416x64xf32, #tpu.memory_space<vmem>>, vector<64x64xf32>
    %cst_24 = arith.constant dense<0.000000e+00> : vector<128x64xf32>
    %41 = tpu.matmul %37, %40, %cst_24 {dimension_numbers = #tpu.dot_dimension_numbers<[1], [0], [0], [1], [0, 0, 1, 1], [], []>} : vector<128x64xf32>, vector<64x64xf32>, vector<128x64xf32> -> vector<128x64xf32>
    %42 = arith.addf %39, %41 : vector<128x64xf32>
    %c32 = arith.constant 32 : index
    %c0_25 = arith.constant 0 : index
    %43 = vector.load %arg6[%c32, %c0_25] : memref<112x64xf32, #tpu.memory_space<vmem>>, vector<1x64xf32>
    %44 = vector.broadcast %43 : vector<1x64xf32> to vector<128x64xf32>
    %45 = arith.addf %42, %44 : vector<128x64xf32>
    %cst_26 = arith.constant 2.000000e-01 : f32
    %46 = vector.broadcast %cst_26 : f32 to vector<128x64xf32>
    %47 = arith.mulf %46, %45 : vector<128x64xf32>
    %48 = arith.maximumf %45, %47 : vector<128x64xf32>
    %c0_27 = arith.constant 0 : index
    %c0_28 = arith.constant 0 : index
    %49 = vector.load %arg2[%c0_27, %c0_28] : memref<224x32xf32, #tpu.memory_space<vmem>>, vector<64x32xf32>
    %cst_29 = arith.constant dense<0.000000e+00> : vector<128x32xf32>
    %50 = tpu.matmul %48, %49, %cst_29 {dimension_numbers = #tpu.dot_dimension_numbers<[1], [0], [0], [1], [0, 0, 1, 1], [], []>} : vector<128x64xf32>, vector<64x32xf32>, vector<128x32xf32> -> vector<128x32xf32>
    %c32_30 = arith.constant 32 : index
    %c0_31 = arith.constant 0 : index
    %51 = vector.load %arg5[%c32_30, %c0_31] : memref<80x32xf32, #tpu.memory_space<vmem>>, vector<1x32xf32>
    %52 = vector.broadcast %51 : vector<1x32xf32> to vector<128x32xf32>
    %53 = arith.addf %50, %52 : vector<128x32xf32>
    %c64 = arith.constant 64 : index
    %c0_32 = arith.constant 0 : index
    %54 = vector.load %arg2[%c64, %c0_32] : memref<224x32xf32, #tpu.memory_space<vmem>>, vector<32x32xf32>
    %cst_33 = arith.constant dense<0.000000e+00> : vector<128x32xf32>
    %55 = tpu.matmul %12, %54, %cst_33 {dimension_numbers = #tpu.dot_dimension_numbers<[1], [0], [0], [1], [0, 0, 1, 1], [], []>} : vector<128x32xf32>, vector<32x32xf32>, vector<128x32xf32> -> vector<128x32xf32>
    %c96 = arith.constant 96 : index
    %c0_34 = arith.constant 0 : index
    %56 = vector.load %arg2[%c96, %c0_34] : memref<224x32xf32, #tpu.memory_space<vmem>>, vector<64x32xf32>
    %cst_35 = arith.constant dense<0.000000e+00> : vector<128x32xf32>
    %57 = tpu.matmul %37, %56, %cst_35 {dimension_numbers = #tpu.dot_dimension_numbers<[1], [0], [0], [1], [0, 0, 1, 1], [], []>} : vector<128x64xf32>, vector<64x32xf32>, vector<128x32xf32> -> vector<128x32xf32>
    %58 = arith.addf %55, %57 : vector<128x32xf32>
    %c48 = arith.constant 48 : index
    %c0_36 = arith.constant 0 : index
    %59 = vector.load %arg5[%c48, %c0_36] : memref<80x32xf32, #tpu.memory_space<vmem>>, vector<1x32xf32>
    %60 = vector.broadcast %59 : vector<1x32xf32> to vector<128x32xf32>
    %61 = arith.addf %58, %60 : vector<128x32xf32>
    %cst_37 = arith.constant 2.000000e-01 : f32
    %62 = vector.broadcast %cst_37 : f32 to vector<128x32xf32>
    %63 = arith.mulf %62, %61 : vector<128x32xf32>
    %64 = arith.maximumf %61, %63 : vector<128x32xf32>
    %65 = arith.addf %64, %53 : vector<128x32xf32>
    %cst_38 = arith.constant 2.000000e-01 : f32
    %66 = vector.broadcast %cst_38 : f32 to vector<128x32xf32>
    %67 = arith.mulf %66, %65 : vector<128x32xf32>
    %68 = arith.maximumf %65, %67 : vector<128x32xf32>
    %c256 = arith.constant 256 : index
    %c0_39 = arith.constant 0 : index
    %69 = vector.load %arg3[%c256, %c0_39] : memref<416x64xf32, #tpu.memory_space<vmem>>, vector<32x64xf32>
    %cst_40 = arith.constant dense<0.000000e+00> : vector<128x64xf32>
    %70 = tpu.matmul %68, %69, %cst_40 {dimension_numbers = #tpu.dot_dimension_numbers<[1], [0], [0], [1], [0, 0, 1, 1], [], []>} : vector<128x32xf32>, vector<32x64xf32>, vector<128x64xf32> -> vector<128x64xf32>
    %c48_41 = arith.constant 48 : index
    %c0_42 = arith.constant 0 : index
    %71 = vector.load %arg6[%c48_41, %c0_42] : memref<112x64xf32, #tpu.memory_space<vmem>>, vector<1x64xf32>
    %72 = vector.broadcast %71 : vector<1x64xf32> to vector<128x64xf32>
    %73 = arith.addf %70, %72 : vector<128x64xf32>
    %cst_43 = arith.constant 2.000000e-01 : f32
    %74 = vector.broadcast %cst_43 : f32 to vector<128x64xf32>
    %75 = arith.mulf %74, %73 : vector<128x64xf32>
    %76 = arith.maximumf %73, %75 : vector<128x64xf32>
    %c160_44 = arith.constant 160 : index
    %c0_45 = arith.constant 0 : index
    %77 = vector.load %arg2[%c160_44, %c0_45] : memref<224x32xf32, #tpu.memory_space<vmem>>, vector<64x32xf32>
    %cst_46 = arith.constant dense<0.000000e+00> : vector<128x32xf32>
    %78 = tpu.matmul %76, %77, %cst_46 {dimension_numbers = #tpu.dot_dimension_numbers<[1], [0], [0], [1], [0, 0, 1, 1], [], []>} : vector<128x64xf32>, vector<64x32xf32>, vector<128x32xf32> -> vector<128x32xf32>
    %c64_47 = arith.constant 64 : index
    %c0_48 = arith.constant 0 : index
    %79 = vector.load %arg5[%c64_47, %c0_48] : memref<80x32xf32, #tpu.memory_space<vmem>>, vector<1x32xf32>
    %80 = vector.broadcast %79 : vector<1x32xf32> to vector<128x32xf32>
    %81 = arith.addf %78, %80 : vector<128x32xf32>
    %82 = arith.addf %68, %81 : vector<128x32xf32>
    %c288 = arith.constant 288 : index
    %c0_49 = arith.constant 0 : index
    %83 = vector.load %arg3[%c288, %c0_49] : memref<416x64xf32, #tpu.memory_space<vmem>>, vector<32x64xf32>
    %cst_50 = arith.constant dense<0.000000e+00> : vector<128x64xf32>
    %84 = tpu.matmul %82, %83, %cst_50 {dimension_numbers = #tpu.dot_dimension_numbers<[1], [0], [0], [1], [0, 0, 1, 1], [], []>} : vector<128x32xf32>, vector<32x64xf32>, vector<128x64xf32> -> vector<128x64xf32>
    %c64_51 = arith.constant 64 : index
    %c0_52 = arith.constant 0 : index
    %85 = vector.load %arg6[%c64_51, %c0_52] : memref<112x64xf32, #tpu.memory_space<vmem>>, vector<1x64xf32>
    %86 = vector.broadcast %85 : vector<1x64xf32> to vector<128x64xf32>
    %87 = arith.addf %84, %86 : vector<128x64xf32>
    %cst_53 = arith.constant 2.000000e-01 : f32
    %88 = vector.broadcast %cst_53 : f32 to vector<128x64xf32>
    %89 = arith.mulf %88, %87 : vector<128x64xf32>
    %90 = arith.maximumf %87, %89 : vector<128x64xf32>
    %c320 = arith.constant 320 : index
    %c0_54 = arith.constant 0 : index
    %91 = vector.load %arg3[%c320, %c0_54] : memref<416x64xf32, #tpu.memory_space<vmem>>, vector<64x64xf32>
    %cst_55 = arith.constant dense<0.000000e+00> : vector<128x64xf32>
    %92 = tpu.matmul %90, %91, %cst_55 {dimension_numbers = #tpu.dot_dimension_numbers<[1], [0], [0], [1], [0, 0, 1, 1], [], []>} : vector<128x64xf32>, vector<64x64xf32>, vector<128x64xf32> -> vector<128x64xf32>
    %c80 = arith.constant 80 : index
    %c0_56 = arith.constant 0 : index
    %93 = vector.load %arg6[%c80, %c0_56] : memref<112x64xf32, #tpu.memory_space<vmem>>, vector<1x64xf32>
    %94 = vector.broadcast %93 : vector<1x64xf32> to vector<128x64xf32>
    %95 = arith.addf %92, %94 : vector<128x64xf32>
    %c384 = arith.constant 384 : index
    %c0_57 = arith.constant 0 : index
    %96 = vector.load %arg3[%c384, %c0_57] : memref<416x64xf32, #tpu.memory_space<vmem>>, vector<32x64xf32>
    %cst_58 = arith.constant dense<0.000000e+00> : vector<128x64xf32>
    %97 = tpu.matmul %82, %96, %cst_58 {dimension_numbers = #tpu.dot_dimension_numbers<[1], [0], [0], [1], [0, 0, 1, 1], [], []>} : vector<128x32xf32>, vector<32x64xf32>, vector<128x64xf32> -> vector<128x64xf32>
    %c96_59 = arith.constant 96 : index
    %c0_60 = arith.constant 0 : index
    %98 = vector.load %arg6[%c96_59, %c0_60] : memref<112x64xf32, #tpu.memory_space<vmem>>, vector<1x64xf32>
    %99 = vector.broadcast %98 : vector<1x64xf32> to vector<128x64xf32>
    %100 = arith.addf %97, %99 : vector<128x64xf32>
    %cst_61 = arith.constant 2.000000e-01 : f32
    %101 = vector.broadcast %cst_61 : f32 to vector<128x64xf32>
    %102 = arith.mulf %101, %100 : vector<128x64xf32>
    %103 = arith.maximumf %100, %102 : vector<128x64xf32>
    %104 = arith.addf %103, %95 : vector<128x64xf32>
    %c32_62 = arith.constant 32 : index
    %c0_63 = arith.constant 0 : index
    %105 = vector.load %arg4[%c32_62, %c0_63] : memref<96x128xf32, #tpu.memory_space<vmem>>, vector<64x128xf32>
    %cst_64 = arith.constant dense<0.000000e+00> : vector<128x128xf32>
    %106 = tpu.matmul %104, %105, %cst_64 {dimension_numbers = #tpu.dot_dimension_numbers<[1], [0], [0], [1], [0, 0, 1, 1], [], []>} : vector<128x64xf32>, vector<64x128xf32>, vector<128x128xf32> -> vector<128x128xf32>
    %c16_65 = arith.constant 16 : index
    %c0_66 = arith.constant 0 : index
    %107 = vector.load %arg7[%c16_65, %c0_66] : memref<32x128xf32, #tpu.memory_space<vmem>>, vector<1x128xf32>
    %108 = vector.broadcast %107 : vector<1x128xf32> to vector<128x128xf32>
    %109 = arith.addf %106, %108 : vector<128x128xf32>
    %c0_67 = arith.constant 0 : index
    %c0_68 = arith.constant 0 : index
    %110 = vector.load %arg8[%c0_67, %c0_68] : memref<128x128xf32, #tpu.memory_space<vmem>>, vector<128x128xf32>
    tpu.vector_store %arg8[%c0_67, %c0_68], %109 {strides = array<i32>} : memref<128x128xf32, #tpu.memory_space<vmem>>, vector<128x128xf32>,
    return
  }
  func.func @transform_0(%arg0: i32) -> (i32, i32, i32) {
    %c0_i32 = arith.constant 0 : i32
    %c0_i32_0 = arith.constant 0 : i32
    %c0_i32_1 = arith.constant 0 : i32
    return %c0_i32, %arg0, %c0_i32_0 : i32, i32, i32
  }
  func.func @transform_1(%arg0: i32) -> (i32, i32) {
    %c0_i32 = arith.constant 0 : i32
    %c0_i32_0 = arith.constant 0 : i32
    %c0_i32_1 = arith.constant 0 : i32
    return %c0_i32, %c0_i32_0 : i32, i32
  }
  func.func @transform_2(%arg0: i32) -> (i32, i32) {
    %c0_i32 = arith.constant 0 : i32
    %c0_i32_0 = arith.constant 0 : i32
    %c0_i32_1 = arith.constant 0 : i32
    return %c0_i32, %c0_i32_0 : i32, i32
  }
  func.func @transform_3(%arg0: i32) -> (i32, i32) {
    %c0_i32 = arith.constant 0 : i32
    %c0_i32_0 = arith.constant 0 : i32
    %c0_i32_1 = arith.constant 0 : i32
    return %c0_i32, %c0_i32_0 : i32, i32
  }
  func.func @transform_4(%arg0: i32) -> (i32, i32) {
    %c0_i32 = arith.constant 0 : i32
    %c0_i32_0 = arith.constant 0 : i32
    %c0_i32_1 = arith.constant 0 : i32
    return %c0_i32, %c0_i32_0 : i32, i32
  }
  func.func @transform_5(%arg0: i32) -> (i32, i32) {
    %c0_i32 = arith.constant 0 : i32
    %c0_i32_0 = arith.constant 0 : i32
    %c0_i32_1 = arith.constant 0 : i32
    return %c0_i32, %c0_i32_0 : i32, i32
  }
  func.func @transform_6(%arg0: i32) -> (i32, i32) {
    %c0_i32 = arith.constant 0 : i32
    %c0_i32_0 = arith.constant 0 : i32
    %c0_i32_1 = arith.constant 0 : i32
    return %c0_i32, %c0_i32_0 : i32, i32
  }
  func.func @transform_7(%arg0: i32) -> (i32, i32) {
    %c0_i32 = arith.constant 0 : i32
    %c0_i32_0 = arith.constant 0 : i32
    return %arg0, %c0_i32 : i32, i32
  }
}

module attributes {stable_mosaic.version = 11 : i64} {
  func.func @kernel(%arg0: i32, %arg1: memref<1x16x32xf32, #tpu.memory_space<vmem>>, %arg2: memref<224x32xf32, #tpu.memory_space<vmem>>, %arg3: memref<416x64xf32, #tpu.memory_space<vmem>>, %arg4: memref<96x128xf32, #tpu.memory_space<vmem>>, %arg5: memref<80x32xf32, #tpu.memory_space<vmem>>, %arg6: memref<112x64xf32, #tpu.memory_space<vmem>>, %arg7: memref<32x128xf32, #tpu.memory_space<vmem>>, %arg8: memref<128x128xf32, #tpu.memory_space<vmem>>) attributes {dimension_semantics = [#tpu.dimension_semantics<parallel>], iteration_bounds = array<i64: 1>, scalar_prefetch = 0 : i64, scratch_operands = 0 : i64, tpu.core_type = #tpu.core_type<tc>, window_params = [{transform_indices = @transform_0, window_bounds = array<i64: 1, 16, 32>}, {pipeline_mode = #tpu.pipeline_mode<synchronous>, transform_indices = @transform_1, window_bounds = array<i64: 224, 32>}, {pipeline_mode = #tpu.pipeline_mode<synchronous>, transform_indices = @transform_2, window_bounds = array<i64: 416, 64>}, {pipeline_mode = #tpu.pipeline_mode<synchronous>, transform_indices = @transform_3, window_bounds = array<i64: 96, 128>}, {pipeline_mode = #tpu.pipeline_mode<synchronous>, transform_indices = @transform_4, window_bounds = array<i64: 80, 32>}, {pipeline_mode = #tpu.pipeline_mode<synchronous>, transform_indices = @transform_5, window_bounds = array<i64: 112, 64>}, {pipeline_mode = #tpu.pipeline_mode<synchronous>, transform_indices = @transform_6, window_bounds = array<i64: 32, 128>}, {transform_indices = @transform_7, window_bounds = array<i64: 128, 128>}]} {
    %c16 = arith.constant 16 : index
    %c0 = arith.constant 0 : index
    %0 = vector.load %arg5[%c16, %c0] : memref<80x32xf32, #tpu.memory_space<vmem>>, vector<8x32xf32>
    %1 = vector.shape_cast %0 : vector<8x32xf32> to vector<8x1x32xf32>
    %c0_0 = arith.constant 0 : index
    %c0_1 = arith.constant 0 : index
    %c0_2 = arith.constant 0 : index
    %2 = vector.load %arg1[%c0_0, %c0_1, %c0_2] : memref<1x16x32xf32, #tpu.memory_space<vmem>>, vector<1x16x32xf32>
    %3 = vector.shape_cast %2 : vector<1x16x32xf32> to vector<16x32xf32>
    %4 = vector.shape_cast %3 : vector<16x32xf32> to vector<1x16x32xf32>
    %c0_3 = arith.constant 0 : index
    %c0_4 = arith.constant 0 : index
    %5 = vector.load %arg5[%c0_3, %c0_4] : memref<80x32xf32, #tpu.memory_space<vmem>>, vector<8x32xf32>
    %6 = vector.shape_cast %5 : vector<8x32xf32> to vector<8x1x32xf32>
    %7 = vector.broadcast %6 : vector<8x1x32xf32> to vector<8x16x32xf32>
    %8 = vector.broadcast %4 : vector<1x16x32xf32> to vector<8x16x32xf32>
    %9 = arith.mulf %7, %8 : vector<8x16x32xf32>
    %10 = vector.broadcast %1 : vector<8x1x32xf32> to vector<8x16x32xf32>
    %11 = arith.addf %10, %9 : vector<8x16x32xf32>
    %12 = vector.shape_cast %11 : vector<8x16x32xf32> to vector<128x32xf32>
    %c0_5 = arith.constant 0 : index
    %c0_6 = arith.constant 0 : index
    %13 = vector.load %arg4[%c0_5, %c0_6] : memref<96x128xf32, #tpu.memory_space<vmem>>, vector<32x128xf32>
    %cst = arith.constant dense<0.000000e+00> : vector<128x128xf32>
    %14 = tpu.matmul %12, %13, %cst {dimension_numbers = #tpu.dot_dimension_numbers<[1], [0], [0], [1], [0, 0, 1, 1], [], []>} : vector<128x32xf32>, vector<32x128xf32>, vector<128x128xf32> -> vector<128x128xf32>
    %c0_7 = arith.constant 0 : index
    %c0_8 = arith.constant 0 : index
    %15 = vector.load %arg7[%c0_7, %c0_8] : memref<32x128xf32, #tpu.memory_space<vmem>>, vector<1x128xf32>
    %16 = vector.broadcast %15 : vector<1x128xf32> to vector<128x128xf32>
    %17 = arith.addf %14, %16 : vector<128x128xf32>
    %cst_9 = arith.constant 2.000000e-01 : f32
    %18 = vector.broadcast %cst_9 : f32 to vector<128x128xf32>
    %19 = arith.mulf %18, %17 : vector<128x128xf32>
    %20 = arith.maximumf %17, %19 : vector<128x128xf32>
    %c0_10 = arith.constant 0 : index
    %c0_11 = arith.constant 0 : index
    %21 = vector.load %arg3[%c0_10, %c0_11] : memref<416x64xf32, #tpu.memory_space<vmem>>, vector<128x64xf32>
    %cst_12 = arith.constant dense<0.000000e+00> : vector<128x64xf32>
    %22 = tpu.matmul %20, %21, %cst_12 {dimension_numbers = #tpu.dot_dimension_numbers<[1], [0], [0], [1], [0, 0, 1, 1], [], []>} : vector<128x128xf32>, vector<128x64xf32>, vector<128x64xf32> -> vector<128x64xf32>
    %c0_13 = arith.constant 0 : index
    %c0_14 = arith.constant 0 : index
    %23 = vector.load %arg6[%c0_13, %c0_14] : memref<112x64xf32, #tpu.memory_space<vmem>>, vector<1x64xf32>
    %24 = vector.broadcast %23 : vector<1x64xf32> to vector<128x64xf32>
    %25 = arith.addf %22, %24 : vector<128x64xf32>
    %c128 = arith.constant 128 : index
    %c0_15 = arith.constant 0 : index
    %26 = vector.load %arg3[%c128, %c0_15] : memref<416x64xf32, #tpu.memory_space<vmem>>, vector<32x64xf32>
    %cst_16 = arith.constant dense<0.000000e+00> : vector<128x64xf32>
    %27 = tpu.matmul %12, %26, %cst_16 {dimension_numbers = #tpu.dot_dimension_numbers<[1], [0], [0], [1], [0, 0, 1, 1], [], []>} : vector<128x32xf32>, vector<32x64xf32>, vector<128x64xf32> -> vector<128x64xf32>
    %c16_17 = arith.constant 16 : index
    %c0_18 = arith.constant 0 : index
    %28 = vector.load %arg6[%c16_17, %c0_18] : memref<112x64xf32, #tpu.memory_space<vmem>>, vector<1x64xf32>
    %29 = vector.broadcast %28 : vector<1x64xf32> to vector<128x64xf32>
    %30 = arith.addf %27, %29 : vector<128x64xf32>
    %cst_19 = arith.constant 2.000000e-01 : f32
    %31 = vector.broadcast %cst_19 : f32 to vector<128x64xf32>
    %32 = arith.mulf %31, %30 : vector<128x64xf32>
    %33 = arith.maximumf %30, %32 : vector<128x64xf32>
    %34 = arith.addf %33, %25 : vector<128x64xf32>
    %cst_20 = arith.constant 2.000000e-01 : f32
    %35 = vector.broadcast %cst_20 : f32 to vector<128x64xf32>
    %36 = arith.mulf %35, %34 : vector<128x64xf32>
    %37 = arith.maximumf %34, %36 : vector<128x64xf32>
    %c160 = arith.constant 160 : index
    %c0_21 = arith.constant 0 : index
    %38 = vector.load %arg3[%c160, %c0_21] : memref<416x64xf32, #tpu.memory_space<vmem>>, vector<32x64xf32>
    %cst_22 = arith.constant dense<0.000000e+00> : vector<128x64xf32>
    %39 = tpu.matmul %12, %38, %cst_22 {dimension_numbers = #tpu.dot_dimension_numbers<[1], [0], [0], [1], [0, 0, 1, 1], [], []>} : vector<128x32xf32>, vector<32x64xf32>, vector<128x64xf32> -> vector<128x64xf32>
    %c192 = arith.constant 192 : index
    %c0_23 = arith.constant 0 : index
    %40 = vector.load %arg3[%c192, %c0_23] : memref<416x64xf32, #tpu.memory_space<vmem>>, vector<64x64xf32>
    %cst_24 = arith.constant dense<0.000000e+00> : vector<128x64xf32>
    %41 = tpu.matmul %37, %40, %cst_24 {dimension_numbers = #tpu.dot_dimension_numbers<[1], [0], [0], [1], [0, 0, 1, 1], [], []>} : vector<128x64xf32>, vector<64x64xf32>, vector<128x64xf32> -> vector<128x64xf32>
    %42 = arith.addf %39, %41 : vector<128x64xf32>
    %c32 = arith.constant 32 : index
    %c0_25 = arith.constant 0 : index
    %43 = vector.load %arg6[%c32, %c0_25] : memref<112x64xf32, #tpu.memory_space<vmem>>, vector<1x64xf32>
    %44 = vector.broadcast %43 : vector<1x64xf32> to vector<128x64xf32>
    %45 = arith.addf %42, %44 : vector<128x64xf32>
    %cst_26 = arith.constant 2.000000e-01 : f32
    %46 = vector.broadcast %cst_26 : f32 to vector<128x64xf32>
    %47 = arith.mulf %46, %45 : vector<128x64xf32>
    %48 = arith.maximumf %45, %47 : vector<128x64xf32>
    %c0_27 = arith.constant 0 : index
    %c0_28 = arith.constant 0 : index
    %49 = vector.load %arg2[%c0_27, %c0_28] : memref<224x32xf32, #tpu.memory_space<vmem>>, vector<64x32xf32>
    %cst_29 = arith.constant dense<0.000000e+00> : vector<128x32xf32>
    %50 = tpu.matmul %48, %49, %cst_29 {dimension_numbers = #tpu.dot_dimension_numbers<[1], [0], [0], [1], [0, 0, 1, 1], [], []>} : vector<128x64xf32>, vector<64x32xf32>, vector<128x32xf32> -> vector<128x32xf32>
    %c32_30 = arith.constant 32 : index
    %c0_31 = arith.constant 0 : index
    %51 = vector.load %arg5[%c32_30, %c0_31] : memref<80x32xf32, #tpu.memory_space<vmem>>, vector<1x32xf32>
    %52 = vector.broadcast %51 : vector<1x32xf32> to vector<128x32xf32>
    %53 = arith.addf %50, %52 : vector<128x32xf32>
    %c64 = arith.constant 64 : index
    %c0_32 = arith.constant 0 : index
    %54 = vector.load %arg2[%c64, %c0_32] : memref<224x32xf32, #tpu.memory_space<vmem>>, vector<32x32xf32>
    %cst_33 = arith.constant dense<0.000000e+00> : vector<128x32xf32>
    %55 = tpu.matmul %12, %54, %cst_33 {dimension_numbers = #tpu.dot_dimension_numbers<[1], [0], [0], [1], [0, 0, 1, 1], [], []>} : vector<128x32xf32>, vector<32x32xf32>, vector<128x32xf32> -> vector<128x32xf32>
    %c96 = arith.constant 96 : index
    %c0_34 = arith.constant 0 : index
    %56 = vector.load %arg2[%c96, %c0_34] : memref<224x32xf32, #tpu.memory_space<vmem>>, vector<64x32xf32>
    %cst_35 = arith.constant dense<0.000000e+00> : vector<128x32xf32>
    %57 = tpu.matmul %37, %56, %cst_35 {dimension_numbers = #tpu.dot_dimension_numbers<[1], [0], [0], [1], [0, 0, 1, 1], [], []>} : vector<128x64xf32>, vector<64x32xf32>, vector<128x32xf32> -> vector<128x32xf32>
    %58 = arith.addf %55, %57 : vector<128x32xf32>
    %c48 = arith.constant 48 : index
    %c0_36 = arith.constant 0 : index
    %59 = vector.load %arg5[%c48, %c0_36] : memref<80x32xf32, #tpu.memory_space<vmem>>, vector<1x32xf32>
    %60 = vector.broadcast %59 : vector<1x32xf32> to vector<128x32xf32>
    %61 = arith.addf %58, %60 : vector<128x32xf32>
    %cst_37 = arith.constant 2.000000e-01 : f32
    %62 = vector.broadcast %cst_37 : f32 to vector<128x32xf32>
    %63 = arith.mulf %62, %61 : vector<128x32xf32>
    %64 = arith.maximumf %61, %63 : vector<128x32xf32>
    %65 = arith.addf %64, %53 : vector<128x32xf32>
    %cst_38 = arith.constant 2.000000e-01 : f32
    %66 = vector.broadcast %cst_38 : f32 to vector<128x32xf32>
    %67 = arith.mulf %66, %65 : vector<128x32xf32>
    %68 = arith.maximumf %65, %67 : vector<128x32xf32>
    %c256 = arith.constant 256 : index
    %c0_39 = arith.constant 0 : index
    %69 = vector.load %arg3[%c256, %c0_39] : memref<416x64xf32, #tpu.memory_space<vmem>>, vector<32x64xf32>
    %cst_40 = arith.constant dense<0.000000e+00> : vector<128x64xf32>
    %70 = tpu.matmul %68, %69, %cst_40 {dimension_numbers = #tpu.dot_dimension_numbers<[1], [0], [0], [1], [0, 0, 1, 1], [], []>} : vector<128x32xf32>, vector<32x64xf32>, vector<128x64xf32> -> vector<128x64xf32>
    %c48_41 = arith.constant 48 : index
    %c0_42 = arith.constant 0 : index
    %71 = vector.load %arg6[%c48_41, %c0_42] : memref<112x64xf32, #tpu.memory_space<vmem>>, vector<1x64xf32>
    %72 = vector.broadcast %71 : vector<1x64xf32> to vector<128x64xf32>
    %73 = arith.addf %70, %72 : vector<128x64xf32>
    %cst_43 = arith.constant 2.000000e-01 : f32
    %74 = vector.broadcast %cst_43 : f32 to vector<128x64xf32>
    %75 = arith.mulf %74, %73 : vector<128x64xf32>
    %76 = arith.maximumf %73, %75 : vector<128x64xf32>
    %c160_44 = arith.constant 160 : index
    %c0_45 = arith.constant 0 : index
    %77 = vector.load %arg2[%c160_44, %c0_45] : memref<224x32xf32, #tpu.memory_space<vmem>>, vector<64x32xf32>
    %cst_46 = arith.constant dense<0.000000e+00> : vector<128x32xf32>
    %78 = tpu.matmul %76, %77, %cst_46 {dimension_numbers = #tpu.dot_dimension_numbers<[1], [0], [0], [1], [0, 0, 1, 1], [], []>} : vector<128x64xf32>, vector<64x32xf32>, vector<128x32xf32> -> vector<128x32xf32>
    %c64_47 = arith.constant 64 : index
    %c0_48 = arith.constant 0 : index
    %79 = vector.load %arg5[%c64_47, %c0_48] : memref<80x32xf32, #tpu.memory_space<vmem>>, vector<1x32xf32>
    %80 = vector.broadcast %79 : vector<1x32xf32> to vector<128x32xf32>
    %81 = arith.addf %78, %80 : vector<128x32xf32>
    %82 = arith.addf %68, %81 : vector<128x32xf32>
    %c288 = arith.constant 288 : index
    %c0_49 = arith.constant 0 : index
    %83 = vector.load %arg3[%c288, %c0_49] : memref<416x64xf32, #tpu.memory_space<vmem>>, vector<32x64xf32>
    %cst_50 = arith.constant dense<0.000000e+00> : vector<128x64xf32>
    %84 = tpu.matmul %82, %83, %cst_50 {dimension_numbers = #tpu.dot_dimension_numbers<[1], [0], [0], [1], [0, 0, 1, 1], [], []>} : vector<128x32xf32>, vector<32x64xf32>, vector<128x64xf32> -> vector<128x64xf32>
    %c64_51 = arith.constant 64 : index
    %c0_52 = arith.constant 0 : index
    %85 = vector.load %arg6[%c64_51, %c0_52] : memref<112x64xf32, #tpu.memory_space<vmem>>, vector<1x64xf32>
    %86 = vector.broadcast %85 : vector<1x64xf32> to vector<128x64xf32>
    %87 = arith.addf %84, %86 : vector<128x64xf32>
    %cst_53 = arith.constant 2.000000e-01 : f32
    %88 = vector.broadcast %cst_53 : f32 to vector<128x64xf32>
    %89 = arith.mulf %88, %87 : vector<128x64xf32>
    %90 = arith.maximumf %87, %89 : vector<128x64xf32>
    %c320 = arith.constant 320 : index
    %c0_54 = arith.constant 0 : index
    %91 = vector.load %arg3[%c320, %c0_54] : memref<416x64xf32, #tpu.memory_space<vmem>>, vector<64x64xf32>
    %cst_55 = arith.constant dense<0.000000e+00> : vector<128x64xf32>
    %92 = tpu.matmul %90, %91, %cst_55 {dimension_numbers = #tpu.dot_dimension_numbers<[1], [0], [0], [1], [0, 0, 1, 1], [], []>} : vector<128x64xf32>, vector<64x64xf32>, vector<128x64xf32> -> vector<128x64xf32>
    %c80 = arith.constant 80 : index
    %c0_56 = arith.constant 0 : index
    %93 = vector.load %arg6[%c80, %c0_56] : memref<112x64xf32, #tpu.memory_space<vmem>>, vector<1x64xf32>
    %94 = vector.broadcast %93 : vector<1x64xf32> to vector<128x64xf32>
    %95 = arith.addf %92, %94 : vector<128x64xf32>
    %c384 = arith.constant 384 : index
    %c0_57 = arith.constant 0 : index
    %96 = vector.load %arg3[%c384, %c0_57] : memref<416x64xf32, #tpu.memory_space<vmem>>, vector<32x64xf32>
    %cst_58 = arith.constant dense<0.000000e+00> : vector<128x64xf32>
    %97 = tpu.matmul %82, %96, %cst_58 {dimension_numbers = #tpu.dot_dimension_numbers<[1], [0], [0], [1], [0, 0, 1, 1], [], []>} : vector<128x32xf32>, vector<32x64xf32>, vector<128x64xf32> -> vector<128x64xf32>
    %c96_59 = arith.constant 96 : index
    %c0_60 = arith.constant 0 : index
    %98 = vector.load %arg6[%c96_59, %c0_60] : memref<112x64xf32, #tpu.memory_space<vmem>>, vector<1x64xf32>
    %99 = vector.broadcast %98 : vector<1x64xf32> to vector<128x64xf32>
    %100 = arith.addf %97, %99 : vector<128x64xf32>
    %cst_61 = arith.constant 2.000000e-01 : f32
    %101 = vector.broadcast %cst_61 : f32 to vector<128x64xf32>
    %102 = arith.mulf %101, %100 : vector<128x64xf32>
    %103 = arith.maximumf %100, %102 : vector<128x64xf32>
    %104 = arith.addf %103, %95 : vector<128x64xf32>
    %c32_62 = arith.constant 32 : index
    %c0_63 = arith.constant 0 : index
    %105 = vector.load %arg4[%c32_62, %c0_63] : memref<96x128xf32, #tpu.memory_space<vmem>>, vector<64x128xf32>
    %cst_64 = arith.constant dense<0.000000e+00> : vector<128x128xf32>
    %106 = tpu.matmul %104, %105, %cst_64 {dimension_numbers = #tpu.dot_dimension_numbers<[1], [0], [0], [1], [0, 0, 1, 1], [], []>} : vector<128x64xf32>, vector<64x128xf32>, vector<128x128xf32> -> vector<128x128xf32>
    %c16_65 = arith.constant 16 : index
    %c0_66 = arith.constant 0 : index
    %107 = vector.load %arg7[%c16_65, %c0_66] : memref<32x128xf32, #tpu.memory_space<vmem>>, vector<1x128xf32>
    %108 = vector.broadcast %107 : vector<1x128xf32> to vector<128x128xf32>
    %109 = arith.addf %106, %108 : vector<128x128xf32>
    %c0_67 = arith.constant 0 : index
    %c0_68 = arith.constant 0 : index
    %110 = vector.load %arg8[%c0_67, %c0_68] : memref<128x128xf32, #tpu.memory_space<vmem>>, vector<128x128xf32>
    tpu.vector_store %arg8[%c0_67, %c0_68], %109 {strides = array<i32>} : memref<128x128xf32, #tpu.memory_space<vmem>>, vector<128x128xf32>,
    return
  }
  func.func @transform_0(%arg0: i32) -> (i32, i32, i32) {
    %c0_i32 = arith.constant 0 : i32
    %c0_i32_0 = arith.constant 0 : i32
    %c0_i32_1 = arith.constant 0 : i32
    return %c0_i32, %arg0, %c0_i32_0 : i32, i32, i32
  }
  func.func @transform_1(%arg0: i32) -> (i32, i32) {
    %c0_i32 = arith.constant 0 : i32
    %c0_i32_0 = arith.constant 0 : i32
    %c0_i32_1 = arith.constant 0 : i32
    return %c0_i32, %c0_i32_0 : i32, i32
  }
  func.func @transform_2(%arg0: i32) -> (i32, i32) {
    %c0_i32 = arith.constant 0 : i32
    %c0_i32_0 = arith.constant 0 : i32
    %c0_i32_1 = arith.constant 0 : i32
    return %c0_i32, %c0_i32_0 : i32, i32
  }
  func.func @transform_3(%arg0: i32) -> (i32, i32) {
    %c0_i32 = arith.constant 0 : i32
    %c0_i32_0 = arith.constant 0 : i32
    %c0_i32_1 = arith.constant 0 : i32
    return %c0_i32, %c0_i32_0 : i32, i32
  }
  func.func @transform_4(%arg0: i32) -> (i32, i32) {
    %c0_i32 = arith.constant 0 : i32
    %c0_i32_0 = arith.constant 0 : i32
    %c0_i32_1 = arith.constant 0 : i32
    return %c0_i32, %c0_i32_0 : i32, i32
  }
  func.func @transform_5(%arg0: i32) -> (i32, i32) {
    %c0_i32 = arith.constant 0 : i32
    %c0_i32_0 = arith.constant 0 : i32
    %c0_i32_1 = arith.constant 0 : i32
    return %c0_i32, %c0_i32_0 : i32, i32
  }
  func.func @transform_6(%arg0: i32) -> (i32, i32) {
    %c0_i32 = arith.constant 0 : i32
    %c0_i32_0 = arith.constant 0 : i32
    %c0_i32_1 = arith.constant 0 : i32
    return %c0_i32, %c0_i32_0 : i32, i32
  }
  func.func @transform_7(%arg0: i32) -> (i32, i32) {
    %c0_i32 = arith.constant 0 : i32
    %c0_i32_0 = arith.constant 0 : i32
    return %arg0, %c0_i32 : i32, i32
  }
}

</mosaic_0001>

<bundles_post_ra>
// kernel: tpu_custom_call.1
= control target key start
LH: loop header
LB: loop body
LE: loop exit
PB: predicated region body
PF: predicated region fallthrough
CT: control target
= control target key end

     0   :  { %vm117_vm0 = vcmask 261120   ;;  %s3295_s0 = inlined_call_operand.vmem [shape: f32[1,16,32], index: 0, kind: input, shape index: {}]   ;;  %s3296_s1 = inlined_call_operand.vmem [shape: f32[224,32], index: 1, kind: input, shape index: {}]   ;;  %s3297_s2 = inlined_call_operand.vmem [shape: f32[416,64], index: 2, kind: input, shape index: {}]   ;;  %s3298_s3 = inlined_call_operand.vmem [shape: f32[96,128], index: 3, kind: input, shape index: {}]   ;;  %s3299_s4 = inlined_call_operand.vmem [shape: f32[80,32], index: 4, kind: input, shape index: {}]   ;;  %s3300_s5 = inlined_call_operand.vmem [shape: f32[112,64], index: 5, kind: input, shape index: {}]   ;;  %s3301_s6 = inlined_call_operand.vmem [shape: f32[32,128], index: 6, kind: input, shape index: {}]   ;;  %s3302_s7 = inlined_call_operand.hbm [shape: f32[128,128], index: 7, kind: output, shape index: {}]  }
   0x1   :  { %v114_v0 = vld [vmem:[%s3298_s3 + $0x18] sm:$0xff]  ;;  %v113_v1 = vld [vmem:[%s3298_s3 + $0x10] sm:$0xff]  ;;  %v112_v3 = vld [vmem:[%s3298_s3 + $0x8] sm:$0xff] }
   0x2   :  { %178 = vmatpush.msra.mxu0 %v114_v0  ;;  %v2254_v2 = vld [vmem:[%s3299_s4 + $0x10] sm:$0xff]  ;;  %2149 = vmatpush.msra.mxu3 %v114_v0  ;;  %v2262_v4 = vld [vmem:[%s3295_s0] sm:$0xff]  ;;  %v2278_v10 = vld [vmem:[%s3295_s0 + $0x8] sm:$0xff] }
   0x3   :  { %v2267_v5 = vld [vmem:[%s3299_s4] sm:$0xff]  ;;  %v79_v7 = vperm.slane %v2254_v2, 0 }
   0x4   :  { %179 = vmatpush.msra.mxu0 %v113_v1  ;;  %v47_v6 = vperm.slane %v2267_v5, 0  ;;  %2150 = vmatpush.msra.mxu3 %v113_v1  ;;  %v111_v8 = vld [vmem:[%s3298_s3] sm:$0xff] }
   0x6   :  { %180 = vmatpush.msra.mxu0 %v112_v3  ;;  %v63_v9 = vmul.f32 %v47_v6, %v2262_v4  ;;  %2151 = vmatpush.msra.mxu3 %v112_v3 }
   0x8   :  { %181 = vmatpush.msra.mxu0 %v111_v8  ;;  %v2280_v11 = vadd.f32 %v79_v7, %v63_v9  ;;  %2152 = vmatpush.msra.mxu3 %v111_v8 }
   0x9   :  { %12 = vsyncpa [#allocation3], 0  ;;  %v64_v12 = vmul.f32 %v47_v6, %v2278_v10  ;;  %v40_v13 = vrot.slane %v2267_v5, 1  ;;  %v29_v15 = vrot.slane %v2254_v2, 1  ;;  %v41_v21 = vrot.slane %v2267_v5, 2  ;;  %v278_v38 = vld [vmem:[%s3297_s2 + $0x78] sm:$0xff] }
   0xa   :  { %1941 = vmatmul.msk.f32.vlgmr.msra.gmra.mxu0 %vm117_vm0, %v2280_v11  ;;  %v30_v23 = vrot.slane %v2254_v2, 2  ;;  %v32_v27 = vrot.slane %v2254_v2, 4  ;;  %v43_v28 = vrot.slane %v2267_v5, 4  ;;  %v42_v35 = vrot.slane %v2267_v5, 3  ;;  %v277_v39 = vld [vmem:[%s3297_s2 + $0x70] sm:$0xff]  ;;  %281 = vmatpush.msra.mxu1 %v278_v38  ;;  %v276_v57 = vld [vmem:[%s3297_s2 + $0x68] sm:$0xff] }
   0xb   :  { %v2286_v14 = vadd.f32 %v79_v7, %v64_v12  ;;  %v48_v16 = vperm.slane %v40_v13, 0  ;;  %v80_v18 = vperm.slane %v29_v15, 0  ;;  %v49_v24 = vperm.slane %v41_v21, 0  ;;  %v275_v58 = vld [vmem:[%s3297_s2 + $0x60] sm:$0xff]  ;;  %v274_v60 = vld [vmem:[%s3297_s2 + $0x58] sm:$0xff]  ;;  %v273_v3 = vld [vmem:[%s3297_s2 + $0x50] sm:$0xff] }
   0xc   :  { %v81_v26 = vperm.slane %v30_v23, 0  ;;  %v2306_v29 = vperm.slane %v43_v28, 0  ;;  %v2308_v30 = vperm.slane %v32_v27, 0  ;;  %v33_v36 = vrot.slane %v2254_v2, 5  ;;  %282 = vmatpush.msra.mxu1 %v277_v39  ;;  %v271_v8 = vld [vmem:[%s3297_s2 + $0x40] sm:$0xff]  ;;  %v270_v9 = vld [vmem:[%s3297_s2 + $0x38] sm:$0xff] }
   0xd   :  { %v65_v17 = vmul.f32 %v48_v16, %v2262_v4  ;;  %v66_v20 = vmul.f32 %v48_v16, %v2278_v10  ;;  %v67_v25 = vmul.f32 %v49_v24, %v2262_v4  ;;  %v68_v34 = vmul.f32 %v49_v24, %v2278_v10  ;;  %v269_v15 = vld [vmem:[%s3297_s2 + $0x30] sm:$0xff]  ;;  %v268_v16 = vld [vmem:[%s3297_s2 + $0x28] sm:$0xff]  ;;  %v2435_v27 = vld [vmem:[%s3301_s6] ss:$0 sm:$0xff]  ;;  %s1929_s19 = sshll.u32 %s3302_s7, 4  ;;  %s2203_s20 = smov 128   ;;  %s1930_s19 = int_to_ptr.hbm [resolvable:$true] %s1929_s19 }
   0xe   :  { %v72_v32 = vmul.f32 %v2306_v29, %v2278_v10  ;;  %v44_v37 = vrot.slane %v2267_v5, 5  ;;  %v35_v40 = vrot.slane %v2254_v2, 7  ;;  %v46_v41 = vrot.slane %v2267_v5, 7  ;;  %283 = vmatpush.msra.mxu1 %v276_v57  ;;  %v264_v24 = vld [vmem:[%s3297_s2 + $0x8] sm:$0xff] }
   0xf   :  { %v2292_v19 = vadd.f32 %v80_v18, %v65_v17  ;;  %v2298_v22 = vadd.f32 %v80_v18, %v66_v20  ;;  %v2310_v31 = vadd.f32 %v81_v26, %v67_v25  ;;  %v84_v43 = vperm.slane %v33_v36, 0  ;;  %v267_v20 = vld [vmem:[%s3297_s2 + $0x20] sm:$0xff] }
  0x10   :  { %v2315_v33 = vadd.f32 %v2308_v30, %v72_v32  ;;  %v52_v42 = vperm.slane %v44_v37, 0  ;;  %v31_v44 = vrot.slane %v2254_v2, 3  ;;  %v54_v45 = vperm.slane %v46_v41, 0  ;;  %284 = vmatpush.msra.mxu1 %v275_v58  ;;  %v263_v25 = vld [vmem:[%s3297_s2] sm:$0xff]  ;;  %v347_v41 = vld [vmem:[%s3297_s2 + $0x88] sm:$0xff] }
  0x11   :  { %v86_v46 = vperm.slane %v35_v40, 0  ;;  %v2334_v47 = vadd.f32 %v81_v26, %v68_v34  ;;  %v50_v48 = vperm.slane %v42_v35, 0  ;;  %v45_v56 = vrot.slane %v2267_v5, 6  ;;  %v349_v26 = vld [vmem:[%s3297_s2 + $0x98] sm:$0xff]  ;;  %v348_v34 = vld [vmem:[%s3297_s2 + $0x90] sm:$0xff] }
  0x12   :  { %1942 = vmatmul.msk.f32.gmra.mxu0 %vm117_vm0, %v2286_v14  ;;  %1950 = vmatmul.msk.f32.vlgmr.msra.gmra.mxu3 %vm117_vm0, %v2315_v33  ;;  %v73_v49 = vmul.f32 %v52_v42, %v2262_v4  ;;  %v77_v50 = vmul.f32 %v54_v45, %v2262_v4  ;;  %v82_v52 = vperm.slane %v31_v44, 0  ;;  %v74_v55 = vmul.f32 %v52_v42, %v2278_v10  ;;  %v346_v42 = vld [vmem:[%s3297_s2 + $0x80] sm:$0xff] }
  0x13   :  { %v69_v54 = vmul.f32 %v50_v48, %v2262_v4  ;;  %v78_v59 = vmul.f32 %v54_v45, %v2278_v10  ;;  %v34_v0 = vrot.slane %v2254_v2, 6  ;;  %v53_v1 = vperm.slane %v45_v56, 0  ;;  %285 = vmatpush.msra.mxu1 %v274_v60  ;;  %v272_v2 = vld [vmem:[%s3297_s2 + $0x48] sm:$0xff]  ;;  %2153 = vmatpush.msra.mxu2 %v349_v26 }
  0x14   :  { %v2338_v51 = vadd.f32 %v84_v43, %v73_v49  ;;  %v2340_v53 = vadd.f32 %v86_v46, %v77_v50  ;;  %v2363_v63 = vadd.f32 %v84_v43, %v74_v55  ;;  %v70_v5 = vmul.f32 %v50_v48, %v2278_v10 }
  0x15   :  { %v2359_v61 = vadd.f32 %v86_v46, %v78_v59  ;;  %v2361_v62 = vadd.f32 %v82_v52, %v69_v54  ;;  %286 = vmatpush.msra.mxu1 %v273_v3  ;;  %v75_v6 = vmul.f32 %v53_v1, %v2262_v4  ;;  %v85_v7 = vperm.slane %v34_v0, 0  ;;  %2154 = vmatpush.msra.mxu2 %v348_v34 }
  0x16   :  { %v2384_v12 = vadd.f32 %v82_v52, %v70_v5  ;;  %v71_v17 = vmul.f32 %v2306_v29, %v2262_v4  ;;  %v76_v18 = vmul.f32 %v53_v1, %v2278_v10  ;;  %v266_v4 = vld [vmem:[%s3297_s2 + $0x18] sm:$0xff]  ;;  %v265_v10 = vld [vmem:[%s3297_s2 + $0x10] sm:$0xff]  ;;  %vm509_vm1 = vcmask 523264  }
  0x17   :  { %287 = vmatpush.msra.mxu1 %v272_v2  ;;  %v2386_v13 = vadd.f32 %v85_v7, %v75_v6  ;;  %2155 = vmatpush.msra.mxu2 %v347_v41 }
  0x18   :  { %v2405_v21 = vadd.f32 %v2308_v30, %v71_v17  ;;  %v2407_v23 = vadd.f32 %v85_v7, %v76_v18 }
  0x19   :  { %288 = vmatpush.msra.mxu1 %v271_v8  ;;  %2156 = vmatpush.msra.mxu2 %v346_v42 }
  0x1a   :  { %1943 = vmatmul.msk.f32.gmra.mxu0 %vm117_vm0, %v2292_v19  ;;  %1951 = vmatmul.msk.f32.gmra.mxu3 %vm117_vm0, %v2338_v51 }
  0x1b   :  { %289 = vmatpush.msra.mxu1 %v270_v9  ;;  %1964 = vmatmul.msk.f32.vlgmr.msra.gmra.mxu2 %vm117_vm0, %v2384_v12 }
  0x1d   :  { %290 = vmatpush.msra.mxu1 %v269_v15 }
  0x1f   :  { %291 = vmatpush.msra.mxu1 %v268_v16 }
  0x21   :  { %292 = vmatpush.msra.mxu1 %v267_v20 }
  0x22   :  { %1944 = vmatmul.msk.f32.gmra.mxu0 %vm117_vm0, %v2298_v22  ;;  %1952 = vmatmul.msk.f32.gmra.mxu3 %vm117_vm0, %v2363_v63 }
  0x23   :  { %293 = vmatpush.msra.mxu1 %v266_v4  ;;  %1965 = vmatmul.msk.f32.gmra.mxu2 %vm117_vm0, %v2405_v21 }
  0x25   :  { %294 = vmatpush.msra.mxu1 %v265_v10 }
  0x27   :  { %295 = vmatpush.msra.mxu1 %v264_v24 }
  0x29   :  { %296 = vmatpush.msra.mxu1 %v263_v25 }
  0x2a   :  { %1945 = vmatmul.msk.f32.gmra.mxu0 %vm117_vm0, %v2310_v31  ;;  %1953 = vmatmul.msk.f32.gmra.mxu3 %vm117_vm0, %v2386_v13 }
  0x2b   :  { %364 = vmatpush.msrb.mxu1 %v349_v26  ;;  %1966 = vmatmul.msk.f32.gmra.mxu2 %vm117_vm0, %v2315_v33 }
  0x2d   :  { %365 = vmatpush.msrb.mxu1 %v348_v34 }
  0x2f   :  { %366 = vmatpush.msrb.mxu1 %v347_v41 }
  0x31   :  { %367 = vmatpush.msrb.mxu1 %v346_v42 }
  0x32   :  { %1946 = vmatmul.msk.f32.gmra.mxu0 %vm117_vm0, %v2334_v47  ;;  %1954 = vmatmul.msk.f32.gmra.mxu3 %vm117_vm0, %v2407_v23 }
  0x33   :  { %1967 = vmatmul.msk.f32.gmra.mxu2 %vm117_vm0, %v2338_v51 }
  0x3a   :  { %1947 = vmatmul.msk.f32.gmra.mxu0 %vm117_vm0, %v2361_v62  ;;  %1955 = vmatmul.msk.f32.gmra.mxu3 %vm117_vm0, %v2340_v53 }
  0x3b   :  { %1968 = vmatmul.msk.f32.gmra.mxu2 %vm117_vm0, %v2363_v63 }
  0x42   :  { %1948 = vmatmul.msk.f32.gmra.mxu0 %vm117_vm0, %v2384_v12  ;;  %1956 = vmatmul.msk.f32.gmra.mxu3 %vm117_vm0, %v2359_v61 }
  0x43   :  { %1969 = vmatmul.msk.f32.gmra.mxu2 %vm117_vm0, %v2386_v13 }
  0x4a   :  { %1949 = vmatmul.msk.f32.gmra.mxu0 %vm117_vm0, %v2405_v21 }
  0x4b   :  { %1970 = vmatmul.msk.f32.gmra.mxu2 %vm117_vm0, %v2407_v23 }
  0x53   :  { %1971 = vmatmul.msk.f32.gmra.mxu2 %vm117_vm0, %v2340_v53 }
  0x5b   :  { %1972 = vmatmul.msk.f32.gmra.mxu2 %vm117_vm0, %v2359_v61 }
  0x87   :  { %v183_v28 = vpop.f32.mrf.mxu0 }
  0x88   :  { %v184_v29 = vadd.f32 %v2435_v27, %v183_v28 }
  0x8a   :  { %v231_v30 = vmul.f32 0.2, %v184_v29 }
  0x8c   :  { %v247_v32 = vmax.f32 %v184_v29, %v231_v30 }
  0x8e   :  { %297 = vmatmul.f32.vlgmr.msra.gmra.mxu1 %v247_v32 }
  0x8f   :  { %v186_v35 = vpop.f32.mrf.mxu0 }
  0x90   :  { %v187_v36 = vadd.f32 %v2435_v27, %v186_v35 }
  0x92   :  { %v232_v37 = vmul.f32 0.2, %v187_v36 }
  0x94   :  { %v248_v38 = vmax.f32 %v187_v36, %v232_v37 }
  0x95   :  { %v210_v5 = vpop.f32.mrf.mxu3 }
  0x96   :  { %300 = vmatmul.f32.gmra.mxu1 %v248_v38  ;;  %v211_v18 = vadd.f32 %v2435_v27, %v210_v5 }
  0x97   :  { %v189_v39 = vpop.f32.mrf.mxu0 }
  0x98   :  { %v190_v40 = vadd.f32 %v2435_v27, %v189_v39  ;;  %v240_v4 = vmul.f32 0.2, %v211_v18 }
  0x9a   :  { %v233_v43 = vmul.f32 0.2, %v190_v40  ;;  %v256_v25 = vmax.f32 %v211_v18, %v240_v4  ;;  %v502_v18 = vld [vmem:[%s3297_s2 + $0xc8] sm:$0xff] }
  0x9c   :  { %v249_v44 = vmax.f32 %v190_v40, %v233_v43 }
  0x9d   :  { %v213_v15 = vpop.f32.mrf.mxu3 }
  0x9e   :  { %303 = vmatmul.f32.gmra.mxu1 %v249_v44  ;;  %v214_v24 = vadd.f32 %v2435_v27, %v213_v15  ;;  %v498_v15 = vld [vmem:[%s3297_s2 + $0xa8] sm:$0xff] }
  0x9f   :  { %v192_v45 = vpop.f32.mrf.mxu0 }
  0xa0   :  { %v193_v46 = vadd.f32 %v2435_v27, %v192_v45  ;;  %v241_v26 = vmul.f32 0.2, %v214_v24 }
  0xa2   :  { %v234_v48 = vmul.f32 0.2, %v193_v46  ;;  %v257_v30 = vmax.f32 %v214_v24, %v241_v26  ;;  %v501_v24 = vld [vmem:[%s3297_s2 + $0xc0] sm:$0xff] }
  0xa4   :  { %v250_v49 = vmax.f32 %v193_v46, %v234_v48 }
  0xa5   :  { %v216_v10 = vpop.f32.mrf.mxu3 }
  0xa6   :  { %306 = vmatmul.f32.gmra.mxu1 %v250_v49  ;;  %v217_v29 = vadd.f32 %v2435_v27, %v216_v10  ;;  %v497_v10 = vld [vmem:[%s3297_s2 + $0xa0] sm:$0xff] }
  0xa7   :  { %v195_v50 = vpop.f32.mrf.mxu0 }
  0xa8   :  { %v196_v52 = vadd.f32 %v2435_v27, %v195_v50  ;;  %v242_v32 = vmul.f32 0.2, %v217_v29 }
  0xaa   :  { %v235_v54 = vmul.f32 0.2, %v196_v52  ;;  %v258_v35 = vmax.f32 %v217_v29, %v242_v32  ;;  %v2572_v29 = vld [vmem:[%s3300_s5 + $0x10] ss:$0 sm:$0xff] }
  0xac   :  { %v251_v55 = vmax.f32 %v196_v52, %v235_v54 }
  0xad   :  { %v219_v28 = vpop.f32.mrf.mxu3 }
  0xae   :  { %309 = vmatmul.f32.gmra.mxu1 %v251_v55  ;;  %v220_v34 = vadd.f32 %v2435_v27, %v219_v28 }
  0xaf   :  { %v198_v56 = vpop.f32.mrf.mxu0 }
  0xb0   :  { %v199_v57 = vadd.f32 %v2435_v27, %v198_v56  ;;  %v243_v37 = vmul.f32 0.2, %v220_v34 }
  0xb2   :  { %v236_v58 = vmul.f32 0.2, %v199_v57  ;;  %v259_v39 = vmax.f32 %v220_v34, %v243_v37  ;;  %v2580_v34 = vld [vmem:[%s3300_s5] ss:$0 sm:$0xff] }
  0xb4   :  { %v252_v59 = vmax.f32 %v199_v57, %v236_v58  ;;  %v500_v58 = vld [vmem:[%s3297_s2 + $0xb8] sm:$0xff] }
  0xb5   :  { %v222_v36 = vpop.f32.mrf.mxu3  ;;  %635 = vmatpush.msrb.mxu0 %v500_v58 }
  0xb6   :  { %312 = vmatmul.f32.gmra.mxu1 %v252_v59  ;;  %v223_v38 = vadd.f32 %v2435_v27, %v222_v36 }
  0xb7   :  { %v201_v60 = vpop.f32.mrf.mxu0 }
  0xb8   :  { %v202_v0 = vadd.f32 %v2435_v27, %v201_v60  ;;  %v244_v41 = vmul.f32 0.2, %v223_v38  ;;  %v508_v60 = vld [vmem:[%s3297_s2 + $0xf8] sm:$0xff] }
  0xb9   :  { %566 = vmatpush.msrb.mxu3 %v508_v60 }
  0xba   :  { %v237_v1 = vmul.f32 0.2, %v202_v0  ;;  %v260_v43 = vmax.f32 %v223_v38, %v244_v41 }
  0xbc   :  { %v253_v3 = vmax.f32 %v202_v0, %v237_v1  ;;  %v507_v1 = vld [vmem:[%s3297_s2 + $0xf0] sm:$0xff] }
  0xbd   :  { %v225_v40 = vpop.f32.mrf.mxu3  ;;  %567 = vmatpush.msrb.mxu3 %v507_v1 }
  0xbe   :  { %315 = vmatmul.f32.gmra.mxu1 %v253_v3  ;;  %v226_v42 = vadd.f32 %v2435_v27, %v225_v40  ;;  %v499_v3 = vld [vmem:[%s3297_s2 + $0xb0] sm:$0xff] }
  0xbf   :  { %v204_v6 = vpop.f32.mrf.mxu0  ;;  %636 = vmatpush.msrb.mxu0 %v499_v3 }
  0xc0   :  { %v205_v7 = vadd.f32 %v2435_v27, %v204_v6  ;;  %v245_v44 = vmul.f32 0.2, %v226_v42  ;;  %v506_v6 = vld [vmem:[%s3297_s2 + $0xe8] sm:$0xff] }
  0xc1   :  { %568 = vmatpush.msrb.mxu3 %v506_v6  ;;  %637 = vmatpush.msrb.mxu0 %v498_v15 }
  0xc2   :  { %v238_v2 = vmul.f32 0.2, %v205_v7  ;;  %v261_v48 = vmax.f32 %v226_v42, %v245_v44 }
  0xc3   :  { %638 = vmatpush.msrb.mxu0 %v497_v10  ;;  %v390_v10 = vpop.f32.mrf.mxu2 }
  0xc4   :  { %v254_v8 = vmax.f32 %v205_v7, %v238_v2  ;;  %v505_v2 = vld [vmem:[%s3297_s2 + $0xe0] sm:$0xff]  ;;  %1989 = vmatmul.msk.f32.vlgmr.msrb.gmra.mxu0 %vm117_vm0, %v2280_v11 }
  0xc5   :  { %v228_v45 = vpop.f32.mrf.mxu3  ;;  %569 = vmatpush.msrb.mxu3 %v505_v2 }
  0xc6   :  { %318 = vmatmul.f32.gmra.mxu1 %v254_v8  ;;  %v229_v46 = vadd.f32 %v2435_v27, %v228_v45 }
  0xc7   :  { %v207_v9 = vpop.f32.mrf.mxu0 }
  0xc8   :  { %v208_v16 = vadd.f32 %v2435_v27, %v207_v9  ;;  %v246_v49 = vmul.f32 0.2, %v229_v46  ;;  %v504_v9 = vld [vmem:[%s3297_s2 + $0xd8] sm:$0xff] }
  0xc9   :  { %570 = vmatpush.msrb.mxu3 %v504_v9 }
  0xca   :  { %v239_v17 = vmul.f32 0.2, %v208_v16  ;;  %v262_v50 = vmax.f32 %v229_v46, %v246_v49  ;;  %v870_v49 = vld [vmem:[%s3296_s1 + $0x88] sm:$0xff] }
  0xcc   :  { %v255_v20 = vmax.f32 %v208_v16, %v239_v17  ;;  %v503_v17 = vld [vmem:[%s3297_s2 + $0xd0] sm:$0xff]  ;;  %1990 = vmatmul.msk.f32.gmra.mxu0 %vm117_vm0, %v2286_v14 }
  0xcd   :  { %571 = vmatpush.msrb.mxu3 %v503_v17 }
  0xce   :  { %321 = vmatmul.f32.gmra.mxu1 %v255_v20 }
  0xcf   :  { %572 = vmatpush.msrb.mxu3 %v502_v18 }
  0xd1   :  { %573 = vmatpush.msrb.mxu3 %v501_v24 }
  0xd4   :  { %1991 = vmatmul.msk.f32.gmra.mxu0 %vm117_vm0, %v2292_v19 }
  0xd6   :  { %324 = vmatmul.f32.gmra.mxu1 %v256_v25  ;;  %v872_v25 = vld [vmem:[%s3296_s1 + $0x98] sm:$0xff] }
  0xd7   :  { %881 = vmatpush.msra.mxu3 %v872_v25  ;;  %v869_v25 = vld [vmem:[%s3296_s1 + $0x80] sm:$0xff] }
  0xdc   :  { %1992 = vmatmul.msk.f32.gmra.mxu0 %vm117_vm0, %v2298_v22 }
  0xde   :  { %327 = vmatmul.f32.gmra.mxu1 %v257_v30  ;;  %v871_v30 = vld [vmem:[%s3296_s1 + $0x90] sm:$0xff] }
  0xdf   :  { %882 = vmatpush.msra.mxu3 %v871_v30 }
  0xe1   :  { %883 = vmatpush.msra.mxu3 %v870_v49 }
  0xe3   :  { %884 = vmatpush.msra.mxu3 %v869_v25 }
  0xe4   :  { %1993 = vmatmul.msk.f32.gmra.mxu0 %vm117_vm0, %v2310_v31 }
  0xe6   :  { %330 = vmatmul.f32.gmra.mxu1 %v258_v35 }
  0xec   :  { %1994 = vmatmul.msk.f32.gmra.mxu0 %vm117_vm0, %v2334_v47 }
  0xee   :  { %333 = vmatmul.f32.gmra.mxu1 %v259_v39 }
  0xf4   :  { %1995 = vmatmul.msk.f32.gmra.mxu0 %vm117_vm0, %v2361_v62 }
  0xf6   :  { %336 = vmatmul.f32.gmra.mxu1 %v260_v43 }
  0xfc   :  { %1996 = vmatmul.msk.f32.gmra.mxu0 %vm117_vm0, %v2384_v12 }
  0xfe   :  { %339 = vmatmul.f32.gmra.mxu1 %v261_v48 }
 0x104   :  { %1997 = vmatmul.msk.f32.gmra.mxu0 %vm117_vm0, %v2405_v21 }
 0x106   :  { %342 = vmatmul.f32.gmra.mxu1 %v262_v50 }
 0x10b   :  { %v298_v52 = vpop.f32.mrf.mxu1 }
 0x10c   :  { %v299_v37 = vadd.f32 %v2580_v34, %v298_v52  ;;  %1998 = vmatmul.msk.f32.gmra.mxu0 %vm117_vm0, %v2315_v33 }
 0x10e   :  { %1957 = vmatmul.msk.f32.vlgmr.msrb.gmra.mxu1 %vm117_vm0, %v2280_v11 }
 0x113   :  { %v2482_v54 = vpop.f32.mrf.mxu1 }
 0x114   :  { %v302_v45 = vadd.f32 %v2580_v34, %v2482_v54  ;;  %1999 = vmatmul.msk.f32.gmra.mxu0 %vm117_vm0, %v2338_v51 }
 0x116   :  { %1958 = vmatmul.msk.f32.gmra.mxu1 %vm117_vm0, %v2286_v14 }
 0x11b   :  { %v2486_v55 = vpop.f32.mrf.mxu1 }
 0x11c   :  { %v305_v54 = vadd.f32 %v2580_v34, %v2486_v55  ;;  %2000 = vmatmul.msk.f32.gmra.mxu0 %vm117_vm0, %v2363_v63 }
 0x11e   :  { %1959 = vmatmul.msk.f32.gmra.mxu1 %vm117_vm0, %v2292_v19 }
 0x123   :  { %v2490_v27 = vpop.f32.mrf.mxu1 }
 0x124   :  { %v308_v24 = vadd.f32 %v2580_v34, %v2490_v27  ;;  %2001 = vmatmul.msk.f32.gmra.mxu0 %vm117_vm0, %v2386_v13 }
 0x126   :  { %1960 = vmatmul.msk.f32.gmra.mxu1 %vm117_vm0, %v2298_v22 }
 0x12b   :  { %v2494_v56 = vpop.f32.mrf.mxu1 }
 0x12c   :  { %v311_v27 = vadd.f32 %v2580_v34, %v2494_v56  ;;  %2002 = vmatmul.msk.f32.gmra.mxu0 %vm117_vm0, %v2407_v23 }
 0x12e   :  { %1961 = vmatmul.msk.f32.gmra.mxu1 %vm117_vm0, %v2310_v31 }
 0x133   :  { %v2498_v57 = vpop.f32.mrf.mxu1 }
 0x134   :  { %v314_v49 = vadd.f32 %v2580_v34, %v2498_v57  ;;  %2003 = vmatmul.msk.f32.gmra.mxu0 %vm117_vm0, %v2340_v53 }
 0x136   :  { %1962 = vmatmul.msk.f32.gmra.mxu1 %vm117_vm0, %v2334_v47 }
 0x13b   :  { %v2505_v59 = vpop.f32.mrf.mxu1 }
 0x13c   :  { %2004 = vmatmul.msk.f32.gmra.mxu0 %vm117_vm0, %v2359_v61 }
 0x13e   :  { %1963 = vmatmul.msk.f32.gmra.mxu1 %vm117_vm0, %v2361_v62 }
 0x143   :  { %v2512_v0 = vpop.f32.mrf.mxu1 }
 0x144   :  { %v320_v25 = vadd.f32 %v2580_v34, %v2512_v0  ;;  %v864_v0 = vld [vmem:[%s3296_s1 + $0x58] sm:$0xff] }
 0x145   :  { %950 = vmatpush.msra.mxu1 %v864_v0 }
 0x14b   :  { %v2520_v5 = vpop.f32.mrf.mxu1 }
 0x153   :  { %v2525_v7 = vpop.f32.mrf.mxu1 }
 0x15b   :  { %v2530_v8 = vpop.f32.mrf.mxu1 }
 0x163   :  { %v2538_v16 = vpop.f32.mrf.mxu1 }
 0x16b   :  { %v2546_v20 = vpop.f32.mrf.mxu1 }
 0x173   :  { %v2548_v4 = vpop.f32.mrf.mxu1 }
 0x17b   :  { %v2561_v26 = vpop.f32.mrf.mxu1 }
 0x183   :  { %v2565_v28 = vpop.f32.mrf.mxu1 }
 0x18b   :  { %v369_v32 = vpop.f32.mrf.mxu1 }
 0x18c   :  { %v370_v35 = vadd.f32 %v2572_v29, %v369_v32 }
 0x18e   :  { %v417_v36 = vmul.f32 0.2, %v370_v35 }
 0x190   :  { %v433_v38 = vmax.f32 %v370_v35, %v417_v36 }
 0x192   :  { %v449_v39 = vadd.f32 %v433_v38, %v299_v37 }
 0x193   :  { %v372_v40 = vpop.f32.mrf.mxu1 }
 0x194   :  { %v465_v41 = vmul.f32 0.2, %v449_v39  ;;  %v373_v42 = vadd.f32 %v2572_v29, %v372_v40  ;;  %v393_v40 = vpop.f32.mrf.mxu2 }
 0x196   :  { %v418_v43 = vmul.f32 0.2, %v373_v42  ;;  %v2587_v44 = vmax.f32 %v449_v39, %v465_v41 }
 0x198   :  { %v434_v46 = vmax.f32 %v373_v42, %v418_v43  ;;  %1973 = vmatmul.msk.f32.vlgmr.msrb.gmra.mxu3 %vm509_vm1, %v2587_v44 }
 0x19a   :  { %v450_v48 = vadd.f32 %v434_v46, %v302_v45 }
 0x19b   :  { %v375_v50 = vpop.f32.mrf.mxu1 }
 0x19c   :  { %v376_v52 = vadd.f32 %v2572_v29, %v375_v50  ;;  %v466_v58 = vmul.f32 0.2, %v450_v48  ;;  %v868_v50 = vld [vmem:[%s3296_s1 + $0x78] sm:$0xff] }
 0x19d   :  { %885 = vmatpush.msra.mxu3 %v868_v50  ;;  %v743_v50 = vld [vmem:[%s3296_s1 + $0x28] sm:$0xff] }
 0x19e   :  { %v419_v60 = vmul.f32 0.2, %v376_v52  ;;  %v2599_v1 = vmax.f32 %v450_v48, %v466_v58  ;;  %v391_v58 = vadd.f32 %v2572_v29, %v390_v10  ;;  %v744_v10 = vld [vmem:[%s3296_s1 + $0x30] sm:$0xff] }
 0x1a0   :  { %v435_v3 = vmax.f32 %v376_v52, %v419_v60  ;;  %1974 = vmatmul.msk.f32.gmra.mxu3 %vm509_vm1, %v2599_v1  ;;  %v745_v52 = vld [vmem:[%s3296_s1 + $0x38] sm:$0xff] }
 0x1a1   :  { %804 = vmatpush.msrb.mxu2 %v745_v52 }
 0x1a2   :  { %v451_v6 = vadd.f32 %v435_v3, %v305_v54  ;;  %v396_v54 = vpop.f32.mrf.mxu2 }
 0x1a3   :  { %v378_v2 = vpop.f32.mrf.mxu1  ;;  %805 = vmatpush.msrb.mxu2 %v744_v10  ;;  %v329_v10 = vadd.f32 %v2580_v34, %v2530_v8 }
 0x1a4   :  { %v379_v9 = vadd.f32 %v2572_v29, %v378_v2  ;;  %v467_v15 = vmul.f32 0.2, %v451_v6  ;;  %v424_v2 = vmul.f32 0.2, %v391_v58 }
 0x1a5   :  { %806 = vmatpush.msrb.mxu2 %v743_v50  ;;  %v335_v50 = vadd.f32 %v2580_v34, %v2546_v20  ;;  %v739_v20 = vld [vmem:[%s3296_s1 + $0x8] sm:$0xff] }
 0x1a6   :  { %v420_v17 = vmul.f32 0.2, %v379_v9  ;;  %v2608_v18 = vmax.f32 %v451_v6, %v467_v15 }
 0x1a8   :  { %v436_v55 = vmax.f32 %v379_v9, %v420_v17  ;;  %1975 = vmatmul.msk.f32.gmra.mxu3 %vm509_vm1, %v2608_v18  ;;  %v317_v17 = vadd.f32 %v2580_v34, %v2505_v59 }
 0x1aa   :  { %v452_v30 = vadd.f32 %v436_v55, %v308_v24  ;;  %v440_v55 = vmax.f32 %v391_v58, %v424_v2  ;;  %v326_v58 = vadd.f32 %v2580_v34, %v2525_v7  ;;  %v742_v7 = vld [vmem:[%s3296_s1 + $0x20] sm:$0xff]  ;;  %v863_v2 = vld [vmem:[%s3296_s1 + $0x50] sm:$0xff] }
 0x1ab   :  { %v381_v32 = vpop.f32.mrf.mxu1  ;;  %807 = vmatpush.msrb.mxu2 %v742_v7  ;;  %951 = vmatpush.msra.mxu1 %v863_v2 }
 0x1ac   :  { %v382_v35 = vadd.f32 %v2572_v29, %v381_v32  ;;  %v468_v36 = vmul.f32 0.2, %v452_v30 }
 0x1ae   :  { %v421_v37 = vmul.f32 0.2, %v382_v35  ;;  %v2620_v38 = vmax.f32 %v452_v30, %v468_v36  ;;  %v394_v30 = vadd.f32 %v2572_v29, %v393_v40  ;;  %v399_v36 = vpop.f32.mrf.mxu2 }
 0x1b0   :  { %v437_v39 = vmax.f32 %v382_v35, %v421_v37  ;;  %1976 = vmatmul.msk.f32.gmra.mxu3 %vm509_vm1, %v2620_v38  ;;  %v456_v37 = vadd.f32 %v440_v55, %v320_v25  ;;  %v425_v59 = vmul.f32 0.2, %v394_v30 }
 0x1b2   :  { %v453_v41 = vadd.f32 %v437_v39, %v311_v27  ;;  %v867_v39 = vld [vmem:[%s3296_s1 + $0x70] sm:$0xff]  ;;  %v472_v40 = vmul.f32 0.2, %v456_v37 }
 0x1b3   :  { %v384_v42 = vpop.f32.mrf.mxu1  ;;  %886 = vmatpush.msra.mxu3 %v867_v39 }
 0x1b4   :  { %v385_v43 = vadd.f32 %v2572_v29, %v384_v42  ;;  %v469_v45 = vmul.f32 0.2, %v453_v41  ;;  %v323_v42 = vadd.f32 %v2580_v34, %v2520_v5 }
 0x1b6   :  { %v422_v46 = vmul.f32 0.2, %v385_v43  ;;  %v2629_v48 = vmax.f32 %v453_v41, %v469_v45  ;;  %v441_v41 = vmax.f32 %v394_v30, %v425_v59 }
 0x1b8   :  { %v438_v56 = vmax.f32 %v385_v43, %v422_v46  ;;  %1977 = vmatmul.msk.f32.gmra.mxu3 %vm509_vm1, %v2629_v48  ;;  %v397_v43 = vadd.f32 %v2572_v29, %v396_v54  ;;  %v457_v45 = vadd.f32 %v441_v41, %v323_v42 }
 0x1ba   :  { %v454_v60 = vadd.f32 %v438_v56, %v314_v49  ;;  %v426_v46 = vmul.f32 0.2, %v397_v43  ;;  %v2674_v49 = vmax.f32 %v456_v37, %v472_v40  ;;  %v402_v56 = vpop.f32.mrf.mxu2  ;;  %v473_v52 = vmul.f32 0.2, %v457_v45 }
 0x1bb   :  { %v387_v3 = vpop.f32.mrf.mxu1  ;;  %v403_v55 = vadd.f32 %v2572_v29, %v402_v56  ;;  %v332_v37 = vadd.f32 %v2580_v34, %v2538_v16  ;;  %v862_v16 = vld [vmem:[%s3296_s1 + $0x48] sm:$0xff] }
 0x1bc   :  { %v388_v57 = vadd.f32 %v2572_v29, %v387_v3  ;;  %v470_v6 = vmul.f32 0.2, %v454_v60  ;;  %v442_v5 = vmax.f32 %v397_v43, %v426_v46  ;;  %v865_v43 = vld [vmem:[%s3296_s1 + $0x60] sm:$0xff]  ;;  %952 = vmatpush.msra.mxu1 %v862_v16 }
 0x1bd   :  { %v428_v30 = vmul.f32 0.2, %v403_v55 }
 0x1be   :  { %v423_v9 = vmul.f32 0.2, %v388_v57  ;;  %v2645_v15 = vmax.f32 %v454_v60, %v470_v6  ;;  %v400_v60 = vadd.f32 %v2572_v29, %v399_v36  ;;  %v458_v54 = vadd.f32 %v442_v5, %v326_v58  ;;  %v866_v6 = vld [vmem:[%s3296_s1 + $0x68] sm:$0xff] }
 0x1bf   :  { %887 = vmatpush.msra.mxu3 %v866_v6  ;;  %v444_v8 = vmax.f32 %v403_v55, %v428_v30  ;;  %v338_v6 = vadd.f32 %v2580_v34, %v2548_v4  ;;  %v341_v4 = vadd.f32 %v2580_v34, %v2561_v26  ;;  %v738_v26 = vld [vmem:[%s3296_s1] sm:$0xff] }
 0x1c0   :  { %v439_v24 = vmax.f32 %v388_v57, %v423_v9  ;;  %1978 = vmatmul.msk.f32.gmra.mxu3 %vm509_vm1, %v2645_v15  ;;  %v427_v3 = vmul.f32 0.2, %v400_v60  ;;  %v2686_v57 = vmax.f32 %v457_v45, %v473_v52  ;;  %v740_v45 = vld [vmem:[%s3296_s1 + $0x10] sm:$0xff] }
 0x1c1   :  { %v460_v40 = vadd.f32 %v444_v8, %v332_v37  ;;  %888 = vmatpush.msra.mxu3 %v865_v43 }
 0x1c2   :  { %v455_v32 = vadd.f32 %v439_v24, %v317_v17  ;;  %v405_v9 = vpop.f32.mrf.mxu2  ;;  %v474_v17 = vmul.f32 0.2, %v458_v54  ;;  %v443_v24 = vmax.f32 %v400_v60, %v427_v3 }
 0x1c3   :  { %v406_v59 = vadd.f32 %v2572_v29, %v405_v9  ;;  %v476_v46 = vmul.f32 0.2, %v460_v40  ;;  %2157 = vmatpush.msrb.mxu3 %v864_v0 }
 0x1c4   :  { %v471_v35 = vmul.f32 0.2, %v455_v32  ;;  %v459_v25 = vadd.f32 %v443_v24, %v329_v10  ;;  %v861_v10 = vld [vmem:[%s3296_s1 + $0x40] sm:$0xff] }
 0x1c5   :  { %v429_v41 = vmul.f32 0.2, %v406_v59  ;;  %2158 = vmatpush.msrb.mxu3 %v863_v2  ;;  %953 = vmatpush.msra.mxu1 %v861_v10 }
 0x1c6   :  { %v2659_v27 = vmax.f32 %v455_v32, %v471_v35  ;;  %v2704_v32 = vmax.f32 %v458_v54, %v474_v17  ;;  %v741_v35 = vld [vmem:[%s3296_s1 + $0x18] sm:$0xff]  ;;  %v475_v36 = vmul.f32 0.2, %v459_v25  ;;  %v2734_v54 = vmax.f32 %v460_v40, %v476_v46  ;;  %2037 = vmatmul.msk.f32.vlgmr.msra.gmra.mxu1 %vm117_vm0, %v2280_v11 }
 0x1c7   :  { %808 = vmatpush.msrb.mxu2 %v741_v35  ;;  %v445_v56 = vmax.f32 %v406_v59, %v429_v41  ;;  %2159 = vmatpush.msrb.mxu3 %v862_v16  ;;  %v640_v35 = vpop.f32.mrf.mxu0  ;;  %v344_v40 = vadd.f32 %v2580_v34, %v2565_v28 }
 0x1c8   :  { %1979 = vmatmul.msk.f32.gmra.mxu3 %vm509_vm1, %v2659_v27  ;;  %v2716_v42 = vmax.f32 %v459_v25, %v475_v36 }
 0x1c9   :  { %809 = vmatpush.msrb.mxu2 %v740_v45  ;;  %v461_v58 = vadd.f32 %v445_v56, %v335_v50  ;;  %2160 = vmatpush.msrb.mxu3 %v861_v10 }
 0x1ca   :  { %v408_v39 = vpop.f32.mrf.mxu2 }
 0x1cb   :  { %v409_v52 = vadd.f32 %v2572_v29, %v408_v39  ;;  %810 = vmatpush.msrb.mxu2 %v739_v20  ;;  %v477_v3 = vmul.f32 0.2, %v461_v58 }
 0x1cd   :  { %v430_v60 = vmul.f32 0.2, %v409_v52  ;;  %v2746_v17 = vmax.f32 %v461_v58, %v477_v3  ;;  %811 = vmatpush.msrb.mxu2 %v738_v26  ;;  %v1102_v26 = vld [vmem:[%s3297_s2 + $0x108] sm:$0xff] }
 0x1ce   :  { %2038 = vmatmul.msk.f32.gmra.mxu1 %vm117_vm0, %v2286_v14  ;;  %v1104_v14 = vld [vmem:[%s3297_s2 + $0x118] sm:$0xff] }
 0x1cf   :  { %v446_v0 = vmax.f32 %v409_v52, %v430_v60  ;;  %v643_v11 = vpop.f32.mrf.mxu0  ;;  %1167 = vmatpush.msra.mxu0 %v1104_v14 }
 0x1d0   :  { %1980 = vmatmul.msk.f32.gmra.mxu3 %vm509_vm1, %v2674_v49 }
 0x1d1   :  { %v462_v2 = vadd.f32 %v446_v0, %v338_v6  ;;  %v1103_v6 = vld [vmem:[%s3297_s2 + $0x110] sm:$0xff] }
 0x1d2   :  { %v411_v5 = vpop.f32.mrf.mxu2  ;;  %1168 = vmatpush.msra.mxu0 %v1103_v6 }
 0x1d3   :  { %v412_v7 = vadd.f32 %v2572_v29, %v411_v5  ;;  %v478_v55 = vmul.f32 0.2, %v462_v2 }
 0x1d4   :  { %1169 = vmatpush.msra.mxu0 %v1102_v26  ;;  %v2891_v26 = vld [vmem:[%s3299_s4 + $0x30] ss:$0 sm:$0xff] }
 0x1d5   :  { %v431_v9 = vmul.f32 0.2, %v412_v7  ;;  %v2758_v37 = vmax.f32 %v462_v2, %v478_v55 }
 0x1d6   :  { %2039 = vmatmul.msk.f32.gmra.mxu1 %vm117_vm0, %v2292_v19  ;;  %v2789_v19 = vld [vmem:[%s3300_s5 + $0x20] ss:$0 sm:$0xff] }
 0x1d7   :  { %v447_v25 = vmax.f32 %v412_v7, %v431_v9  ;;  %v646_v34 = vpop.f32.mrf.mxu0 }
 0x1d8   :  { %1981 = vmatmul.msk.f32.gmra.mxu3 %vm509_vm1, %v2686_v57 }
 0x1d9   :  { %v463_v36 = vadd.f32 %v447_v25, %v341_v4 }
 0x1da   :  { %v414_v24 = vpop.f32.mrf.mxu2 }
 0x1db   :  { %v415_v30 = vadd.f32 %v2572_v29, %v414_v24  ;;  %v479_v59 = vmul.f32 0.2, %v463_v36 }
 0x1dd   :  { %v432_v8 = vmul.f32 0.2, %v415_v30  ;;  %v2769_v41 = vmax.f32 %v463_v36, %v479_v59 }
 0x1de   :  { %2040 = vmatmul.msk.f32.gmra.mxu1 %vm117_vm0, %v2298_v22 }
 0x1df   :  { %v448_v39 = vmax.f32 %v415_v30, %v432_v8  ;;  %v649_v16 = vpop.f32.mrf.mxu0 }
 0x1e0   :  { %1982 = vmatmul.msk.f32.gmra.mxu3 %vm509_vm1, %v2704_v32 }
 0x1e1   :  { %v464_v29 = vadd.f32 %v448_v39, %v344_v40 }
 0x1e3   :  { %v480_v43 = vmul.f32 0.2, %v464_v29 }
 0x1e5   :  { %v2775_v28 = vmax.f32 %v464_v29, %v480_v43 }
 0x1e6   :  { %2041 = vmatmul.msk.f32.gmra.mxu1 %vm117_vm0, %v2310_v31 }
 0x1e7   :  { %v652_v52 = vpop.f32.mrf.mxu0 }
 0x1e8   :  { %1983 = vmatmul.msk.f32.gmra.mxu3 %vm509_vm1, %v2716_v42 }
 0x1ee   :  { %2042 = vmatmul.msk.f32.gmra.mxu1 %vm117_vm0, %v2334_v47 }
 0x1ef   :  { %v655_v47 = vpop.f32.mrf.mxu0 }
 0x1f0   :  { %1984 = vmatmul.msk.f32.gmra.mxu3 %vm509_vm1, %v2734_v54 }
 0x1f6   :  { %2043 = vmatmul.msk.f32.gmra.mxu1 %vm117_vm0, %v2361_v62 }
 0x1f7   :  { %v658_v9 = vpop.f32.mrf.mxu0 }
 0x1f8   :  { %1985 = vmatmul.msk.f32.gmra.mxu3 %vm509_vm1, %v2746_v17 }
 0x1fe   :  { %2044 = vmatmul.msk.f32.gmra.mxu1 %vm117_vm0, %v2384_v12 }
 0x1ff   :  { %v661_v4 = vpop.f32.mrf.mxu0 }
 0x200   :  { %1986 = vmatmul.msk.f32.gmra.mxu3 %vm509_vm1, %v2758_v37 }
 0x206   :  { %2045 = vmatmul.msk.f32.gmra.mxu1 %vm117_vm0, %v2405_v21 }
 0x207   :  { %v664_v59 = vpop.f32.mrf.mxu0 }
 0x208   :  { %1987 = vmatmul.msk.f32.gmra.mxu3 %vm509_vm1, %v2769_v41 }
 0x20e   :  { %2046 = vmatmul.msk.f32.gmra.mxu1 %vm117_vm0, %v2315_v33 }
 0x20f   :  { %v667_v29 = vpop.f32.mrf.mxu0 }
 0x210   :  { %1988 = vmatmul.msk.f32.gmra.mxu3 %vm509_vm1, %v2775_v28 }
 0x216   :  { %2047 = vmatmul.msk.f32.gmra.mxu1 %vm117_vm0, %v2338_v51 }
 0x218   :  { %2021 = vmatmul.msk.f32.vlgmr.msra.gmra.mxu3 %vm509_vm1, %v2587_v44 }
 0x21b   :  { %v575_v45 = vpop.f32.mrf.mxu3 }
 0x21c   :  { %v641_v46 = vadd.f32 %v640_v35, %v575_v45  ;;  %v670_v45 = vpop.f32.mrf.mxu0 }
 0x21e   :  { %v690_v56 = vadd.f32 %v2789_v19, %v641_v46  ;;  %2048 = vmatmul.msk.f32.gmra.mxu1 %vm117_vm0, %v2363_v63 }
 0x220   :  { %v706_v50 = vmul.f32 0.2, %v690_v56  ;;  %2022 = vmatmul.msk.f32.gmra.mxu3 %vm509_vm1, %v2599_v1 }
 0x222   :  { %v722_v22 = vmax.f32 %v690_v56, %v706_v50 }
 0x223   :  { %v578_v44 = vpop.f32.mrf.mxu3 }
 0x224   :  { %v644_v5 = vadd.f32 %v643_v11, %v578_v44  ;;  %2005 = vmatmul.msk.f32.vlgmr.msrb.gmra.mxu2 %vm509_vm1, %v722_v22  ;;  %v673_v44 = vpop.f32.mrf.mxu0 }
 0x226   :  { %v691_v58 = vadd.f32 %v2789_v19, %v644_v5  ;;  %2049 = vmatmul.msk.f32.gmra.mxu1 %vm117_vm0, %v2386_v13 }
 0x228   :  { %v707_v31 = vmul.f32 0.2, %v691_v58  ;;  %2023 = vmatmul.msk.f32.gmra.mxu3 %vm509_vm1, %v2608_v18 }
 0x22a   :  { %v723_v60 = vmax.f32 %v691_v58, %v707_v31  ;;  %v1101_v31 = vld [vmem:[%s3297_s2 + $0x100] sm:$0xff] }
 0x22b   :  { %v581_v1 = vpop.f32.mrf.mxu3  ;;  %1170 = vmatpush.msra.mxu0 %v1101_v31 }
 0x22c   :  { %v647_v20 = vadd.f32 %v646_v34, %v581_v1  ;;  %2006 = vmatmul.msk.f32.gmra.mxu2 %vm509_vm1, %v723_v60  ;;  %v676_v1 = vpop.f32.mrf.mxu0 }
 0x22e   :  { %v692_v3 = vadd.f32 %v2789_v19, %v647_v20  ;;  %2050 = vmatmul.msk.f32.gmra.mxu1 %vm117_vm0, %v2407_v23 }
 0x230   :  { %v708_v0 = vmul.f32 0.2, %v692_v3  ;;  %2024 = vmatmul.msk.f32.gmra.mxu3 %vm509_vm1, %v2620_v38 }
 0x232   :  { %v724_v18 = vmax.f32 %v692_v3, %v708_v0 }
 0x233   :  { %v584_v62 = vpop.f32.mrf.mxu3 }
 0x234   :  { %v650_v7 = vadd.f32 %v649_v16, %v584_v62  ;;  %2007 = vmatmul.msk.f32.gmra.mxu2 %vm509_vm1, %v724_v18  ;;  %v679_v6 = vpop.f32.mrf.mxu0 }
 0x236   :  { %v693_v2 = vadd.f32 %v2789_v19, %v650_v7  ;;  %2051 = vmatmul.msk.f32.gmra.mxu1 %vm117_vm0, %v2340_v53 }
 0x238   :  { %v709_v24 = vmul.f32 0.2, %v693_v2  ;;  %2025 = vmatmul.msk.f32.gmra.mxu3 %vm509_vm1, %v2629_v48 }
 0x23a   :  { %v725_v38 = vmax.f32 %v693_v2, %v709_v24 }
 0x23b   :  { %v587_v10 = vpop.f32.mrf.mxu3 }
 0x23c   :  { %v653_v55 = vadd.f32 %v652_v52, %v587_v10  ;;  %2008 = vmatmul.msk.f32.gmra.mxu2 %vm509_vm1, %v725_v38  ;;  %v682_v38 = vpop.f32.mrf.mxu0 }
 0x23e   :  { %v694_v12 = vadd.f32 %v2789_v19, %v653_v55 }
 0x240   :  { %v710_v25 = vmul.f32 0.2, %v694_v12  ;;  %2026 = vmatmul.msk.f32.gmra.mxu3 %vm509_vm1, %v2645_v15 }
 0x242   :  { %v726_v30 = vmax.f32 %v694_v12, %v710_v25 }
 0x243   :  { %v590_v48 = vpop.f32.mrf.mxu3  ;;  %v955_v18 = vpop.f32.mrf.mxu1 }
 0x244   :  { %v656_v35 = vadd.f32 %v655_v47, %v590_v48  ;;  %2009 = vmatmul.msk.f32.gmra.mxu2 %vm509_vm1, %v726_v30  ;;  %v685_v48 = vpop.f32.mrf.mxu0 }
 0x246   :  { %v695_v21 = vadd.f32 %v2789_v19, %v656_v35 }
 0x248   :  { %v711_v36 = vmul.f32 0.2, %v695_v21  ;;  %2027 = vmatmul.msk.f32.gmra.mxu3 %vm509_vm1, %v2659_v27 }
 0x24a   :  { %v727_v8 = vmax.f32 %v695_v21, %v711_v36 }
 0x24b   :  { %v593_v15 = vpop.f32.mrf.mxu3  ;;  %v958_v10 = vpop.f32.mrf.mxu1 }
 0x24c   :  { %v659_v39 = vadd.f32 %v658_v9, %v593_v15  ;;  %2010 = vmatmul.msk.f32.gmra.mxu2 %vm509_vm1, %v727_v8 }
 0x24e   :  { %v696_v33 = vadd.f32 %v2789_v19, %v659_v39 }
 0x250   :  { %v712_v40 = vmul.f32 0.2, %v696_v33  ;;  %2028 = vmatmul.msk.f32.gmra.mxu3 %vm509_vm1, %v2674_v49 }
 0x252   :  { %v728_v27 = vmax.f32 %v696_v33, %v712_v40 }
 0x253   :  { %v596_v51 = vpop.f32.mrf.mxu3  ;;  %v961_v35 = vpop.f32.mrf.mxu1 }
 0x254   :  { %v662_v11 = vadd.f32 %v661_v4, %v596_v51  ;;  %2011 = vmatmul.msk.f32.gmra.mxu2 %vm509_vm1, %v728_v27 }
 0x256   :  { %v697_v43 = vadd.f32 %v2789_v19, %v662_v11  ;;  %v2898_v11 = vld [vmem:[%s3299_s4 + $0x20] ss:$0 sm:$0xff] }
 0x258   :  { %v713_v34 = vmul.f32 0.2, %v697_v43  ;;  %2029 = vmatmul.msk.f32.gmra.mxu3 %vm509_vm1, %v2686_v57 }
 0x25a   :  { %v729_v49 = vmax.f32 %v697_v43, %v713_v34 }
 0x25b   :  { %v599_v14 = vpop.f32.mrf.mxu3  ;;  %v964_v33 = vpop.f32.mrf.mxu1 }
 0x25c   :  { %v665_v16 = vadd.f32 %v664_v59, %v599_v14  ;;  %2012 = vmatmul.msk.f32.gmra.mxu2 %vm509_vm1, %v729_v49  ;;  %v1259_v59 = vld [vmem:[%s3296_s1 + $0xd8] sm:$0xff] }
 0x25d   :  { %1318 = vmatpush.msra.mxu2 %v1259_v59 }
 0x25e   :  { %v698_v63 = vadd.f32 %v2789_v19, %v665_v16  ;;  %v1258_v16 = vld [vmem:[%s3296_s1 + $0xd0] sm:$0xff] }
 0x25f   :  { %1319 = vmatpush.msra.mxu2 %v1258_v16 }
 0x260   :  { %v714_v46 = vmul.f32 0.2, %v698_v63  ;;  %2030 = vmatmul.msk.f32.gmra.mxu3 %vm509_vm1, %v2704_v32 }
 0x262   :  { %v730_v56 = vmax.f32 %v698_v63, %v714_v46 }
 0x263   :  { %v602_v57 = vpop.f32.mrf.mxu3 }
 0x264   :  { %v668_v50 = vadd.f32 %v667_v29, %v602_v57  ;;  %2013 = vmatmul.msk.f32.gmra.mxu2 %vm509_vm1, %v730_v56  ;;  %v967_v29 = vpop.f32.mrf.mxu1 }
 0x266   :  { %v699_v13 = vadd.f32 %v2789_v19, %v668_v50 }
 0x268   :  { %v715_v22 = vmul.f32 0.2, %v699_v13  ;;  %2031 = vmatmul.msk.f32.gmra.mxu3 %vm509_vm1, %v2716_v42 }
 0x26a   :  { %v731_v52 = vmax.f32 %v699_v13, %v715_v22 }
 0x26b   :  { %v605_v32 = vpop.f32.mrf.mxu3 }
 0x26c   :  { %v671_v5 = vadd.f32 %v670_v45, %v605_v32  ;;  %2014 = vmatmul.msk.f32.gmra.mxu2 %vm509_vm1, %v731_v52  ;;  %v970_v22 = vpop.f32.mrf.mxu1 }
 0x26e   :  { %v700_v23 = vadd.f32 %v2789_v19, %v671_v5 }
 0x270   :  { %v716_v58 = vmul.f32 0.2, %v700_v23  ;;  %2032 = vmatmul.msk.f32.gmra.mxu3 %vm509_vm1, %v2734_v54 }
 0x272   :  { %v732_v42 = vmax.f32 %v700_v23, %v716_v58 }
 0x273   :  { %v608_v60 = vpop.f32.mrf.mxu3 }
 0x274   :  { %v674_v20 = vadd.f32 %v673_v44, %v608_v60  ;;  %2015 = vmatmul.msk.f32.gmra.mxu2 %vm509_vm1, %v732_v42 }
 0x276   :  { %v701_v53 = vadd.f32 %v2789_v19, %v674_v20 }
 0x278   :  { %v717_v47 = vmul.f32 0.2, %v701_v53  ;;  %2033 = vmatmul.msk.f32.gmra.mxu3 %vm509_vm1, %v2746_v17 }
 0x27a   :  { %v733_v3 = vmax.f32 %v701_v53, %v717_v47 }
 0x27b   :  { %v611_v0 = vpop.f32.mrf.mxu3 }
 0x27c   :  { %v677_v54 = vadd.f32 %v676_v1, %v611_v0  ;;  %2016 = vmatmul.msk.f32.gmra.mxu2 %vm509_vm1, %v733_v3  ;;  %v973_v3 = vpop.f32.mrf.mxu1 }
 0x27e   :  { %v702_v62 = vadd.f32 %v2789_v19, %v677_v54  ;;  %v1257_v54 = vld [vmem:[%s3296_s1 + $0xc8] sm:$0xff] }
 0x27f   :  { %1320 = vmatpush.msra.mxu2 %v1257_v54 }
 0x280   :  { %v718_v7 = vmul.f32 0.2, %v702_v62  ;;  %2034 = vmatmul.msk.f32.gmra.mxu3 %vm509_vm1, %v2758_v37 }
 0x282   :  { %v734_v2 = vmax.f32 %v702_v62, %v718_v7 }
 0x283   :  { %v614_v9 = vpop.f32.mrf.mxu3 }
 0x284   :  { %v680_v24 = vadd.f32 %v679_v6, %v614_v9  ;;  %2017 = vmatmul.msk.f32.gmra.mxu2 %vm509_vm1, %v734_v2 }
 0x286   :  { %v703_v17 = vadd.f32 %v2789_v19, %v680_v24 }
 0x288   :  { %v719_v55 = vmul.f32 0.2, %v703_v17  ;;  %2035 = vmatmul.msk.f32.gmra.mxu3 %vm509_vm1, %v2769_v41 }
 0x28a   :  { %v735_v12 = vmax.f32 %v703_v17, %v719_v55 }
 0x28b   :  { %v617_v25 = vpop.f32.mrf.mxu3 }
 0x28c   :  { %v683_v4 = vadd.f32 %v682_v38, %v617_v25  ;;  %2018 = vmatmul.msk.f32.gmra.mxu2 %vm509_vm1, %v735_v12  ;;  %v976_v12 = vpop.f32.mrf.mxu1 }
 0x28e   :  { %v704_v37 = vadd.f32 %v2789_v19, %v683_v4 }
 0x290   :  { %v720_v30 = vmul.f32 0.2, %v704_v37  ;;  %2036 = vmatmul.msk.f32.gmra.mxu3 %vm509_vm1, %v2775_v28 }
 0x292   :  { %v736_v21 = vmax.f32 %v704_v37, %v720_v30 }
 0x293   :  { %v620_v36 = vpop.f32.mrf.mxu3 }
 0x294   :  { %v686_v8 = vadd.f32 %v685_v48, %v620_v36  ;;  %2019 = vmatmul.msk.f32.gmra.mxu2 %vm509_vm1, %v736_v21 }
 0x296   :  { %v705_v41 = vadd.f32 %v2789_v19, %v686_v8 }
 0x298   :  { %v721_v15 = vmul.f32 0.2, %v705_v41  ;;  %2052 = vmatmul.msk.f32.vlgmr.msrb.gmra.mxu3 %vm117_vm0, %v2359_v61 }
 0x29a   :  { %v737_v39 = vmax.f32 %v705_v41, %v721_v15  ;;  %v1256_v41 = vld [vmem:[%s3296_s1 + $0xc0] sm:$0xff] }
 0x29b   :  { %v890_v28 = vpop.f32.mrf.mxu3  ;;  %1321 = vmatpush.msra.mxu2 %v1256_v41 }
 0x29c   :  { %v956_v40 = vadd.f32 %v955_v18, %v890_v28  ;;  %2020 = vmatmul.msk.f32.gmra.mxu2 %vm509_vm1, %v737_v39 }
 0x29e   :  { %v1005_v19 = vadd.f32 %v2891_v26, %v956_v40 }
 0x2a0   :  { %v1021_v61 = vmul.f32 0.2, %v1005_v19 }
 0x2a2   :  { %v1037_v14 = vmax.f32 %v1005_v19, %v1021_v61 }
 0x2a3   :  { %v893_v27 = vpop.f32.mrf.mxu3 }
 0x2a4   :  { %v959_v51 = vadd.f32 %v958_v10, %v893_v27 }
 0x2a6   :  { %v1006_v34 = vadd.f32 %v2891_v26, %v959_v51 }
 0x2a7   :  { %v813_v43 = vpop.f32.mrf.mxu2 }
 0x2a8   :  { %v814_v49 = vadd.f32 %v2898_v11, %v813_v43  ;;  %v1022_v46 = vmul.f32 0.2, %v1006_v34 }
 0x2aa   :  { %v1053_v63 = vadd.f32 %v1037_v14, %v814_v49  ;;  %v1038_v32 = vmax.f32 %v1006_v34, %v1022_v46 }
 0x2ab   :  { %v896_v45 = vpop.f32.mrf.mxu3 }
 0x2ac   :  { %v1069_v56 = vmul.f32 0.2, %v1053_v63  ;;  %v962_v57 = vadd.f32 %v961_v35, %v896_v45 }
 0x2ae   :  { %v2905_v50 = vmax.f32 %v1053_v63, %v1069_v56  ;;  %v1007_v44 = vadd.f32 %v2891_v26, %v962_v57 }
 0x2af   :  { %v816_v13 = vpop.f32.mrf.mxu2 }
 0x2b0   :  { %v817_v52 = vadd.f32 %v2898_v11, %v816_v13  ;;  %2053 = vmatmul.msk.f32.vlgmr.msra.gmra.mxu0 %vm117_vm0, %v2905_v50  ;;  %v1023_v58 = vmul.f32 0.2, %v1007_v44 }
 0x2b2   :  { %v1054_v5 = vadd.f32 %v1038_v32, %v817_v52  ;;  %v1039_v47 = vmax.f32 %v1007_v44, %v1023_v58 }
 0x2b3   :  { %v899_v23 = vpop.f32.mrf.mxu3 }
 0x2b4   :  { %v1070_v31 = vmul.f32 0.2, %v1054_v5  ;;  %v965_v42 = vadd.f32 %v964_v33, %v899_v23  ;;  %v979_v33 = vpop.f32.mrf.mxu1 }
 0x2b6   :  { %v2911_v60 = vmax.f32 %v1054_v5, %v1070_v31  ;;  %v1008_v20 = vadd.f32 %v2891_v26, %v965_v42 }
 0x2b7   :  { %v819_v1 = vpop.f32.mrf.mxu2 }
 0x2b8   :  { %v820_v53 = vadd.f32 %v2898_v11, %v819_v1  ;;  %2054 = vmatmul.msk.f32.gmra.mxu0 %vm117_vm0, %v2911_v60  ;;  %v1024_v18 = vmul.f32 0.2, %v1008_v20 }
 0x2ba   :  { %v1055_v0 = vadd.f32 %v1039_v47, %v820_v53  ;;  %v1040_v38 = vmax.f32 %v1008_v20, %v1024_v18 }
 0x2bb   :  { %v902_v6 = vpop.f32.mrf.mxu3 }
 0x2bc   :  { %v1071_v62 = vmul.f32 0.2, %v1055_v0  ;;  %v968_v7 = vadd.f32 %v967_v29, %v902_v6  ;;  %v982_v45 = vpop.f32.mrf.mxu1 }
 0x2be   :  { %v2920_v2 = vmax.f32 %v1055_v0, %v1071_v62  ;;  %v1009_v24 = vadd.f32 %v2891_v26, %v968_v7 }
 0x2bf   :  { %v822_v9 = vpop.f32.mrf.mxu2 }
 0x2c0   :  { %v823_v17 = vadd.f32 %v2898_v11, %v822_v9  ;;  %2055 = vmatmul.msk.f32.gmra.mxu0 %vm117_vm0, %v2920_v2  ;;  %v1025_v25 = vmul.f32 0.2, %v1009_v24 }
 0x2c2   :  { %v1056_v10 = vadd.f32 %v1040_v38, %v823_v17  ;;  %v1041_v36 = vmax.f32 %v1009_v24, %v1025_v25  ;;  %v1254_v17 = vld [vmem:[%s3296_s1 + $0xb0] sm:$0xff] }
 0x2c3   :  { %v905_v55 = vpop.f32.mrf.mxu3 }
 0x2c4   :  { %v1072_v4 = vmul.f32 0.2, %v1056_v10  ;;  %v971_v37 = vadd.f32 %v970_v22, %v905_v55  ;;  %v1255_v22 = vld [vmem:[%s3296_s1 + $0xb8] sm:$0xff]  ;;  %v985_v20 = vpop.f32.mrf.mxu1 }
 0x2c5   :  { %1322 = vmatpush.msra.mxu2 %v1255_v22 }
 0x2c6   :  { %v2926_v30 = vmax.f32 %v1056_v10, %v1072_v4  ;;  %v1010_v35 = vadd.f32 %v2891_v26, %v971_v37 }
 0x2c7   :  { %v825_v48 = vpop.f32.mrf.mxu2  ;;  %1323 = vmatpush.msra.mxu2 %v1254_v17 }
 0x2c8   :  { %v826_v21 = vadd.f32 %v2898_v11, %v825_v48  ;;  %2056 = vmatmul.msk.f32.gmra.mxu0 %vm117_vm0, %v2926_v30  ;;  %v1026_v59 = vmul.f32 0.2, %v1010_v35 }
 0x2ca   :  { %v1057_v8 = vadd.f32 %v1041_v36, %v826_v21  ;;  %v1042_v51 = vmax.f32 %v1010_v35, %v1026_v59 }
 0x2cb   :  { %v908_v15 = vpop.f32.mrf.mxu3 }
 0x2cc   :  { %v1073_v39 = vmul.f32 0.2, %v1057_v8  ;;  %v974_v28 = vadd.f32 %v973_v3, %v908_v15  ;;  %v988_v10 = vpop.f32.mrf.mxu1 }
 0x2ce   :  { %v2935_v40 = vmax.f32 %v1057_v8, %v1073_v39  ;;  %v1011_v27 = vadd.f32 %v2891_v26, %v974_v28 }
 0x2cf   :  { %v828_v19 = vpop.f32.mrf.mxu2 }
 0x2d0   :  { %v829_v61 = vadd.f32 %v2898_v11, %v828_v19  ;;  %2057 = vmatmul.msk.f32.gmra.mxu0 %vm117_vm0, %v2935_v40  ;;  %v1027_v34 = vmul.f32 0.2, %v1011_v27 }
 0x2d2   :  { %v1058_v29 = vadd.f32 %v1042_v51, %v829_v61  ;;  %v1043_v57 = vmax.f32 %v1011_v27, %v1027_v34 }
 0x2d3   :  { %v911_v43 = vpop.f32.mrf.mxu3 }
 0x2d4   :  { %v1074_v49 = vmul.f32 0.2, %v1058_v29  ;;  %v977_v14 = vadd.f32 %v976_v12, %v911_v43  ;;  %v991_v39 = vpop.f32.mrf.mxu1 }
 0x2d6   :  { %v2941_v16 = vmax.f32 %v1058_v29, %v1074_v49  ;;  %v1012_v46 = vadd.f32 %v2891_v26, %v977_v14 }
 0x2d7   :  { %v831_v63 = vpop.f32.mrf.mxu2 }
 0x2d8   :  { %v832_v56 = vadd.f32 %v2898_v11, %v831_v63  ;;  %2058 = vmatmul.msk.f32.gmra.mxu0 %vm117_vm0, %v2941_v16  ;;  %v1028_v52 = vmul.f32 0.2, %v1012_v46 }
 0x2da   :  { %v1059_v13 = vadd.f32 %v1043_v57, %v832_v56  ;;  %v1044_v31 = vmax.f32 %v1012_v46, %v1028_v52 }
 0x2db   :  { %v914_v44 = vpop.f32.mrf.mxu3 }
 0x2dc   :  { %v1075_v32 = vmul.f32 0.2, %v1059_v13  ;;  %v980_v5 = vadd.f32 %v979_v33, %v914_v44  ;;  %v1253_v33 = vld [vmem:[%s3296_s1 + $0xa8] sm:$0xff]  ;;  %v994_v46 = vpop.f32.mrf.mxu1 }
 0x2dd   :  { %1324 = vmatpush.msra.mxu2 %v1253_v33 }
 0x2de   :  { %v2950_v23 = vmax.f32 %v1059_v13, %v1075_v32  ;;  %v1013_v42 = vadd.f32 %v2891_v26, %v980_v5 }
 0x2df   :  { %v834_v58 = vpop.f32.mrf.mxu2 }
 0x2e0   :  { %v835_v1 = vadd.f32 %v2898_v11, %v834_v58  ;;  %2059 = vmatmul.msk.f32.gmra.mxu0 %vm117_vm0, %v2950_v23  ;;  %v1029_v3 = vmul.f32 0.2, %v1013_v42 }
 0x2e2   :  { %v1060_v53 = vadd.f32 %v1044_v31, %v835_v1  ;;  %v1045_v62 = vmax.f32 %v1013_v42, %v1029_v3 }
 0x2e3   :  { %v917_v47 = vpop.f32.mrf.mxu3 }
 0x2e4   :  { %v1076_v0 = vmul.f32 0.2, %v1060_v53  ;;  %v983_v54 = vadd.f32 %v982_v45, %v917_v47  ;;  %v997_v47 = vpop.f32.mrf.mxu1 }
 0x2e6   :  { %v2956_v6 = vmax.f32 %v1060_v53, %v1076_v0  ;;  %v1014_v7 = vadd.f32 %v2891_v26, %v983_v54  ;;  %v1252_v53 = vld [vmem:[%s3296_s1 + $0xa0] sm:$0xff] }
 0x2e7   :  { %v837_v18 = vpop.f32.mrf.mxu2  ;;  %1325 = vmatpush.msra.mxu2 %v1252_v53 }
 0x2e8   :  { %v838_v9 = vadd.f32 %v2898_v11, %v837_v18  ;;  %2060 = vmatmul.msk.f32.gmra.mxu0 %vm117_vm0, %v2956_v6  ;;  %v1030_v55 = vmul.f32 0.2, %v1014_v7 }
 0x2ea   :  { %v1061_v24 = vadd.f32 %v1045_v62, %v838_v9  ;;  %v1046_v48 = vmax.f32 %v1014_v7, %v1030_v55 }
 0x2eb   :  { %v920_v38 = vpop.f32.mrf.mxu3 }
 0x2ec   :  { %v1077_v12 = vmul.f32 0.2, %v1061_v24  ;;  %v986_v25 = vadd.f32 %v985_v20, %v920_v38 }
 0x2ee   :  { %v2965_v4 = vmax.f32 %v1061_v24, %v1077_v12  ;;  %v1015_v35 = vadd.f32 %v2891_v26, %v986_v25 }
 0x2ef   :  { %v840_v37 = vpop.f32.mrf.mxu2 }
 0x2f0   :  { %v841_v21 = vadd.f32 %v2898_v11, %v840_v37  ;;  %2061 = vmatmul.msk.f32.gmra.mxu0 %vm117_vm0, %v2965_v4  ;;  %v1031_v41 = vmul.f32 0.2, %v1015_v35 }
 0x2f2   :  { %v1062_v36 = vadd.f32 %v1046_v48, %v841_v21  ;;  %v1047_v27 = vmax.f32 %v1015_v35, %v1031_v41 }
 0x2f3   :  { %v923_v8 = vpop.f32.mrf.mxu3 }
 0x2f4   :  { %v1078_v15 = vmul.f32 0.2, %v1062_v36  ;;  %v989_v59 = vadd.f32 %v988_v10, %v923_v8 }
 0x2f6   :  { %v2971_v28 = vmax.f32 %v1062_v36, %v1078_v15  ;;  %v1016_v61 = vadd.f32 %v2891_v26, %v989_v59 }
 0x2f7   :  { %v843_v19 = vpop.f32.mrf.mxu2 }
 0x2f8   :  { %v844_v51 = vadd.f32 %v2898_v11, %v843_v19  ;;  %2062 = vmatmul.msk.f32.gmra.mxu0 %vm117_vm0, %v2971_v28  ;;  %v1032_v34 = vmul.f32 0.2, %v1016_v61 }
 0x2fa   :  { %v1063_v29 = vadd.f32 %v1047_v27, %v844_v51  ;;  %v1048_v56 = vmax.f32 %v1016_v61, %v1032_v34  ;;  %v3019_v34 = vld [vmem:[%s3300_s5 + $0x30] ss:$0 sm:$0xff] }
 0x2fb   :  { %v926_v43 = vpop.f32.mrf.mxu3 }
 0x2fc   :  { %v1079_v49 = vmul.f32 0.2, %v1063_v29  ;;  %v992_v14 = vadd.f32 %v991_v39, %v926_v43 }
 0x2fe   :  { %v2980_v63 = vmax.f32 %v1063_v29, %v1079_v49  ;;  %v1017_v57 = vadd.f32 %v2891_v26, %v992_v14 }
 0x2ff   :  { %v846_v45 = vpop.f32.mrf.mxu2 }
 0x300   :  { %v847_v13 = vadd.f32 %v2898_v11, %v846_v45  ;;  %2063 = vmatmul.msk.f32.gmra.mxu0 %vm117_vm0, %v2980_v63  ;;  %v1033_v52 = vmul.f32 0.2, %v1017_v57 }
 0x302   :  { %v1064_v22 = vadd.f32 %v1048_v56, %v847_v13  ;;  %v1049_v42 = vmax.f32 %v1017_v57, %v1033_v52 }
 0x303   :  { %v929_v44 = vpop.f32.mrf.mxu3 }
 0x304   :  { %v1080_v32 = vmul.f32 0.2, %v1064_v22  ;;  %v995_v5 = vadd.f32 %v994_v46, %v929_v44 }
 0x306   :  { %v2986_v58 = vmax.f32 %v1064_v22, %v1080_v32  ;;  %v1018_v1 = vadd.f32 %v2891_v26, %v995_v5 }
 0x307   :  { %v849_v31 = vpop.f32.mrf.mxu2 }
 0x308   :  { %v850_v20 = vadd.f32 %v2898_v11, %v849_v31  ;;  %2064 = vmatmul.msk.f32.gmra.mxu0 %vm117_vm0, %v2986_v58  ;;  %v1034_v54 = vmul.f32 0.2, %v1018_v1 }
 0x30a   :  { %v1065_v3 = vadd.f32 %v1049_v42, %v850_v20  ;;  %v1050_v24 = vmax.f32 %v1018_v1, %v1034_v54 }
 0x30b   :  { %v932_v0 = vpop.f32.mrf.mxu3 }
 0x30c   :  { %v1081_v18 = vmul.f32 0.2, %v1065_v3  ;;  %v998_v62 = vadd.f32 %v997_v47, %v932_v0 }
 0x30e   :  { %v2995_v7 = vmax.f32 %v1065_v3, %v1081_v18  ;;  %v1019_v17 = vadd.f32 %v2891_v26, %v998_v62 }
 0x30f   :  { %v852_v9 = vpop.f32.mrf.mxu2 }
 0x310   :  { %v853_v38 = vadd.f32 %v2898_v11, %v852_v9  ;;  %2065 = vmatmul.msk.f32.gmra.mxu0 %vm117_vm0, %v2995_v7  ;;  %v1035_v12 = vmul.f32 0.2, %v1019_v17 }
 0x312   :  { %v1066_v10 = vadd.f32 %v1050_v24, %v853_v38  ;;  %v1051_v35 = vmax.f32 %v1019_v17, %v1035_v12 }
 0x313   :  { %v935_v55 = vpop.f32.mrf.mxu3 }
 0x314   :  { %v1082_v25 = vmul.f32 0.2, %v1066_v10 }
 0x316   :  { %v3001_v37 = vmax.f32 %v1066_v10, %v1082_v25 }
 0x317   :  { %v855_v48 = vpop.f32.mrf.mxu2 }
 0x318   :  { %v856_v21 = vadd.f32 %v2898_v11, %v855_v48  ;;  %2066 = vmatmul.msk.f32.gmra.mxu0 %vm117_vm0, %v3001_v37 }
 0x31a   :  { %v1067_v36 = vadd.f32 %v1051_v35, %v856_v21 }
 0x31b   :  { %v1000_v8 = vpop.f32.mrf.mxu3 }
 0x31c   :  { %v1083_v41 = vmul.f32 0.2, %v1067_v36  ;;  %v1001_v15 = vadd.f32 %v1000_v8, %v935_v55 }
 0x31e   :  { %v3006_v59 = vmax.f32 %v1067_v36, %v1083_v41  ;;  %v1020_v39 = vadd.f32 %v2891_v26, %v1001_v15 }
 0x31f   :  { %v858_v33 = vpop.f32.mrf.mxu2 }
 0x320   :  { %v1036_v19 = vmul.f32 0.2, %v1020_v39  ;;  %2067 = vmatmul.msk.f32.gmra.mxu0 %vm117_vm0, %v3006_v59  ;;  %v859_v61 = vadd.f32 %v2898_v11, %v858_v33 }
 0x322   :  { %v1052_v27 = vmax.f32 %v1020_v39, %v1036_v19 }
 0x324   :  { %v1068_v51 = vadd.f32 %v1052_v27, %v859_v61 }
 0x326   :  { %v1084_v29 = vmul.f32 0.2, %v1068_v51 }
 0x328   :  { %v3012_v43 = vmax.f32 %v1068_v51, %v1084_v29 }
 0x32a   :  { %2068 = vmatmul.msk.f32.gmra.mxu0 %vm117_vm0, %v3012_v43 }
 0x32d   :  { %v1172_v26 = vpop.f32.mrf.mxu0 }
 0x32e   :  { %v1173_v49 = vadd.f32 %v3019_v34, %v1172_v26 }
 0x330   :  { %v1220_v14 = vmul.f32 0.2, %v1173_v49 }
 0x332   :  { %v1236_v45 = vmax.f32 %v1173_v49, %v1220_v14 }
 0x334   :  { %2069 = vmatmul.msk.f32.vlgmr.msra.gmra.mxu2 %vm509_vm1, %v1236_v45  ;;  %v1394_v45 = vld [vmem:[%s3297_s2 + $0x138] sm:$0xff] }
 0x335   :  { %v1175_v11 = vpop.f32.mrf.mxu0  ;;  %1457 = vmatpush.msra.mxu3 %v1394_v45  ;;  %v1544_v45 = vld [vmem:[%s3297_s2 + $0x150] sm:$0xff] }
 0x336   :  { %v1176_v46 = vadd.f32 %v3019_v34, %v1175_v11  ;;  %v1668_v11 = vld [vmem:[%s3297_s2 + $0x198] sm:$0xff] }
 0x337   :  { %1683 = vmatpush.msrb.mxu0 %v1668_v11 }
 0x338   :  { %v1221_v56 = vmul.f32 0.2, %v1176_v46 }
 0x33a   :  { %v1237_v57 = vmax.f32 %v1176_v46, %v1221_v56 }
 0x33c   :  { %2070 = vmatmul.msk.f32.gmra.mxu2 %vm509_vm1, %v1237_v57 }
 0x33d   :  { %v1178_v13 = vpop.f32.mrf.mxu0 }
 0x33e   :  { %v1179_v22 = vadd.f32 %v3019_v34, %v1178_v13 }
 0x340   :  { %v1222_v44 = vmul.f32 0.2, %v1179_v22 }
 0x342   :  { %v1238_v52 = vmax.f32 %v1179_v22, %v1222_v44  ;;  %v1393_v22 = vld [vmem:[%s3297_s2 + $0x130] sm:$0xff] }
 0x343   :  { %v1667_v44 = vld [vmem:[%s3297_s2 + $0x190] sm:$0xff]  ;;  %1458 = vmatpush.msra.mxu3 %v1393_v22 }
 0x344   :  { %2071 = vmatmul.msk.f32.gmra.mxu2 %vm509_vm1, %v1238_v52  ;;  %1684 = vmatpush.msrb.mxu0 %v1667_v44 }
 0x345   :  { %v1181_v32 = vpop.f32.mrf.mxu0 }
 0x346   :  { %v1182_v5 = vadd.f32 %v3019_v34, %v1181_v32  ;;  %v1392_v32 = vld [vmem:[%s3297_s2 + $0x128] sm:$0xff] }
 0x347   :  { %1459 = vmatpush.msra.mxu3 %v1392_v32 }
 0x348   :  { %v1223_v31 = vmul.f32 0.2, %v1182_v5 }
 0x34a   :  { %v1239_v42 = vmax.f32 %v1182_v5, %v1223_v31  ;;  %v1666_v5 = vld [vmem:[%s3297_s2 + $0x188] sm:$0xff] }
 0x34b   :  { %1685 = vmatpush.msrb.mxu0 %v1666_v5 }
 0x34c   :  { %2072 = vmatmul.msk.f32.gmra.mxu2 %vm509_vm1, %v1239_v42  ;;  %v1391_v42 = vld [vmem:[%s3297_s2 + $0x120] sm:$0xff] }
 0x34d   :  { %v1184_v1 = vpop.f32.mrf.mxu0  ;;  %1460 = vmatpush.msra.mxu3 %v1391_v42 }
 0x34e   :  { %v1185_v20 = vadd.f32 %v3019_v34, %v1184_v1  ;;  %v1665_v1 = vld [vmem:[%s3297_s2 + $0x180] sm:$0xff] }
 0x34f   :  { %1686 = vmatpush.msrb.mxu0 %v1665_v1 }
 0x350   :  { %v1224_v53 = vmul.f32 0.2, %v1185_v20 }
 0x352   :  { %v1240_v47 = vmax.f32 %v1185_v20, %v1224_v53 }
 0x354   :  { %2073 = vmatmul.msk.f32.gmra.mxu2 %vm509_vm1, %v1240_v47 }
 0x355   :  { %v1187_v3 = vpop.f32.mrf.mxu0 }
 0x356   :  { %v1188_v0 = vadd.f32 %v3019_v34, %v1187_v3 }
 0x358   :  { %v1225_v54 = vmul.f32 0.2, %v1188_v0 }
 0x35a   :  { %v1241_v18 = vmax.f32 %v1188_v0, %v1225_v54 }
 0x35c   :  { %2074 = vmatmul.msk.f32.gmra.mxu2 %vm509_vm1, %v1241_v18 }
 0x35d   :  { %v1190_v62 = vpop.f32.mrf.mxu0 }
 0x35e   :  { %v1191_v9 = vadd.f32 %v3019_v34, %v1190_v62 }
 0x360   :  { %v1226_v24 = vmul.f32 0.2, %v1191_v9 }
 0x362   :  { %v1242_v17 = vmax.f32 %v1191_v9, %v1226_v24  ;;  %v1549_v9 = vld [vmem:[%s3297_s2 + $0x178] sm:$0xff]  ;;  %v3083_v24 = vld [vmem:[%s3299_s4 + $0x40] ss:$0 sm:$0xff] }
 0x363   :  { %1608 = vmatpush.msrb.mxu1 %v1549_v9 }
 0x364   :  { %2075 = vmatmul.msk.f32.gmra.mxu2 %vm509_vm1, %v1242_v17 }
 0x365   :  { %v1193_v38 = vpop.f32.mrf.mxu0 }
 0x366   :  { %v1194_v10 = vadd.f32 %v3019_v34, %v1193_v38 }
 0x368   :  { %v1227_v55 = vmul.f32 0.2, %v1194_v10 }
 0x36a   :  { %v1243_v12 = vmax.f32 %v1194_v10, %v1227_v55 }
 0x36c   :  { %2076 = vmatmul.msk.f32.gmra.mxu2 %vm509_vm1, %v1243_v12 }
 0x36d   :  { %v1196_v25 = vpop.f32.mrf.mxu0 }
 0x36e   :  { %v1197_v48 = vadd.f32 %v3019_v34, %v1196_v25  ;;  %v1548_v25 = vld [vmem:[%s3297_s2 + $0x170] sm:$0xff] }
 0x36f   :  { %1609 = vmatpush.msrb.mxu1 %v1548_v25 }
 0x370   :  { %v1228_v35 = vmul.f32 0.2, %v1197_v48 }
 0x372   :  { %v1244_v21 = vmax.f32 %v1197_v48, %v1228_v35 }
 0x374   :  { %2077 = vmatmul.msk.f32.gmra.mxu2 %vm509_vm1, %v1244_v21 }
 0x375   :  { %v1199_v36 = vpop.f32.mrf.mxu0 }
 0x376   :  { %v1200_v8 = vadd.f32 %v3019_v34, %v1199_v36 }
 0x378   :  { %v1229_v41 = vmul.f32 0.2, %v1200_v8 }
 0x37a   :  { %v1245_v15 = vmax.f32 %v1200_v8, %v1229_v41 }
 0x37c   :  { %2078 = vmatmul.msk.f32.gmra.mxu2 %vm509_vm1, %v1245_v15 }
 0x37d   :  { %v1202_v39 = vpop.f32.mrf.mxu0 }
 0x37e   :  { %v1203_v33 = vadd.f32 %v3019_v34, %v1202_v39  ;;  %v1546_v39 = vld [vmem:[%s3297_s2 + $0x160] sm:$0xff] }
 0x380   :  { %v1230_v19 = vmul.f32 0.2, %v1203_v33 }
 0x382   :  { %v1246_v27 = vmax.f32 %v1203_v33, %v1230_v19 }
 0x384   :  { %2079 = vmatmul.msk.f32.gmra.mxu2 %vm509_vm1, %v1246_v27 }
 0x385   :  { %v1205_v61 = vpop.f32.mrf.mxu0 }
 0x386   :  { %v1206_v51 = vadd.f32 %v3019_v34, %v1205_v61 }
 0x388   :  { %v1231_v29 = vmul.f32 0.2, %v1206_v51 }
 0x38a   :  { %v1247_v26 = vmax.f32 %v1206_v51, %v1231_v29  ;;  %v1545_v51 = vld [vmem:[%s3297_s2 + $0x158] sm:$0xff] }
 0x38c   :  { %2080 = vmatmul.msk.f32.gmra.mxu2 %vm509_vm1, %v1247_v26 }
 0x38d   :  { %v1208_v49 = vpop.f32.mrf.mxu0 }
 0x38e   :  { %v1209_v14 = vadd.f32 %v3019_v34, %v1208_v49 }
 0x390   :  { %v1232_v46 = vmul.f32 0.2, %v1209_v14 }
 0x392   :  { %v1248_v56 = vmax.f32 %v1209_v14, %v1232_v46 }
 0x394   :  { %2081 = vmatmul.msk.f32.gmra.mxu2 %vm509_vm1, %v1248_v56 }
 0x395   :  { %v1211_v57 = vpop.f32.mrf.mxu0 }
 0x396   :  { %v1212_v13 = vadd.f32 %v3019_v34, %v1211_v57 }
 0x398   :  { %v1233_v52 = vmul.f32 0.2, %v1212_v13 }
 0x39a   :  { %v1249_v31 = vmax.f32 %v1212_v13, %v1233_v52  ;;  %v1543_v13 = vld [vmem:[%s3297_s2 + $0x148] sm:$0xff] }
 0x39c   :  { %2082 = vmatmul.msk.f32.gmra.mxu2 %vm509_vm1, %v1249_v31 }
 0x39d   :  { %v1214_v20 = vpop.f32.mrf.mxu0 }
 0x39e   :  { %v1215_v53 = vadd.f32 %v3019_v34, %v1214_v20 }
 0x3a0   :  { %v1234_v47 = vmul.f32 0.2, %v1215_v53 }
 0x3a2   :  { %v1250_v3 = vmax.f32 %v1215_v53, %v1234_v47 }
 0x3a4   :  { %2083 = vmatmul.msk.f32.gmra.mxu2 %vm509_vm1, %v1250_v3 }
 0x3a7   :  { %v1217_v0 = vpop.f32.mrf.mxu0 }
 0x3a8   :  { %v1218_v54 = vadd.f32 %v3019_v34, %v1217_v0  ;;  %v1790_v0 = vld [vmem:[%s3298_s3 + $0x50] sm:$0xff] }
 0x3aa   :  { %v1235_v18 = vmul.f32 0.2, %v1218_v54 }
 0x3ac   :  { %v1251_v62 = vmax.f32 %v1218_v54, %v1235_v18 }
 0x3ae   :  { %2084 = vmatmul.msk.f32.gmra.mxu2 %vm509_vm1, %v1251_v62 }
 0x3b7   :  { %v1327_v17 = vpop.f32.mrf.mxu2 }
 0x3b8   :  { %v1328_v38 = vadd.f32 %v3083_v24, %v1327_v17 }
 0x3ba   :  { %v1375_v10 = vadd.f32 %v1328_v38, %v2905_v50 }
 0x3bc   :  { %2085 = vmatmul.msk.f32.vlgmr.msra.gmra.mxu3 %vm117_vm0, %v1375_v10  ;;  %2117 = vmatmul.msk.f32.vlgmr.msrb.gmra.mxu0 %vm117_vm0, %v1375_v10  ;;  %v1789_v10 = vld [vmem:[%s3298_s3 + $0x48] sm:$0xff] }
 0x3bf   :  { %v1330_v34 = vpop.f32.mrf.mxu2 }
 0x3c0   :  { %v1331_v55 = vadd.f32 %v3083_v24, %v1330_v34 }
 0x3c2   :  { %v1376_v12 = vadd.f32 %v1331_v55, %v2911_v60  ;;  %v1547_v60 = vld [vmem:[%s3297_s2 + $0x168] sm:$0xff] }
 0x3c3   :  { %1610 = vmatpush.msrb.mxu1 %v1547_v60 }
 0x3c4   :  { %2086 = vmatmul.msk.f32.gmra.mxu3 %vm117_vm0, %v1376_v12  ;;  %2118 = vmatmul.msk.f32.gmra.mxu0 %vm117_vm0, %v1376_v12 }
 0x3c5   :  { %1611 = vmatpush.msrb.mxu1 %v1546_v39 }
 0x3c7   :  { %v1333_v48 = vpop.f32.mrf.mxu2  ;;  %1612 = vmatpush.msrb.mxu1 %v1545_v51 }
 0x3c8   :  { %v1334_v50 = vadd.f32 %v3083_v24, %v1333_v48 }
 0x3c9   :  { %1613 = vmatpush.msrb.mxu1 %v1544_v45 }
 0x3ca   :  { %v1377_v35 = vadd.f32 %v1334_v50, %v2920_v2 }
 0x3cb   :  { %1614 = vmatpush.msrb.mxu1 %v1543_v13  ;;  %v1785_v13 = vld [vmem:[%s3298_s3 + $0x28] sm:$0xff] }
 0x3cc   :  { %2087 = vmatmul.msk.f32.gmra.mxu3 %vm117_vm0, %v1377_v35  ;;  %2119 = vmatmul.msk.f32.gmra.mxu0 %vm117_vm0, %v1377_v35 }
 0x3cf   :  { %v1336_v21 = vpop.f32.mrf.mxu2 }
 0x3d0   :  { %v1337_v36 = vadd.f32 %v3083_v24, %v1336_v21  ;;  %v1788_v21 = vld [vmem:[%s3298_s3 + $0x40] sm:$0xff] }
 0x3d2   :  { %v1378_v8 = vadd.f32 %v1337_v36, %v2926_v30 }
 0x3d4   :  { %2088 = vmatmul.msk.f32.gmra.mxu3 %vm117_vm0, %v1378_v8  ;;  %2120 = vmatmul.msk.f32.gmra.mxu0 %vm117_vm0, %v1378_v8 }
 0x3d7   :  { %v1339_v41 = vpop.f32.mrf.mxu2 }
 0x3d8   :  { %v1340_v2 = vadd.f32 %v3083_v24, %v1339_v41 }
 0x3da   :  { %v1379_v15 = vadd.f32 %v1340_v2, %v2935_v40 }
 0x3dc   :  { %2089 = vmatmul.msk.f32.gmra.mxu3 %vm117_vm0, %v1379_v15  ;;  %2121 = vmatmul.msk.f32.gmra.mxu0 %vm117_vm0, %v1379_v15 }
 0x3df   :  { %v1342_v33 = vpop.f32.mrf.mxu2 }
 0x3e0   :  { %v1343_v30 = vadd.f32 %v3083_v24, %v1342_v33 }
 0x3e2   :  { %v1380_v19 = vadd.f32 %v1343_v30, %v2941_v16 }
 0x3e4   :  { %2090 = vmatmul.msk.f32.gmra.mxu3 %vm117_vm0, %v1380_v19  ;;  %2122 = vmatmul.msk.f32.gmra.mxu0 %vm117_vm0, %v1380_v19  ;;  %v1787_v19 = vld [vmem:[%s3298_s3 + $0x38] sm:$0xff] }
 0x3e7   :  { %v1345_v27 = vpop.f32.mrf.mxu2 }
 0x3e8   :  { %v1346_v40 = vadd.f32 %v3083_v24, %v1345_v27 }
 0x3ea   :  { %v1381_v61 = vadd.f32 %v1346_v40, %v2950_v23 }
 0x3ec   :  { %2091 = vmatmul.msk.f32.gmra.mxu3 %vm117_vm0, %v1381_v61  ;;  %2123 = vmatmul.msk.f32.gmra.mxu0 %vm117_vm0, %v1381_v61 }
 0x3ef   :  { %v1348_v29 = vpop.f32.mrf.mxu2 }
 0x3f0   :  { %v1349_v16 = vadd.f32 %v3083_v24, %v1348_v29 }
 0x3f2   :  { %v1382_v26 = vadd.f32 %v1349_v16, %v2956_v6 }
 0x3f4   :  { %2092 = vmatmul.msk.f32.gmra.mxu3 %vm117_vm0, %v1382_v26  ;;  %2124 = vmatmul.msk.f32.gmra.mxu0 %vm117_vm0, %v1382_v26 }
 0x3f7   :  { %v1351_v49 = vpop.f32.mrf.mxu2 }
 0x3f8   :  { %v1352_v23 = vadd.f32 %v3083_v24, %v1351_v49 }
 0x3fa   :  { %v1383_v14 = vadd.f32 %v1352_v23, %v2965_v4  ;;  %v1786_v23 = vld [vmem:[%s3298_s3 + $0x30] sm:$0xff] }
 0x3fc   :  { %2093 = vmatmul.msk.f32.gmra.mxu3 %vm117_vm0, %v1383_v14  ;;  %2125 = vmatmul.msk.f32.gmra.mxu0 %vm117_vm0, %v1383_v14 }
 0x3ff   :  { %v1354_v11 = vpop.f32.mrf.mxu2 }
 0x400   :  { %v1355_v6 = vadd.f32 %v3083_v24, %v1354_v11 }
 0x402   :  { %v1384_v46 = vadd.f32 %v1355_v6, %v2971_v28 }
 0x404   :  { %2094 = vmatmul.msk.f32.gmra.mxu3 %vm117_vm0, %v1384_v46  ;;  %2126 = vmatmul.msk.f32.gmra.mxu0 %vm117_vm0, %v1384_v46 }
 0x407   :  { %v1357_v56 = vpop.f32.mrf.mxu2 }
 0x408   :  { %v1358_v4 = vadd.f32 %v3083_v24, %v1357_v56 }
 0x40a   :  { %v1385_v57 = vadd.f32 %v1358_v4, %v2980_v63  ;;  %v1542_v63 = vld [vmem:[%s3297_s2 + $0x140] sm:$0xff]  ;;  %s2204_s2 = smov 8  }
 0x40b   :  { %1615 = vmatpush.msrb.mxu1 %v1542_v63 }
 0x40c   :  { %2095 = vmatmul.msk.f32.gmra.mxu3 %vm117_vm0, %v1385_v57  ;;  %2127 = vmatmul.msk.f32.gmra.mxu0 %vm117_vm0, %v1385_v57 }
 0x40f   :  { %v1360_v22 = vpop.f32.mrf.mxu2 }
 0x410   :  { %v1361_v28 = vadd.f32 %v3083_v24, %v1360_v22 }
 0x412   :  { %v1386_v44 = vadd.f32 %v1361_v28, %v2986_v58 }
 0x414   :  { %2096 = vmatmul.msk.f32.gmra.mxu3 %vm117_vm0, %v1386_v44  ;;  %2128 = vmatmul.msk.f32.gmra.mxu0 %vm117_vm0, %v1386_v44 }
 0x417   :  { %v1363_v52 = vpop.f32.mrf.mxu2 }
 0x418   :  { %v1364_v32 = vadd.f32 %v3083_v24, %v1363_v52 }
 0x41a   :  { %v1387_v5 = vadd.f32 %v1364_v32, %v2995_v7  ;;  %v1791_v7 = vld [vmem:[%s3298_s3 + $0x58] sm:$0xff] }
 0x41b   :  { %1850 = vmatpush.msrb.mxu2 %v1791_v7 }
 0x41c   :  { %2097 = vmatmul.msk.f32.gmra.mxu3 %vm117_vm0, %v1387_v5  ;;  %2129 = vmatmul.msk.f32.gmra.mxu0 %vm117_vm0, %v1387_v5 }
 0x41d   :  { %1851 = vmatpush.msrb.mxu2 %v1790_v0 }
 0x41f   :  { %v1366_v31 = vpop.f32.mrf.mxu2  ;;  %1852 = vmatpush.msrb.mxu2 %v1789_v10 }
 0x420   :  { %v1367_v58 = vadd.f32 %v3083_v24, %v1366_v31 }
 0x421   :  { %1853 = vmatpush.msrb.mxu2 %v1788_v21 }
 0x422   :  { %v1388_v42 = vadd.f32 %v1367_v58, %v3001_v37 }
 0x423   :  { %1854 = vmatpush.msrb.mxu2 %v1787_v19 }
 0x424   :  { %2098 = vmatmul.msk.f32.gmra.mxu3 %vm117_vm0, %v1388_v42  ;;  %2130 = vmatmul.msk.f32.gmra.mxu0 %vm117_vm0, %v1388_v42  ;;  %v1784_v42 = vld [vmem:[%s3298_s3 + $0x20] sm:$0xff] }
 0x425   :  { %1855 = vmatpush.msrb.mxu2 %v1786_v23 }
 0x427   :  { %v1369_v1 = vpop.f32.mrf.mxu2  ;;  %1856 = vmatpush.msrb.mxu2 %v1785_v13 }
 0x428   :  { %v1370_v20 = vadd.f32 %v3083_v24, %v1369_v1 }
 0x429   :  { %1857 = vmatpush.msrb.mxu2 %v1784_v42 }
 0x42a   :  { %v1389_v53 = vadd.f32 %v1370_v20, %v3006_v59  ;;  %v3176_v59 = vld [vmem:[%s3300_s5 + $0x40] ss:$0 sm:$0xff] }
 0x42c   :  { %2099 = vmatmul.msk.f32.gmra.mxu3 %vm117_vm0, %v1389_v53  ;;  %2131 = vmatmul.msk.f32.gmra.mxu0 %vm117_vm0, %v1389_v53 }
 0x431   :  { %v1372_v47 = vpop.f32.mrf.mxu2 }
 0x432   :  { %v1373_v37 = vadd.f32 %v3083_v24, %v1372_v47 }
 0x434   :  { %v1390_v3 = vadd.f32 %v1373_v37, %v3012_v43 }
 0x436   :  { %2100 = vmatmul.msk.f32.gmra.mxu3 %vm117_vm0, %v1390_v3  ;;  %2132 = vmatmul.msk.f32.gmra.mxu0 %vm117_vm0, %v1390_v3 }
 0x439   :  { %v1688_v58 = vpop.f32.mrf.mxu0 }
 0x43f   :  { %v1462_v54 = vpop.f32.mrf.mxu3 }
 0x440   :  { %v1463_v18 = vadd.f32 %v3176_v59, %v1462_v54 }
 0x441   :  { %v1691_v47 = vpop.f32.mrf.mxu0 }
 0x442   :  { %v1510_v62 = vmul.f32 0.2, %v1463_v18 }
 0x444   :  { %v1526_v9 = vmax.f32 %v1463_v18, %v1510_v62 }
 0x446   :  { %2101 = vmatmul.msk.f32.vlgmr.msrb.gmra.mxu1 %vm509_vm1, %v1526_v9 }
 0x447   :  { %v1465_v43 = vpop.f32.mrf.mxu3 }
 0x448   :  { %v1466_v24 = vadd.f32 %v3176_v59, %v1465_v43 }
 0x449   :  { %v1694_v9 = vpop.f32.mrf.mxu0 }
 0x44a   :  { %v1511_v17 = vmul.f32 0.2, %v1466_v24 }
 0x44c   :  { %v1527_v38 = vmax.f32 %v1466_v24, %v1511_v17  ;;  %v3232_v17 = vld [vmem:[%s3300_s5 + $0x60] ss:$0 sm:$0xff] }
 0x44d   :  { %v1692_v21 = vadd.f32 %v3232_v17, %v1691_v47 }
 0x44e   :  { %2102 = vmatmul.msk.f32.gmra.mxu1 %vm509_vm1, %v1527_v38 }
 0x44f   :  { %v1468_v34 = vpop.f32.mrf.mxu3 }
 0x450   :  { %v1469_v55 = vadd.f32 %v3176_v59, %v1468_v34 }
 0x451   :  { %v1697_v34 = vpop.f32.mrf.mxu0 }
 0x452   :  { %v1512_v12 = vmul.f32 0.2, %v1469_v55 }
 0x454   :  { %v1528_v25 = vmax.f32 %v1469_v55, %v1512_v12  ;;  %v1689_v55 = vadd.f32 %v3232_v17, %v1688_v58 }
 0x456   :  { %2103 = vmatmul.msk.f32.gmra.mxu1 %vm509_vm1, %v1528_v25 }
 0x457   :  { %v1471_v48 = vpop.f32.mrf.mxu3 }
 0x458   :  { %v1472_v50 = vadd.f32 %v3176_v59, %v1471_v48  ;;  %v1736_v48 = vmul.f32 0.2, %v1689_v55 }
 0x45a   :  { %v1513_v35 = vmul.f32 0.2, %v1472_v50 }
 0x45c   :  { %v1529_v60 = vmax.f32 %v1472_v50, %v1513_v35  ;;  %v3240_v50 = vld [vmem:[%s3300_s5 + $0x50] ss:$0 sm:$0xff] }
 0x45e   :  { %2104 = vmatmul.msk.f32.gmra.mxu1 %vm509_vm1, %v1529_v60  ;;  %v1752_v60 = vmax.f32 %v1689_v55, %v1736_v48 }
 0x45f   :  { %v1474_v36 = vpop.f32.mrf.mxu3 }
 0x460   :  { %v1475_v8 = vadd.f32 %v3176_v59, %v1474_v36 }
 0x462   :  { %v1514_v41 = vmul.f32 0.2, %v1475_v8 }
 0x464   :  { %v1530_v2 = vmax.f32 %v1475_v8, %v1514_v41  ;;  %v1737_v41 = vmul.f32 0.2, %v1692_v21 }
 0x466   :  { %2105 = vmatmul.msk.f32.gmra.mxu1 %vm509_vm1, %v1530_v2 }
 0x467   :  { %v1477_v15 = vpop.f32.mrf.mxu3 }
 0x468   :  { %v1478_v39 = vadd.f32 %v3176_v59, %v1477_v15  ;;  %v1753_v15 = vmax.f32 %v1692_v21, %v1737_v41 }
 0x46a   :  { %v1515_v33 = vmul.f32 0.2, %v1478_v39 }
 0x46c   :  { %v1531_v30 = vmax.f32 %v1478_v39, %v1515_v33  ;;  %v1695_v39 = vadd.f32 %v3232_v17, %v1694_v9 }
 0x46e   :  { %2106 = vmatmul.msk.f32.gmra.mxu1 %vm509_vm1, %v1531_v30 }
 0x46f   :  { %v1480_v27 = vpop.f32.mrf.mxu3 }
 0x470   :  { %v1481_v40 = vadd.f32 %v3176_v59, %v1480_v27  ;;  %v1738_v27 = vmul.f32 0.2, %v1695_v39 }
 0x472   :  { %v1516_v61 = vmul.f32 0.2, %v1481_v40 }
 0x474   :  { %v1532_v51 = vmax.f32 %v1481_v40, %v1516_v61  ;;  %v1754_v61 = vmax.f32 %v1695_v39, %v1738_v27 }
 0x476   :  { %2107 = vmatmul.msk.f32.gmra.mxu1 %vm509_vm1, %v1532_v51  ;;  %v1698_v51 = vadd.f32 %v3232_v17, %v1697_v34 }
 0x477   :  { %v1483_v29 = vpop.f32.mrf.mxu3 }
 0x478   :  { %v1484_v16 = vadd.f32 %v3176_v59, %v1483_v29 }
 0x47a   :  { %v1517_v26 = vmul.f32 0.2, %v1484_v16 }
 0x47c   :  { %v1533_v49 = vmax.f32 %v1484_v16, %v1517_v26  ;;  %v1739_v26 = vmul.f32 0.2, %v1698_v51 }
 0x47e   :  { %2108 = vmatmul.msk.f32.gmra.mxu1 %vm509_vm1, %v1533_v49 }
 0x47f   :  { %v1486_v14 = vpop.f32.mrf.mxu3 }
 0x480   :  { %v1487_v45 = vadd.f32 %v3176_v59, %v1486_v14  ;;  %v1755_v14 = vmax.f32 %v1698_v51, %v1739_v26 }
 0x482   :  { %v1518_v11 = vmul.f32 0.2, %v1487_v45 }
 0x484   :  { %v1534_v6 = vmax.f32 %v1487_v45, %v1518_v11 }
 0x486   :  { %2109 = vmatmul.msk.f32.gmra.mxu1 %vm509_vm1, %v1534_v6 }
 0x487   :  { %v1489_v46 = vpop.f32.mrf.mxu3 }
 0x488   :  { %v1490_v56 = vadd.f32 %v3176_v59, %v1489_v46 }
 0x48a   :  { %v1519_v4 = vmul.f32 0.2, %v1490_v56 }
 0x48c   :  { %v1535_v57 = vmax.f32 %v1490_v56, %v1519_v4 }
 0x48e   :  { %2110 = vmatmul.msk.f32.gmra.mxu1 %vm509_vm1, %v1535_v57 }
 0x48f   :  { %v1492_v22 = vpop.f32.mrf.mxu3 }
 0x490   :  { %v1493_v28 = vadd.f32 %v3176_v59, %v1492_v22 }
 0x492   :  { %v1520_v44 = vmul.f32 0.2, %v1493_v28 }
 0x494   :  { %v1536_v63 = vmax.f32 %v1493_v28, %v1520_v44 }
 0x496   :  { %2111 = vmatmul.msk.f32.gmra.mxu1 %vm509_vm1, %v1536_v63 }
 0x497   :  { %v1495_v52 = vpop.f32.mrf.mxu3 }
 0x498   :  { %v1496_v32 = vadd.f32 %v3176_v59, %v1495_v52 }
 0x49a   :  { %v1521_v5 = vmul.f32 0.2, %v1496_v32 }
 0x49c   :  { %v1537_v31 = vmax.f32 %v1496_v32, %v1521_v5 }
 0x49e   :  { %2112 = vmatmul.msk.f32.gmra.mxu1 %vm509_vm1, %v1537_v31 }
 0x49f   :  { %v1498_v1 = vpop.f32.mrf.mxu3 }
 0x4a0   :  { %v1499_v20 = vadd.f32 %v3176_v59, %v1498_v1 }
 0x4a2   :  { %v1522_v53 = vmul.f32 0.2, %v1499_v20 }
 0x4a4   :  { %v1538_v7 = vmax.f32 %v1499_v20, %v1522_v53 }
 0x4a6   :  { %2113 = vmatmul.msk.f32.gmra.mxu1 %vm509_vm1, %v1538_v7 }
 0x4a7   :  { %v1501_v37 = vpop.f32.mrf.mxu3 }
 0x4a8   :  { %v1502_v3 = vadd.f32 %v3176_v59, %v1501_v37 }
 0x4aa   :  { %v1523_v0 = vmul.f32 0.2, %v1502_v3 }
 0x4ac   :  { %v1539_v54 = vmax.f32 %v1502_v3, %v1523_v0 }
 0x4ae   :  { %2114 = vmatmul.msk.f32.gmra.mxu1 %vm509_vm1, %v1539_v54 }
 0x4af   :  { %v1504_v18 = vpop.f32.mrf.mxu3 }
 0x4b0   :  { %v1505_v62 = vadd.f32 %v3176_v59, %v1504_v18 }
 0x4b2   :  { %v1524_v43 = vmul.f32 0.2, %v1505_v62 }
 0x4b4   :  { %v1540_v24 = vmax.f32 %v1505_v62, %v1524_v43 }
 0x4b6   :  { %2115 = vmatmul.msk.f32.gmra.mxu1 %vm509_vm1, %v1540_v24 }
 0x4b9   :  { %v1507_v38 = vpop.f32.mrf.mxu3 }
 0x4ba   :  { %v1508_v10 = vadd.f32 %v3176_v59, %v1507_v38  ;;  %v1700_v59 = vpop.f32.mrf.mxu0 }
 0x4bb   :  { %v1701_v45 = vadd.f32 %v3232_v17, %v1700_v59 }
 0x4bc   :  { %v1525_v12 = vmul.f32 0.2, %v1508_v10 }
 0x4bd   :  { %v1740_v46 = vmul.f32 0.2, %v1701_v45 }
 0x4be   :  { %v1541_v25 = vmax.f32 %v1508_v10, %v1525_v12 }
 0x4bf   :  { %v1756_v57 = vmax.f32 %v1701_v45, %v1740_v46 }
 0x4c0   :  { %2116 = vmatmul.msk.f32.gmra.mxu1 %vm509_vm1, %v1541_v25 }
 0x4c2   :  { %v1703_v19 = vpop.f32.mrf.mxu0 }
 0x4c3   :  { %v1617_v35 = vpop.f32.mrf.mxu1  ;;  %v1704_v13 = vadd.f32 %v3232_v17, %v1703_v19 }
 0x4c4   :  { %v1618_v36 = vadd.f32 %v3240_v50, %v1617_v35 }
 0x4c5   :  { %v1741_v44 = vmul.f32 0.2, %v1704_v13 }
 0x4c6   :  { %v1768_v8 = vadd.f32 %v1752_v60, %v1618_v36 }
 0x4c7   :  { %v1757_v52 = vmax.f32 %v1704_v13, %v1741_v44 }
 0x4c8   :  { %2133 = vmatmul.msk.f32.vlgmr.msrb.gmra.mxu2 %vm509_vm1, %v1768_v8 }
 0x4ca   :  { %v1706_v49 = vpop.f32.mrf.mxu0 }
 0x4cb   :  { %v1620_v2 = vpop.f32.mrf.mxu1  ;;  %v1707_v32 = vadd.f32 %v3232_v17, %v1706_v49 }
 0x4cc   :  { %v1621_v33 = vadd.f32 %v3240_v50, %v1620_v2 }
 0x4cd   :  { %v1742_v42 = vmul.f32 0.2, %v1707_v32 }
 0x4ce   :  { %v1769_v30 = vadd.f32 %v1753_v15, %v1621_v33 }
 0x4cf   :  { %v1758_v20 = vmax.f32 %v1707_v32, %v1742_v42 }
 0x4d0   :  { %2134 = vmatmul.msk.f32.gmra.mxu2 %vm509_vm1, %v1769_v30 }
 0x4d2   :  { %v1709_v56 = vpop.f32.mrf.mxu0 }
 0x4d3   :  { %v1623_v40 = vpop.f32.mrf.mxu1  ;;  %v1710_v53 = vadd.f32 %v3232_v17, %v1709_v56 }
 0x4d4   :  { %v1624_v29 = vadd.f32 %v3240_v50, %v1623_v40 }
 0x4d5   :  { %v1743_v3 = vmul.f32 0.2, %v1710_v53 }
 0x4d6   :  { %v1770_v16 = vadd.f32 %v1754_v61, %v1624_v29 }
 0x4d7   :  { %v1759_v54 = vmax.f32 %v1710_v53, %v1743_v3 }
 0x4d8   :  { %2135 = vmatmul.msk.f32.gmra.mxu2 %vm509_vm1, %v1770_v16 }
 0x4da   :  { %v1712_v31 = vpop.f32.mrf.mxu0 }
 0x4db   :  { %v1626_v23 = vpop.f32.mrf.mxu1  ;;  %v1713_v18 = vadd.f32 %v3232_v17, %v1712_v31 }
 0x4dc   :  { %v1627_v11 = vadd.f32 %v3240_v50, %v1626_v23 }
 0x4dd   :  { %v1744_v43 = vmul.f32 0.2, %v1713_v18 }
 0x4de   :  { %v1771_v6 = vadd.f32 %v1755_v14, %v1627_v11 }
 0x4df   :  { %v1760_v10 = vmax.f32 %v1713_v18, %v1744_v43 }
 0x4e0   :  { %2136 = vmatmul.msk.f32.gmra.mxu2 %vm509_vm1, %v1771_v6 }
 0x4e2   :  { %v1715_v37 = vpop.f32.mrf.mxu0 }
 0x4e3   :  { %v1629_v4 = vpop.f32.mrf.mxu1  ;;  %v1716_v34 = vadd.f32 %v3232_v17, %v1715_v37 }
 0x4e4   :  { %v1630_v22 = vadd.f32 %v3240_v50, %v1629_v4 }
 0x4e5   :  { %v1745_v25 = vmul.f32 0.2, %v1716_v34 }
 0x4e6   :  { %v1772_v28 = vadd.f32 %v1756_v57, %v1630_v22 }
 0x4e7   :  { %v1761_v60 = vmax.f32 %v1716_v34, %v1745_v25 }
 0x4e8   :  { %2137 = vmatmul.msk.f32.gmra.mxu2 %vm509_vm1, %v1772_v28 }
 0x4ea   :  { %v1718_v24 = vpop.f32.mrf.mxu0 }
 0x4eb   :  { %v1632_v63 = vpop.f32.mrf.mxu1  ;;  %v1719_v21 = vadd.f32 %v3232_v17, %v1718_v24 }
 0x4ec   :  { %v1633_v5 = vadd.f32 %v3240_v50, %v1632_v63 }
 0x4ed   :  { %v1746_v8 = vmul.f32 0.2, %v1719_v21 }
 0x4ee   :  { %v1773_v58 = vadd.f32 %v1757_v52, %v1633_v5 }
 0x4ef   :  { %v1762_v2 = vmax.f32 %v1719_v21, %v1746_v8 }
 0x4f0   :  { %2138 = vmatmul.msk.f32.gmra.mxu2 %vm509_vm1, %v1773_v58 }
 0x4f2   :  { %v1721_v48 = vpop.f32.mrf.mxu0 }
 0x4f3   :  { %v1635_v1 = vpop.f32.mrf.mxu1  ;;  %v1722_v15 = vadd.f32 %v3232_v17, %v1721_v48 }
 0x4f4   :  { %v1636_v7 = vadd.f32 %v3240_v50, %v1635_v1 }
 0x4f5   :  { %v1747_v19 = vmul.f32 0.2, %v1722_v15 }
 0x4f6   :  { %v1774_v47 = vadd.f32 %v1758_v20, %v1636_v7  ;;  %v2175_v7 = vld [vmem:[%s3301_s6 + $0x10] ss:$0 sm:$0xff]  ;;  %s2202_s6 = smov [#allocation2]  }
 0x4f7   :  { %v1763_v40 = vmax.f32 %v1722_v15, %v1747_v19  ;;  %s1927_s0 = sshll.u32 %s2202_s6, 4  ;;  %s1928_s0 = int_to_ptr.vmem [resolvable:$true] %s1927_s0 }
 0x4f8   :  { %2139 = vmatmul.msk.f32.gmra.mxu2 %vm509_vm1, %v1774_v47 }
 0x4fa   :  { %v1724_v33 = vpop.f32.mrf.mxu0 }
 0x4fb   :  { %v1638_v0 = vpop.f32.mrf.mxu1  ;;  %v1725_v61 = vadd.f32 %v3232_v17, %v1724_v33 }
 0x4fc   :  { %v1639_v62 = vadd.f32 %v3240_v50, %v1638_v0 }
 0x4fd   :  { %v1748_v26 = vmul.f32 0.2, %v1725_v61 }
 0x4fe   :  { %v1775_v9 = vadd.f32 %v1759_v54, %v1639_v62 }
 0x4ff   :  { %v1764_v23 = vmax.f32 %v1725_v61, %v1748_v26 }
 0x500   :  { %2140 = vmatmul.msk.f32.gmra.mxu2 %vm509_vm1, %v1775_v9 }
 0x502   :  { %v1727_v16 = vpop.f32.mrf.mxu0 }
 0x503   :  { %v1641_v38 = vpop.f32.mrf.mxu1  ;;  %v1728_v14 = vadd.f32 %v3232_v17, %v1727_v16 }
 0x504   :  { %v1642_v55 = vadd.f32 %v3240_v50, %v1641_v38 }
 0x505   :  { %v1749_v6 = vmul.f32 0.2, %v1728_v14 }
 0x506   :  { %v1776_v12 = vadd.f32 %v1760_v10, %v1642_v55 }
 0x507   :  { %v1765_v4 = vmax.f32 %v1728_v14, %v1749_v6 }
 0x508   :  { %2141 = vmatmul.msk.f32.gmra.mxu2 %vm509_vm1, %v1776_v12 }
 0x50a   :  { %v1730_v46 = vpop.f32.mrf.mxu0 }
 0x50b   :  { %v1644_v35 = vpop.f32.mrf.mxu1  ;;  %v1731_v57 = vadd.f32 %v3232_v17, %v1730_v46 }
 0x50c   :  { %v1645_v36 = vadd.f32 %v3240_v50, %v1644_v35 }
 0x50d   :  { %v1750_v28 = vmul.f32 0.2, %v1731_v57 }
 0x50e   :  { %v1777_v59 = vadd.f32 %v1761_v60, %v1645_v36 }
 0x50f   :  { %v1766_v52 = vmax.f32 %v1731_v57, %v1750_v28 }
 0x510   :  { %2142 = vmatmul.msk.f32.gmra.mxu2 %vm509_vm1, %v1777_v59 }
 0x512   :  { %v1733_v44 = vpop.f32.mrf.mxu0 }
 0x513   :  { %v1647_v41 = vpop.f32.mrf.mxu1  ;;  %v1734_v5 = vadd.f32 %v3232_v17, %v1733_v44 }
 0x514   :  { %v1648_v39 = vadd.f32 %v3240_v50, %v1647_v41 }
 0x515   :  { %v1751_v58 = vmul.f32 0.2, %v1734_v5 }
 0x516   :  { %v1778_v30 = vadd.f32 %v1762_v2, %v1648_v39 }
 0x517   :  { %v1767_v1 = vmax.f32 %v1734_v5, %v1751_v58 }
 0x518   :  { %2143 = vmatmul.msk.f32.gmra.mxu2 %vm509_vm1, %v1778_v30 }
 0x51b   :  { %v1650_v27 = vpop.f32.mrf.mxu1 }
 0x51c   :  { %v1651_v51 = vadd.f32 %v3240_v50, %v1650_v27 }
 0x51e   :  { %v1779_v29 = vadd.f32 %v1763_v40, %v1651_v51 }
 0x520   :  { %2144 = vmatmul.msk.f32.gmra.mxu2 %vm509_vm1, %v1779_v29 }
 0x523   :  { %v1653_v49 = vpop.f32.mrf.mxu1 }
 0x524   :  { %v1654_v45 = vadd.f32 %v3240_v50, %v1653_v49 }
 0x526   :  { %v1780_v11 = vadd.f32 %v1764_v23, %v1654_v45 }
 0x528   :  { %2145 = vmatmul.msk.f32.gmra.mxu2 %vm509_vm1, %v1780_v11 }
 0x52b   :  { %v1656_v56 = vpop.f32.mrf.mxu1 }
 0x52c   :  { %v1657_v13 = vadd.f32 %v3240_v50, %v1656_v56 }
 0x52e   :  { %v1781_v22 = vadd.f32 %v1765_v4, %v1657_v13 }
 0x530   :  { %2146 = vmatmul.msk.f32.gmra.mxu2 %vm509_vm1, %v1781_v22 }
 0x533   :  { %v1659_v63 = vpop.f32.mrf.mxu1 }
 0x534   :  { %v1660_v32 = vadd.f32 %v3240_v50, %v1659_v63 }
 0x536   :  { %v1782_v31 = vadd.f32 %v1766_v52, %v1660_v32 }
 0x538   :  { %2147 = vmatmul.msk.f32.gmra.mxu2 %vm509_vm1, %v1782_v31 }
 0x53d   :  { %v1662_v42 = vpop.f32.mrf.mxu1 }
 0x53e   :  { %v1663_v20 = vadd.f32 %v3240_v50, %v1662_v42 }
 0x540   :  { %v1783_v53 = vadd.f32 %v1767_v1, %v1663_v20 }
 0x542   :  { %2148 = vmatmul.msk.f32.gmra.mxu2 %vm509_vm1, %v1783_v53 }
 0x54b   :  { %v1859_v47 = vpop.f32.mrf.mxu2 }
 0x54c   :  { %v1860_v37 = vadd.f32 %v2175_v7, %v1859_v47 }
 0x54e   :  { %1907 = vst [vmem:[#allocation2] sm:$0xff] %v1860_v37 }
 0x553   :  { %v1862_v3 = vpop.f32.mrf.mxu2 }
 0x554   :  { %v1863_v17 = vadd.f32 %v2175_v7, %v1862_v3 }
 0x556   :  { %1908 = vst [vmem:[#allocation2 + $0x8] sm:$0xff] %v1863_v17 }
 0x55b   :  { %v1865_v0 = vpop.f32.mrf.mxu2 }
 0x55c   :  { %v1866_v54 = vadd.f32 %v2175_v7, %v1865_v0 }
 0x55e   :  { %1909 = vst [vmem:[#allocation2 + $0x10] sm:$0xff] %v1866_v54 }
 0x563   :  { %v1868_v18 = vpop.f32.mrf.mxu2 }
 0x564   :  { %v1869_v62 = vadd.f32 %v2175_v7, %v1868_v18 }
 0x566   :  { %1910 = vst [vmem:[#allocation2 + $0x18] sm:$0xff] %v1869_v62 }
 0x56b   :  { %v1871_v50 = vpop.f32.mrf.mxu2 }
 0x56c   :  { %v1872_v9 = vadd.f32 %v2175_v7, %v1871_v50 }
 0x56e   :  { %1911 = vst [vmem:[#allocation2 + $0x20] sm:$0xff] %v1872_v9 }
 0x573   :  { %v1874_v43 = vpop.f32.mrf.mxu2 }
 0x574   :  { %v1875_v24 = vadd.f32 %v2175_v7, %v1874_v43 }
 0x576   :  { %1912 = vst [vmem:[#allocation2 + $0x28] sm:$0xff] %v1875_v24 }
 0x57b   :  { %v1877_v38 = vpop.f32.mrf.mxu2 }
 0x57c   :  { %v1878_v10 = vadd.f32 %v2175_v7, %v1877_v38 }
 0x57e   :  { %1913 = vst [vmem:[#allocation2 + $0x30] sm:$0xff] %v1878_v10 }
 0x583   :  { %v1880_v34 = vpop.f32.mrf.mxu2 }
 0x584   :  { %v1881_v55 = vadd.f32 %v2175_v7, %v1880_v34 }
 0x586   :  { %1914 = vst [vmem:[#allocation2 + $0x38] sm:$0xff] %v1881_v55 }
 0x58b   :  { %v1883_v12 = vpop.f32.mrf.mxu2 }
 0x58c   :  { %v1884_v25 = vadd.f32 %v2175_v7, %v1883_v12 }
 0x58e   :  { %1915 = vst [vmem:[#allocation2 + $0x40] sm:$0xff] %v1884_v25 }
 0x593   :  { %v1886_v48 = vpop.f32.mrf.mxu2 }
 0x594   :  { %v1887_v35 = vadd.f32 %v2175_v7, %v1886_v48 }
 0x596   :  { %1916 = vst [vmem:[#allocation2 + $0x48] sm:$0xff] %v1887_v35 }
 0x59b   :  { %v1889_v60 = vpop.f32.mrf.mxu2 }
 0x59c   :  { %v1890_v21 = vadd.f32 %v2175_v7, %v1889_v60 }
 0x59e   :  { %1917 = vst [vmem:[#allocation2 + $0x50] sm:$0xff] %v1890_v21 }
 0x5a3   :  { %v1892_v36 = vpop.f32.mrf.mxu2 }
 0x5a4   :  { %v1893_v59 = vadd.f32 %v2175_v7, %v1892_v36 }
 0x5a6   :  { %1918 = vst [vmem:[#allocation2 + $0x58] sm:$0xff] %v1893_v59 }
 0x5ab   :  { %v1895_v8 = vpop.f32.mrf.mxu2 }
 0x5ac   :  { %v1896_v41 = vadd.f32 %v2175_v7, %v1895_v8 }
 0x5ae   :  { %1919 = vst [vmem:[#allocation2 + $0x60] sm:$0xff] %v1896_v41 }
 0x5b3   :  { %v1898_v2 = vpop.f32.mrf.mxu2 }
 0x5b4   :  { %v1899_v15 = vadd.f32 %v2175_v7, %v1898_v2 }
 0x5b6   :  { %1920 = vst [vmem:[#allocation2 + $0x68] sm:$0xff] %v1899_v15 }
 0x5bb   :  { %v1901_v39 = vpop.f32.mrf.mxu2 }
 0x5bc   :  { %v1902_v33 = vadd.f32 %v2175_v7, %v1901_v39 }
 0x5be   :  { %1921 = vst [vmem:[#allocation2 + $0x70] sm:$0xff] %v1902_v33 }
 0x5c5   :  { %v1904_v30 = vpop.f32.mrf.mxu2 }
 0x5c6   :  { %v1905_v19 = vadd.f32 %v2175_v7, %v1904_v30 }
 0x5c8   :  { %1922 = vst [vmem:[#allocation2 + $0x78] sm:$0xff] %v1905_v19 }
 0x5c9   :  { %1935 = dma.vmem_to_hbm [thread:$0]  %s1928_s0, 2048, %s1930_s19, [#allocation3], %s2203_s20, %s2203_s20, %s2204_s2  }
 0x5ca   :  { %2200 = dma.done.wait [#allocation3], 2048  }
 0x5cb   :  { %2201 = vsyncadd [#allocation3], 4294965248 }
 0x5cc   :  { %1940 = vsyncpa [#allocation3], 1 }

// kernel: tpu_custom_call.1
= control target key start
LH: loop header
LB: loop body
LE: loop exit
PB: predicated region body
PF: predicated region fallthrough
CT: control target
= control target key end

     0   :  { %vm117_vm0 = vcmask 261120   ;;  %s3295_s0 = inlined_call_operand.vmem [shape: f32[1,16,32], index: 0, kind: input, shape index: {}]   ;;  %s3296_s1 = inlined_call_operand.vmem [shape: f32[224,32], index: 1, kind: input, shape index: {}]   ;;  %s3297_s2 = inlined_call_operand.vmem [shape: f32[416,64], index: 2, kind: input, shape index: {}]   ;;  %s3298_s3 = inlined_call_operand.vmem [shape: f32[96,128], index: 3, kind: input, shape index: {}]   ;;  %s3299_s4 = inlined_call_operand.vmem [shape: f32[80,32], index: 4, kind: input, shape index: {}]   ;;  %s3300_s5 = inlined_call_operand.vmem [shape: f32[112,64], index: 5, kind: input, shape index: {}]   ;;  %s3301_s6 = inlined_call_operand.vmem [shape: f32[32,128], index: 6, kind: input, shape index: {}]   ;;  %s3302_s7 = inlined_call_operand.hbm [shape: f32[128,128], index: 7, kind: output, shape index: {}]  }
   0x1   :  { %v114_v0 = vld [vmem:[%s3298_s3 + $0x18] sm:$0xff]  ;;  %v113_v1 = vld [vmem:[%s3298_s3 + $0x10] sm:$0xff]  ;;  %v112_v3 = vld [vmem:[%s3298_s3 + $0x8] sm:$0xff] }
   0x2   :  { %178 = vmatpush.msra.mxu0 %v114_v0  ;;  %v2254_v2 = vld [vmem:[%s3299_s4 + $0x10] sm:$0xff]  ;;  %2149 = vmatpush.msra.mxu3 %v114_v0  ;;  %v2262_v4 = vld [vmem:[%s3295_s0] sm:$0xff]  ;;  %v2278_v10 = vld [vmem:[%s3295_s0 + $0x8] sm:$0xff] }
   0x3   :  { %v2267_v5 = vld [vmem:[%s3299_s4] sm:$0xff]  ;;  %v79_v7 = vperm.slane %v2254_v2, 0 }
   0x4   :  { %179 = vmatpush.msra.mxu0 %v113_v1  ;;  %v47_v6 = vperm.slane %v2267_v5, 0  ;;  %2150 = vmatpush.msra.mxu3 %v113_v1  ;;  %v111_v8 = vld [vmem:[%s3298_s3] sm:$0xff] }
   0x6   :  { %180 = vmatpush.msra.mxu0 %v112_v3  ;;  %v63_v9 = vmul.f32 %v47_v6, %v2262_v4  ;;  %2151 = vmatpush.msra.mxu3 %v112_v3 }
   0x8   :  { %181 = vmatpush.msra.mxu0 %v111_v8  ;;  %v2280_v11 = vadd.f32 %v79_v7, %v63_v9  ;;  %2152 = vmatpush.msra.mxu3 %v111_v8 }
   0x9   :  { %12 = vsyncpa [#allocation3], 0  ;;  %v64_v12 = vmul.f32 %v47_v6, %v2278_v10  ;;  %v40_v13 = vrot.slane %v2267_v5, 1  ;;  %v29_v15 = vrot.slane %v2254_v2, 1  ;;  %v41_v21 = vrot.slane %v2267_v5, 2  ;;  %v278_v38 = vld [vmem:[%s3297_s2 + $0x78] sm:$0xff] }
   0xa   :  { %1941 = vmatmul.msk.f32.vlgmr.msra.gmra.mxu0 %vm117_vm0, %v2280_v11  ;;  %v30_v23 = vrot.slane %v2254_v2, 2  ;;  %v32_v27 = vrot.slane %v2254_v2, 4  ;;  %v43_v28 = vrot.slane %v2267_v5, 4  ;;  %v42_v35 = vrot.slane %v2267_v5, 3  ;;  %v277_v39 = vld [vmem:[%s3297_s2 + $0x70] sm:$0xff]  ;;  %281 = vmatpush.msra.mxu1 %v278_v38  ;;  %v276_v57 = vld [vmem:[%s3297_s2 + $0x68] sm:$0xff] }
   0xb   :  { %v2286_v14 = vadd.f32 %v79_v7, %v64_v12  ;;  %v48_v16 = vperm.slane %v40_v13, 0  ;;  %v80_v18 = vperm.slane %v29_v15, 0  ;;  %v49_v24 = vperm.slane %v41_v21, 0  ;;  %v275_v58 = vld [vmem:[%s3297_s2 + $0x60] sm:$0xff]  ;;  %v274_v60 = vld [vmem:[%s3297_s2 + $0x58] sm:$0xff]  ;;  %v273_v3 = vld [vmem:[%s3297_s2 + $0x50] sm:$0xff] }
   0xc   :  { %v81_v26 = vperm.slane %v30_v23, 0  ;;  %v2306_v29 = vperm.slane %v43_v28, 0  ;;  %v2308_v30 = vperm.slane %v32_v27, 0  ;;  %v33_v36 = vrot.slane %v2254_v2, 5  ;;  %282 = vmatpush.msra.mxu1 %v277_v39  ;;  %v271_v8 = vld [vmem:[%s3297_s2 + $0x40] sm:$0xff]  ;;  %v270_v9 = vld [vmem:[%s3297_s2 + $0x38] sm:$0xff] }
   0xd   :  { %v65_v17 = vmul.f32 %v48_v16, %v2262_v4  ;;  %v66_v20 = vmul.f32 %v48_v16, %v2278_v10  ;;  %v67_v25 = vmul.f32 %v49_v24, %v2262_v4  ;;  %v68_v34 = vmul.f32 %v49_v24, %v2278_v10  ;;  %v269_v15 = vld [vmem:[%s3297_s2 + $0x30] sm:$0xff]  ;;  %v268_v16 = vld [vmem:[%s3297_s2 + $0x28] sm:$0xff]  ;;  %v2435_v27 = vld [vmem:[%s3301_s6] ss:$0 sm:$0xff]  ;;  %s1929_s19 = sshll.u32 %s3302_s7, 4  ;;  %s2203_s20 = smov 128   ;;  %s1930_s19 = int_to_ptr.hbm [resolvable:$true] %s1929_s19 }
   0xe   :  { %v72_v32 = vmul.f32 %v2306_v29, %v2278_v10  ;;  %v44_v37 = vrot.slane %v2267_v5, 5  ;;  %v35_v40 = vrot.slane %v2254_v2, 7  ;;  %v46_v41 = vrot.slane %v2267_v5, 7  ;;  %283 = vmatpush.msra.mxu1 %v276_v57  ;;  %v264_v24 = vld [vmem:[%s3297_s2 + $0x8] sm:$0xff] }
   0xf   :  { %v2292_v19 = vadd.f32 %v80_v18, %v65_v17  ;;  %v2298_v22 = vadd.f32 %v80_v18, %v66_v20  ;;  %v2310_v31 = vadd.f32 %v81_v26, %v67_v25  ;;  %v84_v43 = vperm.slane %v33_v36, 0  ;;  %v267_v20 = vld [vmem:[%s3297_s2 + $0x20] sm:$0xff] }
  0x10   :  { %v2315_v33 = vadd.f32 %v2308_v30, %v72_v32  ;;  %v52_v42 = vperm.slane %v44_v37, 0  ;;  %v31_v44 = vrot.slane %v2254_v2, 3  ;;  %v54_v45 = vperm.slane %v46_v41, 0  ;;  %284 = vmatpush.msra.mxu1 %v275_v58  ;;  %v263_v25 = vld [vmem:[%s3297_s2] sm:$0xff]  ;;  %v347_v41 = vld [vmem:[%s3297_s2 + $0x88] sm:$0xff] }
  0x11   :  { %v86_v46 = vperm.slane %v35_v40, 0  ;;  %v2334_v47 = vadd.f32 %v81_v26, %v68_v34  ;;  %v50_v48 = vperm.slane %v42_v35, 0  ;;  %v45_v56 = vrot.slane %v2267_v5, 6  ;;  %v349_v26 = vld [vmem:[%s3297_s2 + $0x98] sm:$0xff]  ;;  %v348_v34 = vld [vmem:[%s3297_s2 + $0x90] sm:$0xff] }
  0x12   :  { %1942 = vmatmul.msk.f32.gmra.mxu0 %vm117_vm0, %v2286_v14  ;;  %1950 = vmatmul.msk.f32.vlgmr.msra.gmra.mxu3 %vm117_vm0, %v2315_v33  ;;  %v73_v49 = vmul.f32 %v52_v42, %v2262_v4  ;;  %v77_v50 = vmul.f32 %v54_v45, %v2262_v4  ;;  %v82_v52 = vperm.slane %v31_v44, 0  ;;  %v74_v55 = vmul.f32 %v52_v42, %v2278_v10  ;;  %v346_v42 = vld [vmem:[%s3297_s2 + $0x80] sm:$0xff] }
  0x13   :  { %v69_v54 = vmul.f32 %v50_v48, %v2262_v4  ;;  %v78_v59 = vmul.f32 %v54_v45, %v2278_v10  ;;  %v34_v0 = vrot.slane %v2254_v2, 6  ;;  %v53_v1 = vperm.slane %v45_v56, 0  ;;  %285 = vmatpush.msra.mxu1 %v274_v60  ;;  %v272_v2 = vld [vmem:[%s3297_s2 + $0x48] sm:$0xff]  ;;  %2153 = vmatpush.msra.mxu2 %v349_v26 }
  0x14   :  { %v2338_v51 = vadd.f32 %v84_v43, %v73_v49  ;;  %v2340_v53 = vadd.f32 %v86_v46, %v77_v50  ;;  %v2363_v63 = vadd.f32 %v84_v43, %v74_v55  ;;  %v70_v5 = vmul.f32 %v50_v48, %v2278_v10 }
  0x15   :  { %v2359_v61 = vadd.f32 %v86_v46, %v78_v59  ;;  %v2361_v62 = vadd.f32 %v82_v52, %v69_v54  ;;  %286 = vmatpush.msra.mxu1 %v273_v3  ;;  %v75_v6 = vmul.f32 %v53_v1, %v2262_v4  ;;  %v85_v7 = vperm.slane %v34_v0, 0  ;;  %2154 = vmatpush.msra.mxu2 %v348_v34 }
  0x16   :  { %v2384_v12 = vadd.f32 %v82_v52, %v70_v5  ;;  %v71_v17 = vmul.f32 %v2306_v29, %v2262_v4  ;;  %v76_v18 = vmul.f32 %v53_v1, %v2278_v10  ;;  %v266_v4 = vld [vmem:[%s3297_s2 + $0x18] sm:$0xff]  ;;  %v265_v10 = vld [vmem:[%s3297_s2 + $0x10] sm:$0xff]  ;;  %vm509_vm1 = vcmask 523264  }
  0x17   :  { %287 = vmatpush.msra.mxu1 %v272_v2  ;;  %v2386_v13 = vadd.f32 %v85_v7, %v75_v6  ;;  %2155 = vmatpush.msra.mxu2 %v347_v41 }
  0x18   :  { %v2405_v21 = vadd.f32 %v2308_v30, %v71_v17  ;;  %v2407_v23 = vadd.f32 %v85_v7, %v76_v18 }
  0x19   :  { %288 = vmatpush.msra.mxu1 %v271_v8  ;;  %2156 = vmatpush.msra.mxu2 %v346_v42 }
  0x1a   :  { %1943 = vmatmul.msk.f32.gmra.mxu0 %vm117_vm0, %v2292_v19  ;;  %1951 = vmatmul.msk.f32.gmra.mxu3 %vm117_vm0, %v2338_v51 }
  0x1b   :  { %289 = vmatpush.msra.mxu1 %v270_v9  ;;  %1964 = vmatmul.msk.f32.vlgmr.msra.gmra.mxu2 %vm117_vm0, %v2384_v12 }
  0x1d   :  { %290 = vmatpush.msra.mxu1 %v269_v15 }
  0x1f   :  { %291 = vmatpush.msra.mxu1 %v268_v16 }
  0x21   :  { %292 = vmatpush.msra.mxu1 %v267_v20 }
  0x22   :  { %1944 = vmatmul.msk.f32.gmra.mxu0 %vm117_vm0, %v2298_v22  ;;  %1952 = vmatmul.msk.f32.gmra.mxu3 %vm117_vm0, %v2363_v63 }
  0x23   :  { %293 = vmatpush.msra.mxu1 %v266_v4  ;;  %1965 = vmatmul.msk.f32.gmra.mxu2 %vm117_vm0, %v2405_v21 }
  0x25   :  { %294 = vmatpush.msra.mxu1 %v265_v10 }
  0x27   :  { %295 = vmatpush.msra.mxu1 %v264_v24 }
  0x29   :  { %296 = vmatpush.msra.mxu1 %v263_v25 }
  0x2a   :  { %1945 = vmatmul.msk.f32.gmra.mxu0 %vm117_vm0, %v2310_v31  ;;  %1953 = vmatmul.msk.f32.gmra.mxu3 %vm117_vm0, %v2386_v13 }
  0x2b   :  { %364 = vmatpush.msrb.mxu1 %v349_v26  ;;  %1966 = vmatmul.msk.f32.gmra.mxu2 %vm117_vm0, %v2315_v33 }
  0x2d   :  { %365 = vmatpush.msrb.mxu1 %v348_v34 }
  0x2f   :  { %366 = vmatpush.msrb.mxu1 %v347_v41 }
  0x31   :  { %367 = vmatpush.msrb.mxu1 %v346_v42 }
  0x32   :  { %1946 = vmatmul.msk.f32.gmra.mxu0 %vm117_vm0, %v2334_v47  ;;  %1954 = vmatmul.msk.f32.gmra.mxu3 %vm117_vm0, %v2407_v23 }
  0x33   :  { %1967 = vmatmul.msk.f32.gmra.mxu2 %vm117_vm0, %v2338_v51 }
  0x3a   :  { %1947 = vmatmul.msk.f32.gmra.mxu0 %vm117_vm0, %v2361_v62  ;;  %1955 = vmatmul.msk.f32.gmra.mxu3 %vm117_vm0, %v2340_v53 }
  0x3b   :  { %1968 = vmatmul.msk.f32.gmra.mxu2 %vm117_vm0, %v2363_v63 }
  0x42   :  { %1948 = vmatmul.msk.f32.gmra.mxu0 %vm117_vm0, %v2384_v12  ;;  %1956 = vmatmul.msk.f32.gmra.mxu3 %vm117_vm0, %v2359_v61 }
  0x43   :  { %1969 = vmatmul.msk.f32.gmra.mxu2 %vm117_vm0, %v2386_v13 }
  0x4a   :  { %1949 = vmatmul.msk.f32.gmra.mxu0 %vm117_vm0, %v2405_v21 }
  0x4b   :  { %1970 = vmatmul.msk.f32.gmra.mxu2 %vm117_vm0, %v2407_v23 }
  0x53   :  { %1971 = vmatmul.msk.f32.gmra.mxu2 %vm117_vm0, %v2340_v53 }
  0x5b   :  { %1972 = vmatmul.msk.f32.gmra.mxu2 %vm117_vm0, %v2359_v61 }
  0x87   :  { %v183_v28 = vpop.f32.mrf.mxu0 }
  0x88   :  { %v184_v29 = vadd.f32 %v2435_v27, %v183_v28 }
  0x8a   :  { %v231_v30 = vmul.f32 0.2, %v184_v29 }
  0x8c   :  { %v247_v32 = vmax.f32 %v184_v29, %v231_v30 }
  0x8e   :  { %297 = vmatmul.f32.vlgmr.msra.gmra.mxu1 %v247_v32 }
  0x8f   :  { %v186_v35 = vpop.f32.mrf.mxu0 }
  0x90   :  { %v187_v36 = vadd.f32 %v2435_v27, %v186_v35 }
  0x92   :  { %v232_v37 = vmul.f32 0.2, %v187_v36 }
  0x94   :  { %v248_v38 = vmax.f32 %v187_v36, %v232_v37 }
  0x95   :  { %v210_v5 = vpop.f32.mrf.mxu3 }
  0x96   :  { %300 = vmatmul.f32.gmra.mxu1 %v248_v38  ;;  %v211_v18 = vadd.f32 %v2435_v27, %v210_v5 }
  0x97   :  { %v189_v39 = vpop.f32.mrf.mxu0 }
  0x98   :  { %v190_v40 = vadd.f32 %v2435_v27, %v189_v39  ;;  %v240_v4 = vmul.f32 0.2, %v211_v18 }
  0x9a   :  { %v233_v43 = vmul.f32 0.2, %v190_v40  ;;  %v256_v25 = vmax.f32 %v211_v18, %v240_v4  ;;  %v502_v18 = vld [vmem:[%s3297_s2 + $0xc8] sm:$0xff] }
  0x9c   :  { %v249_v44 = vmax.f32 %v190_v40, %v233_v43 }
  0x9d   :  { %v213_v15 = vpop.f32.mrf.mxu3 }
  0x9e   :  { %303 = vmatmul.f32.gmra.mxu1 %v249_v44  ;;  %v214_v24 = vadd.f32 %v2435_v27, %v213_v15  ;;  %v498_v15 = vld [vmem:[%s3297_s2 + $0xa8] sm:$0xff] }
  0x9f   :  { %v192_v45 = vpop.f32.mrf.mxu0 }
  0xa0   :  { %v193_v46 = vadd.f32 %v2435_v27, %v192_v45  ;;  %v241_v26 = vmul.f32 0.2, %v214_v24 }
  0xa2   :  { %v234_v48 = vmul.f32 0.2, %v193_v46  ;;  %v257_v30 = vmax.f32 %v214_v24, %v241_v26  ;;  %v501_v24 = vld [vmem:[%s3297_s2 + $0xc0] sm:$0xff] }
  0xa4   :  { %v250_v49 = vmax.f32 %v193_v46, %v234_v48 }
  0xa5   :  { %v216_v10 = vpop.f32.mrf.mxu3 }
  0xa6   :  { %306 = vmatmul.f32.gmra.mxu1 %v250_v49  ;;  %v217_v29 = vadd.f32 %v2435_v27, %v216_v10  ;;  %v497_v10 = vld [vmem:[%s3297_s2 + $0xa0] sm:$0xff] }
  0xa7   :  { %v195_v50 = vpop.f32.mrf.mxu0 }
  0xa8   :  { %v196_v52 = vadd.f32 %v2435_v27, %v195_v50  ;;  %v242_v32 = vmul.f32 0.2, %v217_v29 }
  0xaa   :  { %v235_v54 = vmul.f32 0.2, %v196_v52  ;;  %v258_v35 = vmax.f32 %v217_v29, %v242_v32  ;;  %v2572_v29 = vld [vmem:[%s3300_s5 + $0x10] ss:$0 sm:$0xff] }
  0xac   :  { %v251_v55 = vmax.f32 %v196_v52, %v235_v54 }
  0xad   :  { %v219_v28 = vpop.f32.mrf.mxu3 }
  0xae   :  { %309 = vmatmul.f32.gmra.mxu1 %v251_v55  ;;  %v220_v34 = vadd.f32 %v2435_v27, %v219_v28 }
  0xaf   :  { %v198_v56 = vpop.f32.mrf.mxu0 }
  0xb0   :  { %v199_v57 = vadd.f32 %v2435_v27, %v198_v56  ;;  %v243_v37 = vmul.f32 0.2, %v220_v34 }
  0xb2   :  { %v236_v58 = vmul.f32 0.2, %v199_v57  ;;  %v259_v39 = vmax.f32 %v220_v34, %v243_v37  ;;  %v2580_v34 = vld [vmem:[%s3300_s5] ss:$0 sm:$0xff] }
  0xb4   :  { %v252_v59 = vmax.f32 %v199_v57, %v236_v58  ;;  %v500_v58 = vld [vmem:[%s3297_s2 + $0xb8] sm:$0xff] }
  0xb5   :  { %v222_v36 = vpop.f32.mrf.mxu3  ;;  %635 = vmatpush.msrb.mxu0 %v500_v58 }
  0xb6   :  { %312 = vmatmul.f32.gmra.mxu1 %v252_v59  ;;  %v223_v38 = vadd.f32 %v2435_v27, %v222_v36 }
  0xb7   :  { %v201_v60 = vpop.f32.mrf.mxu0 }
  0xb8   :  { %v202_v0 = vadd.f32 %v2435_v27, %v201_v60  ;;  %v244_v41 = vmul.f32 0.2, %v223_v38  ;;  %v508_v60 = vld [vmem:[%s3297_s2 + $0xf8] sm:$0xff] }
  0xb9   :  { %566 = vmatpush.msrb.mxu3 %v508_v60 }
  0xba   :  { %v237_v1 = vmul.f32 0.2, %v202_v0  ;;  %v260_v43 = vmax.f32 %v223_v38, %v244_v41 }
  0xbc   :  { %v253_v3 = vmax.f32 %v202_v0, %v237_v1  ;;  %v507_v1 = vld [vmem:[%s3297_s2 + $0xf0] sm:$0xff] }
  0xbd   :  { %v225_v40 = vpop.f32.mrf.mxu3  ;;  %567 = vmatpush.msrb.mxu3 %v507_v1 }
  0xbe   :  { %315 = vmatmul.f32.gmra.mxu1 %v253_v3  ;;  %v226_v42 = vadd.f32 %v2435_v27, %v225_v40  ;;  %v499_v3 = vld [vmem:[%s3297_s2 + $0xb0] sm:$0xff] }
  0xbf   :  { %v204_v6 = vpop.f32.mrf.mxu0  ;;  %636 = vmatpush.msrb.mxu0 %v499_v3 }
  0xc0   :  { %v205_v7 = vadd.f32 %v2435_v27, %v204_v6  ;;  %v245_v44 = vmul.f32 0.2, %v226_v42  ;;  %v506_v6 = vld [vmem:[%s3297_s2 + $0xe8] sm:$0xff] }
  0xc1   :  { %568 = vmatpush.msrb.mxu3 %v506_v6  ;;  %637 = vmatpush.msrb.mxu0 %v498_v15 }
  0xc2   :  { %v238_v2 = vmul.f32 0.2, %v205_v7  ;;  %v261_v48 = vmax.f32 %v226_v42, %v245_v44 }
  0xc3   :  { %638 = vmatpush.msrb.mxu0 %v497_v10  ;;  %v390_v10 = vpop.f32.mrf.mxu2 }
  0xc4   :  { %v254_v8 = vmax.f32 %v205_v7, %v238_v2  ;;  %v505_v2 = vld [vmem:[%s3297_s2 + $0xe0] sm:$0xff]  ;;  %1989 = vmatmul.msk.f32.vlgmr.msrb.gmra.mxu0 %vm117_vm0, %v2280_v11 }
  0xc5   :  { %v228_v45 = vpop.f32.mrf.mxu3  ;;  %569 = vmatpush.msrb.mxu3 %v505_v2 }
  0xc6   :  { %318 = vmatmul.f32.gmra.mxu1 %v254_v8  ;;  %v229_v46 = vadd.f32 %v2435_v27, %v228_v45 }
  0xc7   :  { %v207_v9 = vpop.f32.mrf.mxu0 }
  0xc8   :  { %v208_v16 = vadd.f32 %v2435_v27, %v207_v9  ;;  %v246_v49 = vmul.f32 0.2, %v229_v46  ;;  %v504_v9 = vld [vmem:[%s3297_s2 + $0xd8] sm:$0xff] }
  0xc9   :  { %570 = vmatpush.msrb.mxu3 %v504_v9 }
  0xca   :  { %v239_v17 = vmul.f32 0.2, %v208_v16  ;;  %v262_v50 = vmax.f32 %v229_v46, %v246_v49  ;;  %v870_v49 = vld [vmem:[%s3296_s1 + $0x88] sm:$0xff] }
  0xcc   :  { %v255_v20 = vmax.f32 %v208_v16, %v239_v17  ;;  %v503_v17 = vld [vmem:[%s3297_s2 + $0xd0] sm:$0xff]  ;;  %1990 = vmatmul.msk.f32.gmra.mxu0 %vm117_vm0, %v2286_v14 }
  0xcd   :  { %571 = vmatpush.msrb.mxu3 %v503_v17 }
  0xce   :  { %321 = vmatmul.f32.gmra.mxu1 %v255_v20 }
  0xcf   :  { %572 = vmatpush.msrb.mxu3 %v502_v18 }
  0xd1   :  { %573 = vmatpush.msrb.mxu3 %v501_v24 }
  0xd4   :  { %1991 = vmatmul.msk.f32.gmra.mxu0 %vm117_vm0, %v2292_v19 }
  0xd6   :  { %324 = vmatmul.f32.gmra.mxu1 %v256_v25  ;;  %v872_v25 = vld [vmem:[%s3296_s1 + $0x98] sm:$0xff] }
  0xd7   :  { %881 = vmatpush.msra.mxu3 %v872_v25  ;;  %v869_v25 = vld [vmem:[%s3296_s1 + $0x80] sm:$0xff] }
  0xdc   :  { %1992 = vmatmul.msk.f32.gmra.mxu0 %vm117_vm0, %v2298_v22 }
  0xde   :  { %327 = vmatmul.f32.gmra.mxu1 %v257_v30  ;;  %v871_v30 = vld [vmem:[%s3296_s1 + $0x90] sm:$0xff] }
  0xdf   :  { %882 = vmatpush.msra.mxu3 %v871_v30 }
  0xe1   :  { %883 = vmatpush.msra.mxu3 %v870_v49 }
  0xe3   :  { %884 = vmatpush.msra.mxu3 %v869_v25 }
  0xe4   :  { %1993 = vmatmul.msk.f32.gmra.mxu0 %vm117_vm0, %v2310_v31 }
  0xe6   :  { %330 = vmatmul.f32.gmra.mxu1 %v258_v35 }
  0xec   :  { %1994 = vmatmul.msk.f32.gmra.mxu0 %vm117_vm0, %v2334_v47 }
  0xee   :  { %333 = vmatmul.f32.gmra.mxu1 %v259_v39 }
  0xf4   :  { %1995 = vmatmul.msk.f32.gmra.mxu0 %vm117_vm0, %v2361_v62 }
  0xf6   :  { %336 = vmatmul.f32.gmra.mxu1 %v260_v43 }
  0xfc   :  { %1996 = vmatmul.msk.f32.gmra.mxu0 %vm117_vm0, %v2384_v12 }
  0xfe   :  { %339 = vmatmul.f32.gmra.mxu1 %v261_v48 }
 0x104   :  { %1997 = vmatmul.msk.f32.gmra.mxu0 %vm117_vm0, %v2405_v21 }
 0x106   :  { %342 = vmatmul.f32.gmra.mxu1 %v262_v50 }
 0x10b   :  { %v298_v52 = vpop.f32.mrf.mxu1 }
 0x10c   :  { %v299_v37 = vadd.f32 %v2580_v34, %v298_v52  ;;  %1998 = vmatmul.msk.f32.gmra.mxu0 %vm117_vm0, %v2315_v33 }
 0x10e   :  { %1957 = vmatmul.msk.f32.vlgmr.msrb.gmra.mxu1 %vm117_vm0, %v2280_v11 }
 0x113   :  { %v2482_v54 = vpop.f32.mrf.mxu1 }
 0x114   :  { %v302_v45 = vadd.f32 %v2580_v34, %v2482_v54  ;;  %1999 = vmatmul.msk.f32.gmra.mxu0 %vm117_vm0, %v2338_v51 }
 0x116   :  { %1958 = vmatmul.msk.f32.gmra.mxu1 %vm117_vm0, %v2286_v14 }
 0x11b   :  { %v2486_v55 = vpop.f32.mrf.mxu1 }
 0x11c   :  { %v305_v54 = vadd.f32 %v2580_v34, %v2486_v55  ;;  %2000 = vmatmul.msk.f32.gmra.mxu0 %vm117_vm0, %v2363_v63 }
 0x11e   :  { %1959 = vmatmul.msk.f32.gmra.mxu1 %vm117_vm0, %v2292_v19 }
 0x123   :  { %v2490_v27 = vpop.f32.mrf.mxu1 }
 0x124   :  { %v308_v24 = vadd.f32 %v2580_v34, %v2490_v27  ;;  %2001 = vmatmul.msk.f32.gmra.mxu0 %vm117_vm0, %v2386_v13 }
 0x126   :  { %1960 = vmatmul.msk.f32.gmra.mxu1 %vm117_vm0, %v2298_v22 }
 0x12b   :  { %v2494_v56 = vpop.f32.mrf.mxu1 }
 0x12c   :  { %v311_v27 = vadd.f32 %v2580_v34, %v2494_v56  ;;  %2002 = vmatmul.msk.f32.gmra.mxu0 %vm117_vm0, %v2407_v23 }
 0x12e   :  { %1961 = vmatmul.msk.f32.gmra.mxu1 %vm117_vm0, %v2310_v31 }
 0x133   :  { %v2498_v57 = vpop.f32.mrf.mxu1 }
 0x134   :  { %v314_v49 = vadd.f32 %v2580_v34, %v2498_v57  ;;  %2003 = vmatmul.msk.f32.gmra.mxu0 %vm117_vm0, %v2340_v53 }
 0x136   :  { %1962 = vmatmul.msk.f32.gmra.mxu1 %vm117_vm0, %v2334_v47 }
 0x13b   :  { %v2505_v59 = vpop.f32.mrf.mxu1 }
 0x13c   :  { %2004 = vmatmul.msk.f32.gmra.mxu0 %vm117_vm0, %v2359_v61 }
 0x13e   :  { %1963 = vmatmul.msk.f32.gmra.mxu1 %vm117_vm0, %v2361_v62 }
 0x143   :  { %v2512_v0 = vpop.f32.mrf.mxu1 }
 0x144   :  { %v320_v25 = vadd.f32 %v2580_v34, %v2512_v0  ;;  %v864_v0 = vld [vmem:[%s3296_s1 + $0x58] sm:$0xff] }
 0x145   :  { %950 = vmatpush.msra.mxu1 %v864_v0 }
 0x14b   :  { %v2520_v5 = vpop.f32.mrf.mxu1 }
 0x153   :  { %v2525_v7 = vpop.f32.mrf.mxu1 }
 0x15b   :  { %v2530_v8 = vpop.f32.mrf.mxu1 }
 0x163   :  { %v2538_v16 = vpop.f32.mrf.mxu1 }
 0x16b   :  { %v2546_v20 = vpop.f32.mrf.mxu1 }
 0x173   :  { %v2548_v4 = vpop.f32.mrf.mxu1 }
 0x17b   :  { %v2561_v26 = vpop.f32.mrf.mxu1 }
 0x183   :  { %v2565_v28 = vpop.f32.mrf.mxu1 }
 0x18b   :  { %v369_v32 = vpop.f32.mrf.mxu1 }
 0x18c   :  { %v370_v35 = vadd.f32 %v2572_v29, %v369_v32 }
 0x18e   :  { %v417_v36 = vmul.f32 0.2, %v370_v35 }
 0x190   :  { %v433_v38 = vmax.f32 %v370_v35, %v417_v36 }
 0x192   :  { %v449_v39 = vadd.f32 %v433_v38, %v299_v37 }
 0x193   :  { %v372_v40 = vpop.f32.mrf.mxu1 }
 0x194   :  { %v465_v41 = vmul.f32 0.2, %v449_v39  ;;  %v373_v42 = vadd.f32 %v2572_v29, %v372_v40  ;;  %v393_v40 = vpop.f32.mrf.mxu2 }
 0x196   :  { %v418_v43 = vmul.f32 0.2, %v373_v42  ;;  %v2587_v44 = vmax.f32 %v449_v39, %v465_v41 }
 0x198   :  { %v434_v46 = vmax.f32 %v373_v42, %v418_v43  ;;  %1973 = vmatmul.msk.f32.vlgmr.msrb.gmra.mxu3 %vm509_vm1, %v2587_v44 }
 0x19a   :  { %v450_v48 = vadd.f32 %v434_v46, %v302_v45 }
 0x19b   :  { %v375_v50 = vpop.f32.mrf.mxu1 }
 0x19c   :  { %v376_v52 = vadd.f32 %v2572_v29, %v375_v50  ;;  %v466_v58 = vmul.f32 0.2, %v450_v48  ;;  %v868_v50 = vld [vmem:[%s3296_s1 + $0x78] sm:$0xff] }
 0x19d   :  { %885 = vmatpush.msra.mxu3 %v868_v50  ;;  %v743_v50 = vld [vmem:[%s3296_s1 + $0x28] sm:$0xff] }
 0x19e   :  { %v419_v60 = vmul.f32 0.2, %v376_v52  ;;  %v2599_v1 = vmax.f32 %v450_v48, %v466_v58  ;;  %v391_v58 = vadd.f32 %v2572_v29, %v390_v10  ;;  %v744_v10 = vld [vmem:[%s3296_s1 + $0x30] sm:$0xff] }
 0x1a0   :  { %v435_v3 = vmax.f32 %v376_v52, %v419_v60  ;;  %1974 = vmatmul.msk.f32.gmra.mxu3 %vm509_vm1, %v2599_v1  ;;  %v745_v52 = vld [vmem:[%s3296_s1 + $0x38] sm:$0xff] }
 0x1a1   :  { %804 = vmatpush.msrb.mxu2 %v745_v52 }
 0x1a2   :  { %v451_v6 = vadd.f32 %v435_v3, %v305_v54  ;;  %v396_v54 = vpop.f32.mrf.mxu2 }
 0x1a3   :  { %v378_v2 = vpop.f32.mrf.mxu1  ;;  %805 = vmatpush.msrb.mxu2 %v744_v10  ;;  %v329_v10 = vadd.f32 %v2580_v34, %v2530_v8 }
 0x1a4   :  { %v379_v9 = vadd.f32 %v2572_v29, %v378_v2  ;;  %v467_v15 = vmul.f32 0.2, %v451_v6  ;;  %v424_v2 = vmul.f32 0.2, %v391_v58 }
 0x1a5   :  { %806 = vmatpush.msrb.mxu2 %v743_v50  ;;  %v335_v50 = vadd.f32 %v2580_v34, %v2546_v20  ;;  %v739_v20 = vld [vmem:[%s3296_s1 + $0x8] sm:$0xff] }
 0x1a6   :  { %v420_v17 = vmul.f32 0.2, %v379_v9  ;;  %v2608_v18 = vmax.f32 %v451_v6, %v467_v15 }
 0x1a8   :  { %v436_v55 = vmax.f32 %v379_v9, %v420_v17  ;;  %1975 = vmatmul.msk.f32.gmra.mxu3 %vm509_vm1, %v2608_v18  ;;  %v317_v17 = vadd.f32 %v2580_v34, %v2505_v59 }
 0x1aa   :  { %v452_v30 = vadd.f32 %v436_v55, %v308_v24  ;;  %v440_v55 = vmax.f32 %v391_v58, %v424_v2  ;;  %v326_v58 = vadd.f32 %v2580_v34, %v2525_v7  ;;  %v742_v7 = vld [vmem:[%s3296_s1 + $0x20] sm:$0xff]  ;;  %v863_v2 = vld [vmem:[%s3296_s1 + $0x50] sm:$0xff] }
 0x1ab   :  { %v381_v32 = vpop.f32.mrf.mxu1  ;;  %807 = vmatpush.msrb.mxu2 %v742_v7  ;;  %951 = vmatpush.msra.mxu1 %v863_v2 }
 0x1ac   :  { %v382_v35 = vadd.f32 %v2572_v29, %v381_v32  ;;  %v468_v36 = vmul.f32 0.2, %v452_v30 }
 0x1ae   :  { %v421_v37 = vmul.f32 0.2, %v382_v35  ;;  %v2620_v38 = vmax.f32 %v452_v30, %v468_v36  ;;  %v394_v30 = vadd.f32 %v2572_v29, %v393_v40  ;;  %v399_v36 = vpop.f32.mrf.mxu2 }
 0x1b0   :  { %v437_v39 = vmax.f32 %v382_v35, %v421_v37  ;;  %1976 = vmatmul.msk.f32.gmra.mxu3 %vm509_vm1, %v2620_v38  ;;  %v456_v37 = vadd.f32 %v440_v55, %v320_v25  ;;  %v425_v59 = vmul.f32 0.2, %v394_v30 }
 0x1b2   :  { %v453_v41 = vadd.f32 %v437_v39, %v311_v27  ;;  %v867_v39 = vld [vmem:[%s3296_s1 + $0x70] sm:$0xff]  ;;  %v472_v40 = vmul.f32 0.2, %v456_v37 }
 0x1b3   :  { %v384_v42 = vpop.f32.mrf.mxu1  ;;  %886 = vmatpush.msra.mxu3 %v867_v39 }
 0x1b4   :  { %v385_v43 = vadd.f32 %v2572_v29, %v384_v42  ;;  %v469_v45 = vmul.f32 0.2, %v453_v41  ;;  %v323_v42 = vadd.f32 %v2580_v34, %v2520_v5 }
 0x1b6   :  { %v422_v46 = vmul.f32 0.2, %v385_v43  ;;  %v2629_v48 = vmax.f32 %v453_v41, %v469_v45  ;;  %v441_v41 = vmax.f32 %v394_v30, %v425_v59 }
 0x1b8   :  { %v438_v56 = vmax.f32 %v385_v43, %v422_v46  ;;  %1977 = vmatmul.msk.f32.gmra.mxu3 %vm509_vm1, %v2629_v48  ;;  %v397_v43 = vadd.f32 %v2572_v29, %v396_v54  ;;  %v457_v45 = vadd.f32 %v441_v41, %v323_v42 }
 0x1ba   :  { %v454_v60 = vadd.f32 %v438_v56, %v314_v49  ;;  %v426_v46 = vmul.f32 0.2, %v397_v43  ;;  %v2674_v49 = vmax.f32 %v456_v37, %v472_v40  ;;  %v402_v56 = vpop.f32.mrf.mxu2  ;;  %v473_v52 = vmul.f32 0.2, %v457_v45 }
 0x1bb   :  { %v387_v3 = vpop.f32.mrf.mxu1  ;;  %v403_v55 = vadd.f32 %v2572_v29, %v402_v56  ;;  %v332_v37 = vadd.f32 %v2580_v34, %v2538_v16  ;;  %v862_v16 = vld [vmem:[%s3296_s1 + $0x48] sm:$0xff] }
 0x1bc   :  { %v388_v57 = vadd.f32 %v2572_v29, %v387_v3  ;;  %v470_v6 = vmul.f32 0.2, %v454_v60  ;;  %v442_v5 = vmax.f32 %v397_v43, %v426_v46  ;;  %v865_v43 = vld [vmem:[%s3296_s1 + $0x60] sm:$0xff]  ;;  %952 = vmatpush.msra.mxu1 %v862_v16 }
 0x1bd   :  { %v428_v30 = vmul.f32 0.2, %v403_v55 }
 0x1be   :  { %v423_v9 = vmul.f32 0.2, %v388_v57  ;;  %v2645_v15 = vmax.f32 %v454_v60, %v470_v6  ;;  %v400_v60 = vadd.f32 %v2572_v29, %v399_v36  ;;  %v458_v54 = vadd.f32 %v442_v5, %v326_v58  ;;  %v866_v6 = vld [vmem:[%s3296_s1 + $0x68] sm:$0xff] }
 0x1bf   :  { %887 = vmatpush.msra.mxu3 %v866_v6  ;;  %v444_v8 = vmax.f32 %v403_v55, %v428_v30  ;;  %v338_v6 = vadd.f32 %v2580_v34, %v2548_v4  ;;  %v341_v4 = vadd.f32 %v2580_v34, %v2561_v26  ;;  %v738_v26 = vld [vmem:[%s3296_s1] sm:$0xff] }
 0x1c0   :  { %v439_v24 = vmax.f32 %v388_v57, %v423_v9  ;;  %1978 = vmatmul.msk.f32.gmra.mxu3 %vm509_vm1, %v2645_v15  ;;  %v427_v3 = vmul.f32 0.2, %v400_v60  ;;  %v2686_v57 = vmax.f32 %v457_v45, %v473_v52  ;;  %v740_v45 = vld [vmem:[%s3296_s1 + $0x10] sm:$0xff] }
 0x1c1   :  { %v460_v40 = vadd.f32 %v444_v8, %v332_v37  ;;  %888 = vmatpush.msra.mxu3 %v865_v43 }
 0x1c2   :  { %v455_v32 = vadd.f32 %v439_v24, %v317_v17  ;;  %v405_v9 = vpop.f32.mrf.mxu2  ;;  %v474_v17 = vmul.f32 0.2, %v458_v54  ;;  %v443_v24 = vmax.f32 %v400_v60, %v427_v3 }
 0x1c3   :  { %v406_v59 = vadd.f32 %v2572_v29, %v405_v9  ;;  %v476_v46 = vmul.f32 0.2, %v460_v40  ;;  %2157 = vmatpush.msrb.mxu3 %v864_v0 }
 0x1c4   :  { %v471_v35 = vmul.f32 0.2, %v455_v32  ;;  %v459_v25 = vadd.f32 %v443_v24, %v329_v10  ;;  %v861_v10 = vld [vmem:[%s3296_s1 + $0x40] sm:$0xff] }
 0x1c5   :  { %v429_v41 = vmul.f32 0.2, %v406_v59  ;;  %2158 = vmatpush.msrb.mxu3 %v863_v2  ;;  %953 = vmatpush.msra.mxu1 %v861_v10 }
 0x1c6   :  { %v2659_v27 = vmax.f32 %v455_v32, %v471_v35  ;;  %v2704_v32 = vmax.f32 %v458_v54, %v474_v17  ;;  %v741_v35 = vld [vmem:[%s3296_s1 + $0x18] sm:$0xff]  ;;  %v475_v36 = vmul.f32 0.2, %v459_v25  ;;  %v2734_v54 = vmax.f32 %v460_v40, %v476_v46  ;;  %2037 = vmatmul.msk.f32.vlgmr.msra.gmra.mxu1 %vm117_vm0, %v2280_v11 }
 0x1c7   :  { %808 = vmatpush.msrb.mxu2 %v741_v35  ;;  %v445_v56 = vmax.f32 %v406_v59, %v429_v41  ;;  %2159 = vmatpush.msrb.mxu3 %v862_v16  ;;  %v640_v35 = vpop.f32.mrf.mxu0  ;;  %v344_v40 = vadd.f32 %v2580_v34, %v2565_v28 }
 0x1c8   :  { %1979 = vmatmul.msk.f32.gmra.mxu3 %vm509_vm1, %v2659_v27  ;;  %v2716_v42 = vmax.f32 %v459_v25, %v475_v36 }
 0x1c9   :  { %809 = vmatpush.msrb.mxu2 %v740_v45  ;;  %v461_v58 = vadd.f32 %v445_v56, %v335_v50  ;;  %2160 = vmatpush.msrb.mxu3 %v861_v10 }
 0x1ca   :  { %v408_v39 = vpop.f32.mrf.mxu2 }
 0x1cb   :  { %v409_v52 = vadd.f32 %v2572_v29, %v408_v39  ;;  %810 = vmatpush.msrb.mxu2 %v739_v20  ;;  %v477_v3 = vmul.f32 0.2, %v461_v58 }
 0x1cd   :  { %v430_v60 = vmul.f32 0.2, %v409_v52  ;;  %v2746_v17 = vmax.f32 %v461_v58, %v477_v3  ;;  %811 = vmatpush.msrb.mxu2 %v738_v26  ;;  %v1102_v26 = vld [vmem:[%s3297_s2 + $0x108] sm:$0xff] }
 0x1ce   :  { %2038 = vmatmul.msk.f32.gmra.mxu1 %vm117_vm0, %v2286_v14  ;;  %v1104_v14 = vld [vmem:[%s3297_s2 + $0x118] sm:$0xff] }
 0x1cf   :  { %v446_v0 = vmax.f32 %v409_v52, %v430_v60  ;;  %v643_v11 = vpop.f32.mrf.mxu0  ;;  %1167 = vmatpush.msra.mxu0 %v1104_v14 }
 0x1d0   :  { %1980 = vmatmul.msk.f32.gmra.mxu3 %vm509_vm1, %v2674_v49 }
 0x1d1   :  { %v462_v2 = vadd.f32 %v446_v0, %v338_v6  ;;  %v1103_v6 = vld [vmem:[%s3297_s2 + $0x110] sm:$0xff] }
 0x1d2   :  { %v411_v5 = vpop.f32.mrf.mxu2  ;;  %1168 = vmatpush.msra.mxu0 %v1103_v6 }
 0x1d3   :  { %v412_v7 = vadd.f32 %v2572_v29, %v411_v5  ;;  %v478_v55 = vmul.f32 0.2, %v462_v2 }
 0x1d4   :  { %1169 = vmatpush.msra.mxu0 %v1102_v26  ;;  %v2891_v26 = vld [vmem:[%s3299_s4 + $0x30] ss:$0 sm:$0xff] }
 0x1d5   :  { %v431_v9 = vmul.f32 0.2, %v412_v7  ;;  %v2758_v37 = vmax.f32 %v462_v2, %v478_v55 }
 0x1d6   :  { %2039 = vmatmul.msk.f32.gmra.mxu1 %vm117_vm0, %v2292_v19  ;;  %v2789_v19 = vld [vmem:[%s3300_s5 + $0x20] ss:$0 sm:$0xff] }
 0x1d7   :  { %v447_v25 = vmax.f32 %v412_v7, %v431_v9  ;;  %v646_v34 = vpop.f32.mrf.mxu0 }
 0x1d8   :  { %1981 = vmatmul.msk.f32.gmra.mxu3 %vm509_vm1, %v2686_v57 }
 0x1d9   :  { %v463_v36 = vadd.f32 %v447_v25, %v341_v4 }
 0x1da   :  { %v414_v24 = vpop.f32.mrf.mxu2 }
 0x1db   :  { %v415_v30 = vadd.f32 %v2572_v29, %v414_v24  ;;  %v479_v59 = vmul.f32 0.2, %v463_v36 }
 0x1dd   :  { %v432_v8 = vmul.f32 0.2, %v415_v30  ;;  %v2769_v41 = vmax.f32 %v463_v36, %v479_v59 }
 0x1de   :  { %2040 = vmatmul.msk.f32.gmra.mxu1 %vm117_vm0, %v2298_v22 }
 0x1df   :  { %v448_v39 = vmax.f32 %v415_v30, %v432_v8  ;;  %v649_v16 = vpop.f32.mrf.mxu0 }
 0x1e0   :  { %1982 = vmatmul.msk.f32.gmra.mxu3 %vm509_vm1, %v2704_v32 }
 0x1e1   :  { %v464_v29 = vadd.f32 %v448_v39, %v344_v40 }
 0x1e3   :  { %v480_v43 = vmul.f32 0.2, %v464_v29 }
 0x1e5   :  { %v2775_v28 = vmax.f32 %v464_v29, %v480_v43 }
 0x1e6   :  { %2041 = vmatmul.msk.f32.gmra.mxu1 %vm117_vm0, %v2310_v31 }
 0x1e7   :  { %v652_v52 = vpop.f32.mrf.mxu0 }
 0x1e8   :  { %1983 = vmatmul.msk.f32.gmra.mxu3 %vm509_vm1, %v2716_v42 }
 0x1ee   :  { %2042 = vmatmul.msk.f32.gmra.mxu1 %vm117_vm0, %v2334_v47 }
 0x1ef   :  { %v655_v47 = vpop.f32.mrf.mxu0 }
 0x1f0   :  { %1984 = vmatmul.msk.f32.gmra.mxu3 %vm509_vm1, %v2734_v54 }
 0x1f6   :  { %2043 = vmatmul.msk.f32.gmra.mxu1 %vm117_vm0, %v2361_v62 }
 0x1f7   :  { %v658_v9 = vpop.f32.mrf.mxu0 }
 0x1f8   :  { %1985 = vmatmul.msk.f32.gmra.mxu3 %vm509_vm1, %v2746_v17 }
 0x1fe   :  { %2044 = vmatmul.msk.f32.gmra.mxu1 %vm117_vm0, %v2384_v12 }
 0x1ff   :  { %v661_v4 = vpop.f32.mrf.mxu0 }
 0x200   :  { %1986 = vmatmul.msk.f32.gmra.mxu3 %vm509_vm1, %v2758_v37 }
 0x206   :  { %2045 = vmatmul.msk.f32.gmra.mxu1 %vm117_vm0, %v2405_v21 }
 0x207   :  { %v664_v59 = vpop.f32.mrf.mxu0 }
 0x208   :  { %1987 = vmatmul.msk.f32.gmra.mxu3 %vm509_vm1, %v2769_v41 }
 0x20e   :  { %2046 = vmatmul.msk.f32.gmra.mxu1 %vm117_vm0, %v2315_v33 }
 0x20f   :  { %v667_v29 = vpop.f32.mrf.mxu0 }
 0x210   :  { %1988 = vmatmul.msk.f32.gmra.mxu3 %vm509_vm1, %v2775_v28 }
 0x216   :  { %2047 = vmatmul.msk.f32.gmra.mxu1 %vm117_vm0, %v2338_v51 }
 0x218   :  { %2021 = vmatmul.msk.f32.vlgmr.msra.gmra.mxu3 %vm509_vm1, %v2587_v44 }
 0x21b   :  { %v575_v45 = vpop.f32.mrf.mxu3 }
 0x21c   :  { %v641_v46 = vadd.f32 %v640_v35, %v575_v45  ;;  %v670_v45 = vpop.f32.mrf.mxu0 }
 0x21e   :  { %v690_v56 = vadd.f32 %v2789_v19, %v641_v46  ;;  %2048 = vmatmul.msk.f32.gmra.mxu1 %vm117_vm0, %v2363_v63 }
 0x220   :  { %v706_v50 = vmul.f32 0.2, %v690_v56  ;;  %2022 = vmatmul.msk.f32.gmra.mxu3 %vm509_vm1, %v2599_v1 }
 0x222   :  { %v722_v22 = vmax.f32 %v690_v56, %v706_v50 }
 0x223   :  { %v578_v44 = vpop.f32.mrf.mxu3 }
 0x224   :  { %v644_v5 = vadd.f32 %v643_v11, %v578_v44  ;;  %2005 = vmatmul.msk.f32.vlgmr.msrb.gmra.mxu2 %vm509_vm1, %v722_v22  ;;  %v673_v44 = vpop.f32.mrf.mxu0 }
 0x226   :  { %v691_v58 = vadd.f32 %v2789_v19, %v644_v5  ;;  %2049 = vmatmul.msk.f32.gmra.mxu1 %vm117_vm0, %v2386_v13 }
 0x228   :  { %v707_v31 = vmul.f32 0.2, %v691_v58  ;;  %2023 = vmatmul.msk.f32.gmra.mxu3 %vm509_vm1, %v2608_v18 }
 0x22a   :  { %v723_v60 = vmax.f32 %v691_v58, %v707_v31  ;;  %v1101_v31 = vld [vmem:[%s3297_s2 + $0x100] sm:$0xff] }
 0x22b   :  { %v581_v1 = vpop.f32.mrf.mxu3  ;;  %1170 = vmatpush.msra.mxu0 %v1101_v31 }
 0x22c   :  { %v647_v20 = vadd.f32 %v646_v34, %v581_v1  ;;  %2006 = vmatmul.msk.f32.gmra.mxu2 %vm509_vm1, %v723_v60  ;;  %v676_v1 = vpop.f32.mrf.mxu0 }
 0x22e   :  { %v692_v3 = vadd.f32 %v2789_v19, %v647_v20  ;;  %2050 = vmatmul.msk.f32.gmra.mxu1 %vm117_vm0, %v2407_v23 }
 0x230   :  { %v708_v0 = vmul.f32 0.2, %v692_v3  ;;  %2024 = vmatmul.msk.f32.gmra.mxu3 %vm509_vm1, %v2620_v38 }
 0x232   :  { %v724_v18 = vmax.f32 %v692_v3, %v708_v0 }
 0x233   :  { %v584_v62 = vpop.f32.mrf.mxu3 }
 0x234   :  { %v650_v7 = vadd.f32 %v649_v16, %v584_v62  ;;  %2007 = vmatmul.msk.f32.gmra.mxu2 %vm509_vm1, %v724_v18  ;;  %v679_v6 = vpop.f32.mrf.mxu0 }
 0x236   :  { %v693_v2 = vadd.f32 %v2789_v19, %v650_v7  ;;  %2051 = vmatmul.msk.f32.gmra.mxu1 %vm117_vm0, %v2340_v53 }
 0x238   :  { %v709_v24 = vmul.f32 0.2, %v693_v2  ;;  %2025 = vmatmul.msk.f32.gmra.mxu3 %vm509_vm1, %v2629_v48 }
 0x23a   :  { %v725_v38 = vmax.f32 %v693_v2, %v709_v24 }
 0x23b   :  { %v587_v10 = vpop.f32.mrf.mxu3 }
 0x23c   :  { %v653_v55 = vadd.f32 %v652_v52, %v587_v10  ;;  %2008 = vmatmul.msk.f32.gmra.mxu2 %vm509_vm1, %v725_v38  ;;  %v682_v38 = vpop.f32.mrf.mxu0 }
 0x23e   :  { %v694_v12 = vadd.f32 %v2789_v19, %v653_v55 }
 0x240   :  { %v710_v25 = vmul.f32 0.2, %v694_v12  ;;  %2026 = vmatmul.msk.f32.gmra.mxu3 %vm509_vm1, %v2645_v15 }
 0x242   :  { %v726_v30 = vmax.f32 %v694_v12, %v710_v25 }
 0x243   :  { %v590_v48 = vpop.f32.mrf.mxu3  ;;  %v955_v18 = vpop.f32.mrf.mxu1 }
 0x244   :  { %v656_v35 = vadd.f32 %v655_v47, %v590_v48  ;;  %2009 = vmatmul.msk.f32.gmra.mxu2 %vm509_vm1, %v726_v30  ;;  %v685_v48 = vpop.f32.mrf.mxu0 }
 0x246   :  { %v695_v21 = vadd.f32 %v2789_v19, %v656_v35 }
 0x248   :  { %v711_v36 = vmul.f32 0.2, %v695_v21  ;;  %2027 = vmatmul.msk.f32.gmra.mxu3 %vm509_vm1, %v2659_v27 }
 0x24a   :  { %v727_v8 = vmax.f32 %v695_v21, %v711_v36 }
 0x24b   :  { %v593_v15 = vpop.f32.mrf.mxu3  ;;  %v958_v10 = vpop.f32.mrf.mxu1 }
 0x24c   :  { %v659_v39 = vadd.f32 %v658_v9, %v593_v15  ;;  %2010 = vmatmul.msk.f32.gmra.mxu2 %vm509_vm1, %v727_v8 }
 0x24e   :  { %v696_v33 = vadd.f32 %v2789_v19, %v659_v39 }
 0x250   :  { %v712_v40 = vmul.f32 0.2, %v696_v33  ;;  %2028 = vmatmul.msk.f32.gmra.mxu3 %vm509_vm1, %v2674_v49 }
 0x252   :  { %v728_v27 = vmax.f32 %v696_v33, %v712_v40 }
 0x253   :  { %v596_v51 = vpop.f32.mrf.mxu3  ;;  %v961_v35 = vpop.f32.mrf.mxu1 }
 0x254   :  { %v662_v11 = vadd.f32 %v661_v4, %v596_v51  ;;  %2011 = vmatmul.msk.f32.gmra.mxu2 %vm509_vm1, %v728_v27 }
 0x256   :  { %v697_v43 = vadd.f32 %v2789_v19, %v662_v11  ;;  %v2898_v11 = vld [vmem:[%s3299_s4 + $0x20] ss:$0 sm:$0xff] }
 0x258   :  { %v713_v34 = vmul.f32 0.2, %v697_v43  ;;  %2029 = vmatmul.msk.f32.gmra.mxu3 %vm509_vm1, %v2686_v57 }
 0x25a   :  { %v729_v49 = vmax.f32 %v697_v43, %v713_v34 }
 0x25b   :  { %v599_v14 = vpop.f32.mrf.mxu3  ;;  %v964_v33 = vpop.f32.mrf.mxu1 }
 0x25c   :  { %v665_v16 = vadd.f32 %v664_v59, %v599_v14  ;;  %2012 = vmatmul.msk.f32.gmra.mxu2 %vm509_vm1, %v729_v49  ;;  %v1259_v59 = vld [vmem:[%s3296_s1 + $0xd8] sm:$0xff] }
 0x25d   :  { %1318 = vmatpush.msra.mxu2 %v1259_v59 }
 0x25e   :  { %v698_v63 = vadd.f32 %v2789_v19, %v665_v16  ;;  %v1258_v16 = vld [vmem:[%s3296_s1 + $0xd0] sm:$0xff] }
 0x25f   :  { %1319 = vmatpush.msra.mxu2 %v1258_v16 }
 0x260   :  { %v714_v46 = vmul.f32 0.2, %v698_v63  ;;  %2030 = vmatmul.msk.f32.gmra.mxu3 %vm509_vm1, %v2704_v32 }
 0x262   :  { %v730_v56 = vmax.f32 %v698_v63, %v714_v46 }
 0x263   :  { %v602_v57 = vpop.f32.mrf.mxu3 }
 0x264   :  { %v668_v50 = vadd.f32 %v667_v29, %v602_v57  ;;  %2013 = vmatmul.msk.f32.gmra.mxu2 %vm509_vm1, %v730_v56  ;;  %v967_v29 = vpop.f32.mrf.mxu1 }
 0x266   :  { %v699_v13 = vadd.f32 %v2789_v19, %v668_v50 }
 0x268   :  { %v715_v22 = vmul.f32 0.2, %v699_v13  ;;  %2031 = vmatmul.msk.f32.gmra.mxu3 %vm509_vm1, %v2716_v42 }
 0x26a   :  { %v731_v52 = vmax.f32 %v699_v13, %v715_v22 }
 0x26b   :  { %v605_v32 = vpop.f32.mrf.mxu3 }
 0x26c   :  { %v671_v5 = vadd.f32 %v670_v45, %v605_v32  ;;  %2014 = vmatmul.msk.f32.gmra.mxu2 %vm509_vm1, %v731_v52  ;;  %v970_v22 = vpop.f32.mrf.mxu1 }
 0x26e   :  { %v700_v23 = vadd.f32 %v2789_v19, %v671_v5 }
 0x270   :  { %v716_v58 = vmul.f32 0.2, %v700_v23  ;;  %2032 = vmatmul.msk.f32.gmra.mxu3 %vm509_vm1, %v2734_v54 }
 0x272   :  { %v732_v42 = vmax.f32 %v700_v23, %v716_v58 }
 0x273   :  { %v608_v60 = vpop.f32.mrf.mxu3 }
 0x274   :  { %v674_v20 = vadd.f32 %v673_v44, %v608_v60  ;;  %2015 = vmatmul.msk.f32.gmra.mxu2 %vm509_vm1, %v732_v42 }
 0x276   :  { %v701_v53 = vadd.f32 %v2789_v19, %v674_v20 }
 0x278   :  { %v717_v47 = vmul.f32 0.2, %v701_v53  ;;  %2033 = vmatmul.msk.f32.gmra.mxu3 %vm509_vm1, %v2746_v17 }
 0x27a   :  { %v733_v3 = vmax.f32 %v701_v53, %v717_v47 }
 0x27b   :  { %v611_v0 = vpop.f32.mrf.mxu3 }
 0x27c   :  { %v677_v54 = vadd.f32 %v676_v1, %v611_v0  ;;  %2016 = vmatmul.msk.f32.gmra.mxu2 %vm509_vm1, %v733_v3  ;;  %v973_v3 = vpop.f32.mrf.mxu1 }
 0x27e   :  { %v702_v62 = vadd.f32 %v2789_v19, %v677_v54  ;;  %v1257_v54 = vld [vmem:[%s3296_s1 + $0xc8] sm:$0xff] }
 0x27f   :  { %1320 = vmatpush.msra.mxu2 %v1257_v54 }
 0x280   :  { %v718_v7 = vmul.f32 0.2, %v702_v62  ;;  %2034 = vmatmul.msk.f32.gmra.mxu3 %vm509_vm1, %v2758_v37 }
 0x282   :  { %v734_v2 = vmax.f32 %v702_v62, %v718_v7 }
 0x283   :  { %v614_v9 = vpop.f32.mrf.mxu3 }
 0x284   :  { %v680_v24 = vadd.f32 %v679_v6, %v614_v9  ;;  %2017 = vmatmul.msk.f32.gmra.mxu2 %vm509_vm1, %v734_v2 }
 0x286   :  { %v703_v17 = vadd.f32 %v2789_v19, %v680_v24 }
 0x288   :  { %v719_v55 = vmul.f32 0.2, %v703_v17  ;;  %2035 = vmatmul.msk.f32.gmra.mxu3 %vm509_vm1, %v2769_v41 }
 0x28a   :  { %v735_v12 = vmax.f32 %v703_v17, %v719_v55 }
 0x28b   :  { %v617_v25 = vpop.f32.mrf.mxu3 }
 0x28c   :  { %v683_v4 = vadd.f32 %v682_v38, %v617_v25  ;;  %2018 = vmatmul.msk.f32.gmra.mxu2 %vm509_vm1, %v735_v12  ;;  %v976_v12 = vpop.f32.mrf.mxu1 }
 0x28e   :  { %v704_v37 = vadd.f32 %v2789_v19, %v683_v4 }
 0x290   :  { %v720_v30 = vmul.f32 0.2, %v704_v37  ;;  %2036 = vmatmul.msk.f32.gmra.mxu3 %vm509_vm1, %v2775_v28 }
 0x292   :  { %v736_v21 = vmax.f32 %v704_v37, %v720_v30 }
 0x293   :  { %v620_v36 = vpop.f32.mrf.mxu3 }
 0x294   :  { %v686_v8 = vadd.f32 %v685_v48, %v620_v36  ;;  %2019 = vmatmul.msk.f32.gmra.mxu2 %vm509_vm1, %v736_v21 }
 0x296   :  { %v705_v41 = vadd.f32 %v2789_v19, %v686_v8 }
 0x298   :  { %v721_v15 = vmul.f32 0.2, %v705_v41  ;;  %2052 = vmatmul.msk.f32.vlgmr.msrb.gmra.mxu3 %vm117_vm0, %v2359_v61 }
 0x29a   :  { %v737_v39 = vmax.f32 %v705_v41, %v721_v15  ;;  %v1256_v41 = vld [vmem:[%s3296_s1 + $0xc0] sm:$0xff] }
 0x29b   :  { %v890_v28 = vpop.f32.mrf.mxu3  ;;  %1321 = vmatpush.msra.mxu2 %v1256_v41 }
 0x29c   :  { %v956_v40 = vadd.f32 %v955_v18, %v890_v28  ;;  %2020 = vmatmul.msk.f32.gmra.mxu2 %vm509_vm1, %v737_v39 }
 0x29e   :  { %v1005_v19 = vadd.f32 %v2891_v26, %v956_v40 }
 0x2a0   :  { %v1021_v61 = vmul.f32 0.2, %v1005_v19 }
 0x2a2   :  { %v1037_v14 = vmax.f32 %v1005_v19, %v1021_v61 }
 0x2a3   :  { %v893_v27 = vpop.f32.mrf.mxu3 }
 0x2a4   :  { %v959_v51 = vadd.f32 %v958_v10, %v893_v27 }
 0x2a6   :  { %v1006_v34 = vadd.f32 %v2891_v26, %v959_v51 }
 0x2a7   :  { %v813_v43 = vpop.f32.mrf.mxu2 }
 0x2a8   :  { %v814_v49 = vadd.f32 %v2898_v11, %v813_v43  ;;  %v1022_v46 = vmul.f32 0.2, %v1006_v34 }
 0x2aa   :  { %v1053_v63 = vadd.f32 %v1037_v14, %v814_v49  ;;  %v1038_v32 = vmax.f32 %v1006_v34, %v1022_v46 }
 0x2ab   :  { %v896_v45 = vpop.f32.mrf.mxu3 }
 0x2ac   :  { %v1069_v56 = vmul.f32 0.2, %v1053_v63  ;;  %v962_v57 = vadd.f32 %v961_v35, %v896_v45 }
 0x2ae   :  { %v2905_v50 = vmax.f32 %v1053_v63, %v1069_v56  ;;  %v1007_v44 = vadd.f32 %v2891_v26, %v962_v57 }
 0x2af   :  { %v816_v13 = vpop.f32.mrf.mxu2 }
 0x2b0   :  { %v817_v52 = vadd.f32 %v2898_v11, %v816_v13  ;;  %2053 = vmatmul.msk.f32.vlgmr.msra.gmra.mxu0 %vm117_vm0, %v2905_v50  ;;  %v1023_v58 = vmul.f32 0.2, %v1007_v44 }
 0x2b2   :  { %v1054_v5 = vadd.f32 %v1038_v32, %v817_v52  ;;  %v1039_v47 = vmax.f32 %v1007_v44, %v1023_v58 }
 0x2b3   :  { %v899_v23 = vpop.f32.mrf.mxu3 }
 0x2b4   :  { %v1070_v31 = vmul.f32 0.2, %v1054_v5  ;;  %v965_v42 = vadd.f32 %v964_v33, %v899_v23  ;;  %v979_v33 = vpop.f32.mrf.mxu1 }
 0x2b6   :  { %v2911_v60 = vmax.f32 %v1054_v5, %v1070_v31  ;;  %v1008_v20 = vadd.f32 %v2891_v26, %v965_v42 }
 0x2b7   :  { %v819_v1 = vpop.f32.mrf.mxu2 }
 0x2b8   :  { %v820_v53 = vadd.f32 %v2898_v11, %v819_v1  ;;  %2054 = vmatmul.msk.f32.gmra.mxu0 %vm117_vm0, %v2911_v60  ;;  %v1024_v18 = vmul.f32 0.2, %v1008_v20 }
 0x2ba   :  { %v1055_v0 = vadd.f32 %v1039_v47, %v820_v53  ;;  %v1040_v38 = vmax.f32 %v1008_v20, %v1024_v18 }
 0x2bb   :  { %v902_v6 = vpop.f32.mrf.mxu3 }
 0x2bc   :  { %v1071_v62 = vmul.f32 0.2, %v1055_v0  ;;  %v968_v7 = vadd.f32 %v967_v29, %v902_v6  ;;  %v982_v45 = vpop.f32.mrf.mxu1 }
 0x2be   :  { %v2920_v2 = vmax.f32 %v1055_v0, %v1071_v62  ;;  %v1009_v24 = vadd.f32 %v2891_v26, %v968_v7 }
 0x2bf   :  { %v822_v9 = vpop.f32.mrf.mxu2 }
 0x2c0   :  { %v823_v17 = vadd.f32 %v2898_v11, %v822_v9  ;;  %2055 = vmatmul.msk.f32.gmra.mxu0 %vm117_vm0, %v2920_v2  ;;  %v1025_v25 = vmul.f32 0.2, %v1009_v24 }
 0x2c2   :  { %v1056_v10 = vadd.f32 %v1040_v38, %v823_v17  ;;  %v1041_v36 = vmax.f32 %v1009_v24, %v1025_v25  ;;  %v1254_v17 = vld [vmem:[%s3296_s1 + $0xb0] sm:$0xff] }
 0x2c3   :  { %v905_v55 = vpop.f32.mrf.mxu3 }
 0x2c4   :  { %v1072_v4 = vmul.f32 0.2, %v1056_v10  ;;  %v971_v37 = vadd.f32 %v970_v22, %v905_v55  ;;  %v1255_v22 = vld [vmem:[%s3296_s1 + $0xb8] sm:$0xff]  ;;  %v985_v20 = vpop.f32.mrf.mxu1 }
 0x2c5   :  { %1322 = vmatpush.msra.mxu2 %v1255_v22 }
 0x2c6   :  { %v2926_v30 = vmax.f32 %v1056_v10, %v1072_v4  ;;  %v1010_v35 = vadd.f32 %v2891_v26, %v971_v37 }
 0x2c7   :  { %v825_v48 = vpop.f32.mrf.mxu2  ;;  %1323 = vmatpush.msra.mxu2 %v1254_v17 }
 0x2c8   :  { %v826_v21 = vadd.f32 %v2898_v11, %v825_v48  ;;  %2056 = vmatmul.msk.f32.gmra.mxu0 %vm117_vm0, %v2926_v30  ;;  %v1026_v59 = vmul.f32 0.2, %v1010_v35 }
 0x2ca   :  { %v1057_v8 = vadd.f32 %v1041_v36, %v826_v21  ;;  %v1042_v51 = vmax.f32 %v1010_v35, %v1026_v59 }
 0x2cb   :  { %v908_v15 = vpop.f32.mrf.mxu3 }
 0x2cc   :  { %v1073_v39 = vmul.f32 0.2, %v1057_v8  ;;  %v974_v28 = vadd.f32 %v973_v3, %v908_v15  ;;  %v988_v10 = vpop.f32.mrf.mxu1 }
 0x2ce   :  { %v2935_v40 = vmax.f32 %v1057_v8, %v1073_v39  ;;  %v1011_v27 = vadd.f32 %v2891_v26, %v974_v28 }
 0x2cf   :  { %v828_v19 = vpop.f32.mrf.mxu2 }
 0x2d0   :  { %v829_v61 = vadd.f32 %v2898_v11, %v828_v19  ;;  %2057 = vmatmul.msk.f32.gmra.mxu0 %vm117_vm0, %v2935_v40  ;;  %v1027_v34 = vmul.f32 0.2, %v1011_v27 }
 0x2d2   :  { %v1058_v29 = vadd.f32 %v1042_v51, %v829_v61  ;;  %v1043_v57 = vmax.f32 %v1011_v27, %v1027_v34 }
 0x2d3   :  { %v911_v43 = vpop.f32.mrf.mxu3 }
 0x2d4   :  { %v1074_v49 = vmul.f32 0.2, %v1058_v29  ;;  %v977_v14 = vadd.f32 %v976_v12, %v911_v43  ;;  %v991_v39 = vpop.f32.mrf.mxu1 }
 0x2d6   :  { %v2941_v16 = vmax.f32 %v1058_v29, %v1074_v49  ;;  %v1012_v46 = vadd.f32 %v2891_v26, %v977_v14 }
 0x2d7   :  { %v831_v63 = vpop.f32.mrf.mxu2 }
 0x2d8   :  { %v832_v56 = vadd.f32 %v2898_v11, %v831_v63  ;;  %2058 = vmatmul.msk.f32.gmra.mxu0 %vm117_vm0, %v2941_v16  ;;  %v1028_v52 = vmul.f32 0.2, %v1012_v46 }
 0x2da   :  { %v1059_v13 = vadd.f32 %v1043_v57, %v832_v56  ;;  %v1044_v31 = vmax.f32 %v1012_v46, %v1028_v52 }
 0x2db   :  { %v914_v44 = vpop.f32.mrf.mxu3 }
 0x2dc   :  { %v1075_v32 = vmul.f32 0.2, %v1059_v13  ;;  %v980_v5 = vadd.f32 %v979_v33, %v914_v44  ;;  %v1253_v33 = vld [vmem:[%s3296_s1 + $0xa8] sm:$0xff]  ;;  %v994_v46 = vpop.f32.mrf.mxu1 }
 0x2dd   :  { %1324 = vmatpush.msra.mxu2 %v1253_v33 }
 0x2de   :  { %v2950_v23 = vmax.f32 %v1059_v13, %v1075_v32  ;;  %v1013_v42 = vadd.f32 %v2891_v26, %v980_v5 }
 0x2df   :  { %v834_v58 = vpop.f32.mrf.mxu2 }
 0x2e0   :  { %v835_v1 = vadd.f32 %v2898_v11, %v834_v58  ;;  %2059 = vmatmul.msk.f32.gmra.mxu0 %vm117_vm0, %v2950_v23  ;;  %v1029_v3 = vmul.f32 0.2, %v1013_v42 }
 0x2e2   :  { %v1060_v53 = vadd.f32 %v1044_v31, %v835_v1  ;;  %v1045_v62 = vmax.f32 %v1013_v42, %v1029_v3 }
 0x2e3   :  { %v917_v47 = vpop.f32.mrf.mxu3 }
 0x2e4   :  { %v1076_v0 = vmul.f32 0.2, %v1060_v53  ;;  %v983_v54 = vadd.f32 %v982_v45, %v917_v47  ;;  %v997_v47 = vpop.f32.mrf.mxu1 }
 0x2e6   :  { %v2956_v6 = vmax.f32 %v1060_v53, %v1076_v0  ;;  %v1014_v7 = vadd.f32 %v2891_v26, %v983_v54  ;;  %v1252_v53 = vld [vmem:[%s3296_s1 + $0xa0] sm:$0xff] }
 0x2e7   :  { %v837_v18 = vpop.f32.mrf.mxu2  ;;  %1325 = vmatpush.msra.mxu2 %v1252_v53 }
 0x2e8   :  { %v838_v9 = vadd.f32 %v2898_v11, %v837_v18  ;;  %2060 = vmatmul.msk.f32.gmra.mxu0 %vm117_vm0, %v2956_v6  ;;  %v1030_v55 = vmul.f32 0.2, %v1014_v7 }
 0x2ea   :  { %v1061_v24 = vadd.f32 %v1045_v62, %v838_v9  ;;  %v1046_v48 = vmax.f32 %v1014_v7, %v1030_v55 }
 0x2eb   :  { %v920_v38 = vpop.f32.mrf.mxu3 }
 0x2ec   :  { %v1077_v12 = vmul.f32 0.2, %v1061_v24  ;;  %v986_v25 = vadd.f32 %v985_v20, %v920_v38 }
 0x2ee   :  { %v2965_v4 = vmax.f32 %v1061_v24, %v1077_v12  ;;  %v1015_v35 = vadd.f32 %v2891_v26, %v986_v25 }
 0x2ef   :  { %v840_v37 = vpop.f32.mrf.mxu2 }
 0x2f0   :  { %v841_v21 = vadd.f32 %v2898_v11, %v840_v37  ;;  %2061 = vmatmul.msk.f32.gmra.mxu0 %vm117_vm0, %v2965_v4  ;;  %v1031_v41 = vmul.f32 0.2, %v1015_v35 }
 0x2f2   :  { %v1062_v36 = vadd.f32 %v1046_v48, %v841_v21  ;;  %v1047_v27 = vmax.f32 %v1015_v35, %v1031_v41 }
 0x2f3   :  { %v923_v8 = vpop.f32.mrf.mxu3 }
 0x2f4   :  { %v1078_v15 = vmul.f32 0.2, %v1062_v36  ;;  %v989_v59 = vadd.f32 %v988_v10, %v923_v8 }
 0x2f6   :  { %v2971_v28 = vmax.f32 %v1062_v36, %v1078_v15  ;;  %v1016_v61 = vadd.f32 %v2891_v26, %v989_v59 }
 0x2f7   :  { %v843_v19 = vpop.f32.mrf.mxu2 }
 0x2f8   :  { %v844_v51 = vadd.f32 %v2898_v11, %v843_v19  ;;  %2062 = vmatmul.msk.f32.gmra.mxu0 %vm117_vm0, %v2971_v28  ;;  %v1032_v34 = vmul.f32 0.2, %v1016_v61 }
 0x2fa   :  { %v1063_v29 = vadd.f32 %v1047_v27, %v844_v51  ;;  %v1048_v56 = vmax.f32 %v1016_v61, %v1032_v34  ;;  %v3019_v34 = vld [vmem:[%s3300_s5 + $0x30] ss:$0 sm:$0xff] }
 0x2fb   :  { %v926_v43 = vpop.f32.mrf.mxu3 }
 0x2fc   :  { %v1079_v49 = vmul.f32 0.2, %v1063_v29  ;;  %v992_v14 = vadd.f32 %v991_v39, %v926_v43 }
 0x2fe   :  { %v2980_v63 = vmax.f32 %v1063_v29, %v1079_v49  ;;  %v1017_v57 = vadd.f32 %v2891_v26, %v992_v14 }
 0x2ff   :  { %v846_v45 = vpop.f32.mrf.mxu2 }
 0x300   :  { %v847_v13 = vadd.f32 %v2898_v11, %v846_v45  ;;  %2063 = vmatmul.msk.f32.gmra.mxu0 %vm117_vm0, %v2980_v63  ;;  %v1033_v52 = vmul.f32 0.2, %v1017_v57 }
 0x302   :  { %v1064_v22 = vadd.f32 %v1048_v56, %v847_v13  ;;  %v1049_v42 = vmax.f32 %v1017_v57, %v1033_v52 }
 0x303   :  { %v929_v44 = vpop.f32.mrf.mxu3 }
 0x304   :  { %v1080_v32 = vmul.f32 0.2, %v1064_v22  ;;  %v995_v5 = vadd.f32 %v994_v46, %v929_v44 }
 0x306   :  { %v2986_v58 = vmax.f32 %v1064_v22, %v1080_v32  ;;  %v1018_v1 = vadd.f32 %v2891_v26, %v995_v5 }
 0x307   :  { %v849_v31 = vpop.f32.mrf.mxu2 }
 0x308   :  { %v850_v20 = vadd.f32 %v2898_v11, %v849_v31  ;;  %2064 = vmatmul.msk.f32.gmra.mxu0 %vm117_vm0, %v2986_v58  ;;  %v1034_v54 = vmul.f32 0.2, %v1018_v1 }
 0x30a   :  { %v1065_v3 = vadd.f32 %v1049_v42, %v850_v20  ;;  %v1050_v24 = vmax.f32 %v1018_v1, %v1034_v54 }
 0x30b   :  { %v932_v0 = vpop.f32.mrf.mxu3 }
 0x30c   :  { %v1081_v18 = vmul.f32 0.2, %v1065_v3  ;;  %v998_v62 = vadd.f32 %v997_v47, %v932_v0 }
 0x30e   :  { %v2995_v7 = vmax.f32 %v1065_v3, %v1081_v18  ;;  %v1019_v17 = vadd.f32 %v2891_v26, %v998_v62 }
 0x30f   :  { %v852_v9 = vpop.f32.mrf.mxu2 }
 0x310   :  { %v853_v38 = vadd.f32 %v2898_v11, %v852_v9  ;;  %2065 = vmatmul.msk.f32.gmra.mxu0 %vm117_vm0, %v2995_v7  ;;  %v1035_v12 = vmul.f32 0.2, %v1019_v17 }
 0x312   :  { %v1066_v10 = vadd.f32 %v1050_v24, %v853_v38  ;;  %v1051_v35 = vmax.f32 %v1019_v17, %v1035_v12 }
 0x313   :  { %v935_v55 = vpop.f32.mrf.mxu3 }
 0x314   :  { %v1082_v25 = vmul.f32 0.2, %v1066_v10 }
 0x316   :  { %v3001_v37 = vmax.f32 %v1066_v10, %v1082_v25 }
 0x317   :  { %v855_v48 = vpop.f32.mrf.mxu2 }
 0x318   :  { %v856_v21 = vadd.f32 %v2898_v11, %v855_v48  ;;  %2066 = vmatmul.msk.f32.gmra.mxu0 %vm117_vm0, %v3001_v37 }
 0x31a   :  { %v1067_v36 = vadd.f32 %v1051_v35, %v856_v21 }
 0x31b   :  { %v1000_v8 = vpop.f32.mrf.mxu3 }
 0x31c   :  { %v1083_v41 = vmul.f32 0.2, %v1067_v36  ;;  %v1001_v15 = vadd.f32 %v1000_v8, %v935_v55 }
 0x31e   :  { %v3006_v59 = vmax.f32 %v1067_v36, %v1083_v41  ;;  %v1020_v39 = vadd.f32 %v2891_v26, %v1001_v15 }
 0x31f   :  { %v858_v33 = vpop.f32.mrf.mxu2 }
 0x320   :  { %v1036_v19 = vmul.f32 0.2, %v1020_v39  ;;  %2067 = vmatmul.msk.f32.gmra.mxu0 %vm117_vm0, %v3006_v59  ;;  %v859_v61 = vadd.f32 %v2898_v11, %v858_v33 }
 0x322   :  { %v1052_v27 = vmax.f32 %v1020_v39, %v1036_v19 }
 0x324   :  { %v1068_v51 = vadd.f32 %v1052_v27, %v859_v61 }
 0x326   :  { %v1084_v29 = vmul.f32 0.2, %v1068_v51 }
 0x328   :  { %v3012_v43 = vmax.f32 %v1068_v51, %v1084_v29 }
 0x32a   :  { %2068 = vmatmul.msk.f32.gmra.mxu0 %vm117_vm0, %v3012_v43 }
 0x32d   :  { %v1172_v26 = vpop.f32.mrf.mxu0 }
 0x32e   :  { %v1173_v49 = vadd.f32 %v3019_v34, %v1172_v26 }
 0x330   :  { %v1220_v14 = vmul.f32 0.2, %v1173_v49 }
 0x332   :  { %v1236_v45 = vmax.f32 %v1173_v49, %v1220_v14 }
 0x334   :  { %2069 = vmatmul.msk.f32.vlgmr.msra.gmra.mxu2 %vm509_vm1, %v1236_v45  ;;  %v1394_v45 = vld [vmem:[%s3297_s2 + $0x138] sm:$0xff] }
 0x335   :  { %v1175_v11 = vpop.f32.mrf.mxu0  ;;  %1457 = vmatpush.msra.mxu3 %v1394_v45  ;;  %v1544_v45 = vld [vmem:[%s3297_s2 + $0x150] sm:$0xff] }
 0x336   :  { %v1176_v46 = vadd.f32 %v3019_v34, %v1175_v11  ;;  %v1668_v11 = vld [vmem:[%s3297_s2 + $0x198] sm:$0xff] }
 0x337   :  { %1683 = vmatpush.msrb.mxu0 %v1668_v11 }
 0x338   :  { %v1221_v56 = vmul.f32 0.2, %v1176_v46 }
 0x33a   :  { %v1237_v57 = vmax.f32 %v1176_v46, %v1221_v56 }
 0x33c   :  { %2070 = vmatmul.msk.f32.gmra.mxu2 %vm509_vm1, %v1237_v57 }
 0x33d   :  { %v1178_v13 = vpop.f32.mrf.mxu0 }
 0x33e   :  { %v1179_v22 = vadd.f32 %v3019_v34, %v1178_v13 }
 0x340   :  { %v1222_v44 = vmul.f32 0.2, %v1179_v22 }
 0x342   :  { %v1238_v52 = vmax.f32 %v1179_v22, %v1222_v44  ;;  %v1393_v22 = vld [vmem:[%s3297_s2 + $0x130] sm:$0xff] }
 0x343   :  { %v1667_v44 = vld [vmem:[%s3297_s2 + $0x190] sm:$0xff]  ;;  %1458 = vmatpush.msra.mxu3 %v1393_v22 }
 0x344   :  { %2071 = vmatmul.msk.f32.gmra.mxu2 %vm509_vm1, %v1238_v52  ;;  %1684 = vmatpush.msrb.mxu0 %v1667_v44 }
 0x345   :  { %v1181_v32 = vpop.f32.mrf.mxu0 }
 0x346   :  { %v1182_v5 = vadd.f32 %v3019_v34, %v1181_v32  ;;  %v1392_v32 = vld [vmem:[%s3297_s2 + $0x128] sm:$0xff] }
 0x347   :  { %1459 = vmatpush.msra.mxu3 %v1392_v32 }
 0x348   :  { %v1223_v31 = vmul.f32 0.2, %v1182_v5 }
 0x34a   :  { %v1239_v42 = vmax.f32 %v1182_v5, %v1223_v31  ;;  %v1666_v5 = vld [vmem:[%s3297_s2 + $0x188] sm:$0xff] }
 0x34b   :  { %1685 = vmatpush.msrb.mxu0 %v1666_v5 }
 0x34c   :  { %2072 = vmatmul.msk.f32.gmra.mxu2 %vm509_vm1, %v1239_v42  ;;  %v1391_v42 = vld [vmem:[%s3297_s2 + $0x120] sm:$0xff] }
 0x34d   :  { %v1184_v1 = vpop.f32.mrf.mxu0  ;;  %1460 = vmatpush.msra.mxu3 %v1391_v42 }
 0x34e   :  { %v1185_v20 = vadd.f32 %v3019_v34, %v1184_v1  ;;  %v1665_v1 = vld [vmem:[%s3297_s2 + $0x180] sm:$0xff] }
 0x34f   :  { %1686 = vmatpush.msrb.mxu0 %v1665_v1 }
 0x350   :  { %v1224_v53 = vmul.f32 0.2, %v1185_v20 }
 0x352   :  { %v1240_v47 = vmax.f32 %v1185_v20, %v1224_v53 }
 0x354   :  { %2073 = vmatmul.msk.f32.gmra.mxu2 %vm509_vm1, %v1240_v47 }
 0x355   :  { %v1187_v3 = vpop.f32.mrf.mxu0 }
 0x356   :  { %v1188_v0 = vadd.f32 %v3019_v34, %v1187_v3 }
 0x358   :  { %v1225_v54 = vmul.f32 0.2, %v1188_v0 }
 0x35a   :  { %v1241_v18 = vmax.f32 %v1188_v0, %v1225_v54 }
 0x35c   :  { %2074 = vmatmul.msk.f32.gmra.mxu2 %vm509_vm1, %v1241_v18 }
 0x35d   :  { %v1190_v62 = vpop.f32.mrf.mxu0 }
 0x35e   :  { %v1191_v9 = vadd.f32 %v3019_v34, %v1190_v62 }
 0x360   :  { %v1226_v24 = vmul.f32 0.2, %v1191_v9 }
 0x362   :  { %v1242_v17 = vmax.f32 %v1191_v9, %v1226_v24  ;;  %v1549_v9 = vld [vmem:[%s3297_s2 + $0x178] sm:$0xff]  ;;  %v3083_v24 = vld [vmem:[%s3299_s4 + $0x40] ss:$0 sm:$0xff] }
 0x363   :  { %1608 = vmatpush.msrb.mxu1 %v1549_v9 }
 0x364   :  { %2075 = vmatmul.msk.f32.gmra.mxu2 %vm509_vm1, %v1242_v17 }
 0x365   :  { %v1193_v38 = vpop.f32.mrf.mxu0 }
 0x366   :  { %v1194_v10 = vadd.f32 %v3019_v34, %v1193_v38 }
 0x368   :  { %v1227_v55 = vmul.f32 0.2, %v1194_v10 }
 0x36a   :  { %v1243_v12 = vmax.f32 %v1194_v10, %v1227_v55 }
 0x36c   :  { %2076 = vmatmul.msk.f32.gmra.mxu2 %vm509_vm1, %v1243_v12 }
 0x36d   :  { %v1196_v25 = vpop.f32.mrf.mxu0 }
 0x36e   :  { %v1197_v48 = vadd.f32 %v3019_v34, %v1196_v25  ;;  %v1548_v25 = vld [vmem:[%s3297_s2 + $0x170] sm:$0xff] }
 0x36f   :  { %1609 = vmatpush.msrb.mxu1 %v1548_v25 }
 0x370   :  { %v1228_v35 = vmul.f32 0.2, %v1197_v48 }
 0x372   :  { %v1244_v21 = vmax.f32 %v1197_v48, %v1228_v35 }
 0x374   :  { %2077 = vmatmul.msk.f32.gmra.mxu2 %vm509_vm1, %v1244_v21 }
 0x375   :  { %v1199_v36 = vpop.f32.mrf.mxu0 }
 0x376   :  { %v1200_v8 = vadd.f32 %v3019_v34, %v1199_v36 }
 0x378   :  { %v1229_v41 = vmul.f32 0.2, %v1200_v8 }
 0x37a   :  { %v1245_v15 = vmax.f32 %v1200_v8, %v1229_v41 }
 0x37c   :  { %2078 = vmatmul.msk.f32.gmra.mxu2 %vm509_vm1, %v1245_v15 }
 0x37d   :  { %v1202_v39 = vpop.f32.mrf.mxu0 }
 0x37e   :  { %v1203_v33 = vadd.f32 %v3019_v34, %v1202_v39  ;;  %v1546_v39 = vld [vmem:[%s3297_s2 + $0x160] sm:$0xff] }
 0x380   :  { %v1230_v19 = vmul.f32 0.2, %v1203_v33 }
 0x382   :  { %v1246_v27 = vmax.f32 %v1203_v33, %v1230_v19 }
 0x384   :  { %2079 = vmatmul.msk.f32.gmra.mxu2 %vm509_vm1, %v1246_v27 }
 0x385   :  { %v1205_v61 = vpop.f32.mrf.mxu0 }
 0x386   :  { %v1206_v51 = vadd.f32 %v3019_v34, %v1205_v61 }
 0x388   :  { %v1231_v29 = vmul.f32 0.2, %v1206_v51 }
 0x38a   :  { %v1247_v26 = vmax.f32 %v1206_v51, %v1231_v29  ;;  %v1545_v51 = vld [vmem:[%s3297_s2 + $0x158] sm:$0xff] }
 0x38c   :  { %2080 = vmatmul.msk.f32.gmra.mxu2 %vm509_vm1, %v1247_v26 }
 0x38d   :  { %v1208_v49 = vpop.f32.mrf.mxu0 }
 0x38e   :  { %v1209_v14 = vadd.f32 %v3019_v34, %v1208_v49 }
 0x390   :  { %v1232_v46 = vmul.f32 0.2, %v1209_v14 }
 0x392   :  { %v1248_v56 = vmax.f32 %v1209_v14, %v1232_v46 }
 0x394   :  { %2081 = vmatmul.msk.f32.gmra.mxu2 %vm509_vm1, %v1248_v56 }
 0x395   :  { %v1211_v57 = vpop.f32.mrf.mxu0 }
 0x396   :  { %v1212_v13 = vadd.f32 %v3019_v34, %v1211_v57 }
 0x398   :  { %v1233_v52 = vmul.f32 0.2, %v1212_v13 }
 0x39a   :  { %v1249_v31 = vmax.f32 %v1212_v13, %v1233_v52  ;;  %v1543_v13 = vld [vmem:[%s3297_s2 + $0x148] sm:$0xff] }
 0x39c   :  { %2082 = vmatmul.msk.f32.gmra.mxu2 %vm509_vm1, %v1249_v31 }
 0x39d   :  { %v1214_v20 = vpop.f32.mrf.mxu0 }
 0x39e   :  { %v1215_v53 = vadd.f32 %v3019_v34, %v1214_v20 }
 0x3a0   :  { %v1234_v47 = vmul.f32 0.2, %v1215_v53 }
 0x3a2   :  { %v1250_v3 = vmax.f32 %v1215_v53, %v1234_v47 }
 0x3a4   :  { %2083 = vmatmul.msk.f32.gmra.mxu2 %vm509_vm1, %v1250_v3 }
 0x3a7   :  { %v1217_v0 = vpop.f32.mrf.mxu0 }
 0x3a8   :  { %v1218_v54 = vadd.f32 %v3019_v34, %v1217_v0  ;;  %v1790_v0 = vld [vmem:[%s3298_s3 + $0x50] sm:$0xff] }
 0x3aa   :  { %v1235_v18 = vmul.f32 0.2, %v1218_v54 }
 0x3ac   :  { %v1251_v62 = vmax.f32 %v1218_v54, %v1235_v18 }
 0x3ae   :  { %2084 = vmatmul.msk.f32.gmra.mxu2 %vm509_vm1, %v1251_v62 }
 0x3b7   :  { %v1327_v17 = vpop.f32.mrf.mxu2 }
 0x3b8   :  { %v1328_v38 = vadd.f32 %v3083_v24, %v1327_v17 }
 0x3ba   :  { %v1375_v10 = vadd.f32 %v1328_v38, %v2905_v50 }
 0x3bc   :  { %2085 = vmatmul.msk.f32.vlgmr.msra.gmra.mxu3 %vm117_vm0, %v1375_v10  ;;  %2117 = vmatmul.msk.f32.vlgmr.msrb.gmra.mxu0 %vm117_vm0, %v1375_v10  ;;  %v1789_v10 = vld [vmem:[%s3298_s3 + $0x48] sm:$0xff] }
 0x3bf   :  { %v1330_v34 = vpop.f32.mrf.mxu2 }
 0x3c0   :  { %v1331_v55 = vadd.f32 %v3083_v24, %v1330_v34 }
 0x3c2   :  { %v1376_v12 = vadd.f32 %v1331_v55, %v2911_v60  ;;  %v1547_v60 = vld [vmem:[%s3297_s2 + $0x168] sm:$0xff] }
 0x3c3   :  { %1610 = vmatpush.msrb.mxu1 %v1547_v60 }
 0x3c4   :  { %2086 = vmatmul.msk.f32.gmra.mxu3 %vm117_vm0, %v1376_v12  ;;  %2118 = vmatmul.msk.f32.gmra.mxu0 %vm117_vm0, %v1376_v12 }
 0x3c5   :  { %1611 = vmatpush.msrb.mxu1 %v1546_v39 }
 0x3c7   :  { %v1333_v48 = vpop.f32.mrf.mxu2  ;;  %1612 = vmatpush.msrb.mxu1 %v1545_v51 }
 0x3c8   :  { %v1334_v50 = vadd.f32 %v3083_v24, %v1333_v48 }
 0x3c9   :  { %1613 = vmatpush.msrb.mxu1 %v1544_v45 }
 0x3ca   :  { %v1377_v35 = vadd.f32 %v1334_v50, %v2920_v2 }
 0x3cb   :  { %1614 = vmatpush.msrb.mxu1 %v1543_v13  ;;  %v1785_v13 = vld [vmem:[%s3298_s3 + $0x28] sm:$0xff] }
 0x3cc   :  { %2087 = vmatmul.msk.f32.gmra.mxu3 %vm117_vm0, %v1377_v35  ;;  %2119 = vmatmul.msk.f32.gmra.mxu0 %vm117_vm0, %v1377_v35 }
 0x3cf   :  { %v1336_v21 = vpop.f32.mrf.mxu2 }
 0x3d0   :  { %v1337_v36 = vadd.f32 %v3083_v24, %v1336_v21  ;;  %v1788_v21 = vld [vmem:[%s3298_s3 + $0x40] sm:$0xff] }
 0x3d2   :  { %v1378_v8 = vadd.f32 %v1337_v36, %v2926_v30 }
 0x3d4   :  { %2088 = vmatmul.msk.f32.gmra.mxu3 %vm117_vm0, %v1378_v8  ;;  %2120 = vmatmul.msk.f32.gmra.mxu0 %vm117_vm0, %v1378_v8 }
 0x3d7   :  { %v1339_v41 = vpop.f32.mrf.mxu2 }
 0x3d8   :  { %v1340_v2 = vadd.f32 %v3083_v24, %v1339_v41 }
 0x3da   :  { %v1379_v15 = vadd.f32 %v1340_v2, %v2935_v40 }
 0x3dc   :  { %2089 = vmatmul.msk.f32.gmra.mxu3 %vm117_vm0, %v1379_v15  ;;  %2121 = vmatmul.msk.f32.gmra.mxu0 %vm117_vm0, %v1379_v15 }
 0x3df   :  { %v1342_v33 = vpop.f32.mrf.mxu2 }
 0x3e0   :  { %v1343_v30 = vadd.f32 %v3083_v24, %v1342_v33 }
 0x3e2   :  { %v1380_v19 = vadd.f32 %v1343_v30, %v2941_v16 }
 0x3e4   :  { %2090 = vmatmul.msk.f32.gmra.mxu3 %vm117_vm0, %v1380_v19  ;;  %2122 = vmatmul.msk.f32.gmra.mxu0 %vm117_vm0, %v1380_v19  ;;  %v1787_v19 = vld [vmem:[%s3298_s3 + $0x38] sm:$0xff] }
 0x3e7   :  { %v1345_v27 = vpop.f32.mrf.mxu2 }
 0x3e8   :  { %v1346_v40 = vadd.f32 %v3083_v24, %v1345_v27 }
 0x3ea   :  { %v1381_v61 = vadd.f32 %v1346_v40, %v2950_v23 }
 0x3ec   :  { %2091 = vmatmul.msk.f32.gmra.mxu3 %vm117_vm0, %v1381_v61  ;;  %2123 = vmatmul.msk.f32.gmra.mxu0 %vm117_vm0, %v1381_v61 }
 0x3ef   :  { %v1348_v29 = vpop.f32.mrf.mxu2 }
 0x3f0   :  { %v1349_v16 = vadd.f32 %v3083_v24, %v1348_v29 }
 0x3f2   :  { %v1382_v26 = vadd.f32 %v1349_v16, %v2956_v6 }
 0x3f4   :  { %2092 = vmatmul.msk.f32.gmra.mxu3 %vm117_vm0, %v1382_v26  ;;  %2124 = vmatmul.msk.f32.gmra.mxu0 %vm117_vm0, %v1382_v26 }
 0x3f7   :  { %v1351_v49 = vpop.f32.mrf.mxu2 }
 0x3f8   :  { %v1352_v23 = vadd.f32 %v3083_v24, %v1351_v49 }
 0x3fa   :  { %v1383_v14 = vadd.f32 %v1352_v23, %v2965_v4  ;;  %v1786_v23 = vld [vmem:[%s3298_s3 + $0x30] sm:$0xff] }
 0x3fc   :  { %2093 = vmatmul.msk.f32.gmra.mxu3 %vm117_vm0, %v1383_v14  ;;  %2125 = vmatmul.msk.f32.gmra.mxu0 %vm117_vm0, %v1383_v14 }
 0x3ff   :  { %v1354_v11 = vpop.f32.mrf.mxu2 }
 0x400   :  { %v1355_v6 = vadd.f32 %v3083_v24, %v1354_v11 }
 0x402   :  { %v1384_v46 = vadd.f32 %v1355_v6, %v2971_v28 }
 0x404   :  { %2094 = vmatmul.msk.f32.gmra.mxu3 %vm117_vm0, %v1384_v46  ;;  %2126 = vmatmul.msk.f32.gmra.mxu0 %vm117_vm0, %v1384_v46 }
 0x407   :  { %v1357_v56 = vpop.f32.mrf.mxu2 }
 0x408   :  { %v1358_v4 = vadd.f32 %v3083_v24, %v1357_v56 }
 0x40a   :  { %v1385_v57 = vadd.f32 %v1358_v4, %v2980_v63  ;;  %v1542_v63 = vld [vmem:[%s3297_s2 + $0x140] sm:$0xff]  ;;  %s2204_s2 = smov 8  }
 0x40b   :  { %1615 = vmatpush.msrb.mxu1 %v1542_v63 }
 0x40c   :  { %2095 = vmatmul.msk.f32.gmra.mxu3 %vm117_vm0, %v1385_v57  ;;  %2127 = vmatmul.msk.f32.gmra.mxu0 %vm117_vm0, %v1385_v57 }
 0x40f   :  { %v1360_v22 = vpop.f32.mrf.mxu2 }
 0x410   :  { %v1361_v28 = vadd.f32 %v3083_v24, %v1360_v22 }
 0x412   :  { %v1386_v44 = vadd.f32 %v1361_v28, %v2986_v58 }
 0x414   :  { %2096 = vmatmul.msk.f32.gmra.mxu3 %vm117_vm0, %v1386_v44  ;;  %2128 = vmatmul.msk.f32.gmra.mxu0 %vm117_vm0, %v1386_v44 }
 0x417   :  { %v1363_v52 = vpop.f32.mrf.mxu2 }
 0x418   :  { %v1364_v32 = vadd.f32 %v3083_v24, %v1363_v52 }
 0x41a   :  { %v1387_v5 = vadd.f32 %v1364_v32, %v2995_v7  ;;  %v1791_v7 = vld [vmem:[%s3298_s3 + $0x58] sm:$0xff] }
 0x41b   :  { %1850 = vmatpush.msrb.mxu2 %v1791_v7 }
 0x41c   :  { %2097 = vmatmul.msk.f32.gmra.mxu3 %vm117_vm0, %v1387_v5  ;;  %2129 = vmatmul.msk.f32.gmra.mxu0 %vm117_vm0, %v1387_v5 }
 0x41d   :  { %1851 = vmatpush.msrb.mxu2 %v1790_v0 }
 0x41f   :  { %v1366_v31 = vpop.f32.mrf.mxu2  ;;  %1852 = vmatpush.msrb.mxu2 %v1789_v10 }
 0x420   :  { %v1367_v58 = vadd.f32 %v3083_v24, %v1366_v31 }
 0x421   :  { %1853 = vmatpush.msrb.mxu2 %v1788_v21 }
 0x422   :  { %v1388_v42 = vadd.f32 %v1367_v58, %v3001_v37 }
 0x423   :  { %1854 = vmatpush.msrb.mxu2 %v1787_v19 }
 0x424   :  { %2098 = vmatmul.msk.f32.gmra.mxu3 %vm117_vm0, %v1388_v42  ;;  %2130 = vmatmul.msk.f32.gmra.mxu0 %vm117_vm0, %v1388_v42  ;;  %v1784_v42 = vld [vmem:[%s3298_s3 + $0x20] sm:$0xff] }
 0x425   :  { %1855 = vmatpush.msrb.mxu2 %v1786_v23 }
 0x427   :  { %v1369_v1 = vpop.f32.mrf.mxu2  ;;  %1856 = vmatpush.msrb.mxu2 %v1785_v13 }
 0x428   :  { %v1370_v20 = vadd.f32 %v3083_v24, %v1369_v1 }
 0x429   :  { %1857 = vmatpush.msrb.mxu2 %v1784_v42 }
 0x42a   :  { %v1389_v53 = vadd.f32 %v1370_v20, %v3006_v59  ;;  %v3176_v59 = vld [vmem:[%s3300_s5 + $0x40] ss:$0 sm:$0xff] }
 0x42c   :  { %2099 = vmatmul.msk.f32.gmra.mxu3 %vm117_vm0, %v1389_v53  ;;  %2131 = vmatmul.msk.f32.gmra.mxu0 %vm117_vm0, %v1389_v53 }
 0x431   :  { %v1372_v47 = vpop.f32.mrf.mxu2 }
 0x432   :  { %v1373_v37 = vadd.f32 %v3083_v24, %v1372_v47 }
 0x434   :  { %v1390_v3 = vadd.f32 %v1373_v37, %v3012_v43 }
 0x436   :  { %2100 = vmatmul.msk.f32.gmra.mxu3 %vm117_vm0, %v1390_v3  ;;  %2132 = vmatmul.msk.f32.gmra.mxu0 %vm117_vm0, %v1390_v3 }
 0x439   :  { %v1688_v58 = vpop.f32.mrf.mxu0 }
 0x43f   :  { %v1462_v54 = vpop.f32.mrf.mxu3 }
 0x440   :  { %v1463_v18 = vadd.f32 %v3176_v59, %v1462_v54 }
 0x441   :  { %v1691_v47 = vpop.f32.mrf.mxu0 }
 0x442   :  { %v1510_v62 = vmul.f32 0.2, %v1463_v18 }
 0x444   :  { %v1526_v9 = vmax.f32 %v1463_v18, %v1510_v62 }
 0x446   :  { %2101 = vmatmul.msk.f32.vlgmr.msrb.gmra.mxu1 %vm509_vm1, %v1526_v9 }
 0x447   :  { %v1465_v43 = vpop.f32.mrf.mxu3 }
 0x448   :  { %v1466_v24 = vadd.f32 %v3176_v59, %v1465_v43 }
 0x449   :  { %v1694_v9 = vpop.f32.mrf.mxu0 }
 0x44a   :  { %v1511_v17 = vmul.f32 0.2, %v1466_v24 }
 0x44c   :  { %v1527_v38 = vmax.f32 %v1466_v24, %v1511_v17  ;;  %v3232_v17 = vld [vmem:[%s3300_s5 + $0x60] ss:$0 sm:$0xff] }
 0x44d   :  { %v1692_v21 = vadd.f32 %v3232_v17, %v1691_v47 }
 0x44e   :  { %2102 = vmatmul.msk.f32.gmra.mxu1 %vm509_vm1, %v1527_v38 }
 0x44f   :  { %v1468_v34 = vpop.f32.mrf.mxu3 }
 0x450   :  { %v1469_v55 = vadd.f32 %v3176_v59, %v1468_v34 }
 0x451   :  { %v1697_v34 = vpop.f32.mrf.mxu0 }
 0x452   :  { %v1512_v12 = vmul.f32 0.2, %v1469_v55 }
 0x454   :  { %v1528_v25 = vmax.f32 %v1469_v55, %v1512_v12  ;;  %v1689_v55 = vadd.f32 %v3232_v17, %v1688_v58 }
 0x456   :  { %2103 = vmatmul.msk.f32.gmra.mxu1 %vm509_vm1, %v1528_v25 }
 0x457   :  { %v1471_v48 = vpop.f32.mrf.mxu3 }
 0x458   :  { %v1472_v50 = vadd.f32 %v3176_v59, %v1471_v48  ;;  %v1736_v48 = vmul.f32 0.2, %v1689_v55 }
 0x45a   :  { %v1513_v35 = vmul.f32 0.2, %v1472_v50 }
 0x45c   :  { %v1529_v60 = vmax.f32 %v1472_v50, %v1513_v35  ;;  %v3240_v50 = vld [vmem:[%s3300_s5 + $0x50] ss:$0 sm:$0xff] }
 0x45e   :  { %2104 = vmatmul.msk.f32.gmra.mxu1 %vm509_vm1, %v1529_v60  ;;  %v1752_v60 = vmax.f32 %v1689_v55, %v1736_v48 }
 0x45f   :  { %v1474_v36 = vpop.f32.mrf.mxu3 }
 0x460   :  { %v1475_v8 = vadd.f32 %v3176_v59, %v1474_v36 }
 0x462   :  { %v1514_v41 = vmul.f32 0.2, %v1475_v8 }
 0x464   :  { %v1530_v2 = vmax.f32 %v1475_v8, %v1514_v41  ;;  %v1737_v41 = vmul.f32 0.2, %v1692_v21 }
 0x466   :  { %2105 = vmatmul.msk.f32.gmra.mxu1 %vm509_vm1, %v1530_v2 }
 0x467   :  { %v1477_v15 = vpop.f32.mrf.mxu3 }
 0x468   :  { %v1478_v39 = vadd.f32 %v3176_v59, %v1477_v15  ;;  %v1753_v15 = vmax.f32 %v1692_v21, %v1737_v41 }
 0x46a   :  { %v1515_v33 = vmul.f32 0.2, %v1478_v39 }
 0x46c   :  { %v1531_v30 = vmax.f32 %v1478_v39, %v1515_v33  ;;  %v1695_v39 = vadd.f32 %v3232_v17, %v1694_v9 }
 0x46e   :  { %2106 = vmatmul.msk.f32.gmra.mxu1 %vm509_vm1, %v1531_v30 }
 0x46f   :  { %v1480_v27 = vpop.f32.mrf.mxu3 }
 0x470   :  { %v1481_v40 = vadd.f32 %v3176_v59, %v1480_v27  ;;  %v1738_v27 = vmul.f32 0.2, %v1695_v39 }
 0x472   :  { %v1516_v61 = vmul.f32 0.2, %v1481_v40 }
 0x474   :  { %v1532_v51 = vmax.f32 %v1481_v40, %v1516_v61  ;;  %v1754_v61 = vmax.f32 %v1695_v39, %v1738_v27 }
 0x476   :  { %2107 = vmatmul.msk.f32.gmra.mxu1 %vm509_vm1, %v1532_v51  ;;  %v1698_v51 = vadd.f32 %v3232_v17, %v1697_v34 }
 0x477   :  { %v1483_v29 = vpop.f32.mrf.mxu3 }
 0x478   :  { %v1484_v16 = vadd.f32 %v3176_v59, %v1483_v29 }
 0x47a   :  { %v1517_v26 = vmul.f32 0.2, %v1484_v16 }
 0x47c   :  { %v1533_v49 = vmax.f32 %v1484_v16, %v1517_v26  ;;  %v1739_v26 = vmul.f32 0.2, %v1698_v51 }
 0x47e   :  { %2108 = vmatmul.msk.f32.gmra.mxu1 %vm509_vm1, %v1533_v49 }
 0x47f   :  { %v1486_v14 = vpop.f32.mrf.mxu3 }
 0x480   :  { %v1487_v45 = vadd.f32 %v3176_v59, %v1486_v14  ;;  %v1755_v14 = vmax.f32 %v1698_v51, %v1739_v26 }
 0x482   :  { %v1518_v11 = vmul.f32 0.2, %v1487_v45 }
 0x484   :  { %v1534_v6 = vmax.f32 %v1487_v45, %v1518_v11 }
 0x486   :  { %2109 = vmatmul.msk.f32.gmra.mxu1 %vm509_vm1, %v1534_v6 }
 0x487   :  { %v1489_v46 = vpop.f32.mrf.mxu3 }
 0x488   :  { %v1490_v56 = vadd.f32 %v3176_v59, %v1489_v46 }
 0x48a   :  { %v1519_v4 = vmul.f32 0.2, %v1490_v56 }
 0x48c   :  { %v1535_v57 = vmax.f32 %v1490_v56, %v1519_v4 }
 0x48e   :  { %2110 = vmatmul.msk.f32.gmra.mxu1 %vm509_vm1, %v1535_v57 }
 0x48f   :  { %v1492_v22 = vpop.f32.mrf.mxu3 }
 0x490   :  { %v1493_v28 = vadd.f32 %v3176_v59, %v1492_v22 }
 0x492   :  { %v1520_v44 = vmul.f32 0.2, %v1493_v28 }
 0x494   :  { %v1536_v63 = vmax.f32 %v1493_v28, %v1520_v44 }
 0x496   :  { %2111 = vmatmul.msk.f32.gmra.mxu1 %vm509_vm1, %v1536_v63 }
 0x497   :  { %v1495_v52 = vpop.f32.mrf.mxu3 }
 0x498   :  { %v1496_v32 = vadd.f32 %v3176_v59, %v1495_v52 }
 0x49a   :  { %v1521_v5 = vmul.f32 0.2, %v1496_v32 }
 0x49c   :  { %v1537_v31 = vmax.f32 %v1496_v32, %v1521_v5 }
 0x49e   :  { %2112 = vmatmul.msk.f32.gmra.mxu1 %vm509_vm1, %v1537_v31 }
 0x49f   :  { %v1498_v1 = vpop.f32.mrf.mxu3 }
 0x4a0   :  { %v1499_v20 = vadd.f32 %v3176_v59, %v1498_v1 }
 0x4a2   :  { %v1522_v53 = vmul.f32 0.2, %v1499_v20 }
 0x4a4   :  { %v1538_v7 = vmax.f32 %v1499_v20, %v1522_v53 }
 0x4a6   :  { %2113 = vmatmul.msk.f32.gmra.mxu1 %vm509_vm1, %v1538_v7 }
 0x4a7   :  { %v1501_v37 = vpop.f32.mrf.mxu3 }
 0x4a8   :  { %v1502_v3 = vadd.f32 %v3176_v59, %v1501_v37 }
 0x4aa   :  { %v1523_v0 = vmul.f32 0.2, %v1502_v3 }
 0x4ac   :  { %v1539_v54 = vmax.f32 %v1502_v3, %v1523_v0 }
 0x4ae   :  { %2114 = vmatmul.msk.f32.gmra.mxu1 %vm509_vm1, %v1539_v54 }
 0x4af   :  { %v1504_v18 = vpop.f32.mrf.mxu3 }
 0x4b0   :  { %v1505_v62 = vadd.f32 %v3176_v59, %v1504_v18 }
 0x4b2   :  { %v1524_v43 = vmul.f32 0.2, %v1505_v62 }
 0x4b4   :  { %v1540_v24 = vmax.f32 %v1505_v62, %v1524_v43 }
 0x4b6   :  { %2115 = vmatmul.msk.f32.gmra.mxu1 %vm509_vm1, %v1540_v24 }
 0x4b9   :  { %v1507_v38 = vpop.f32.mrf.mxu3 }
 0x4ba   :  { %v1508_v10 = vadd.f32 %v3176_v59, %v1507_v38  ;;  %v1700_v59 = vpop.f32.mrf.mxu0 }
 0x4bb   :  { %v1701_v45 = vadd.f32 %v3232_v17, %v1700_v59 }
 0x4bc   :  { %v1525_v12 = vmul.f32 0.2, %v1508_v10 }
 0x4bd   :  { %v1740_v46 = vmul.f32 0.2, %v1701_v45 }
 0x4be   :  { %v1541_v25 = vmax.f32 %v1508_v10, %v1525_v12 }
 0x4bf   :  { %v1756_v57 = vmax.f32 %v1701_v45, %v1740_v46 }
 0x4c0   :  { %2116 = vmatmul.msk.f32.gmra.mxu1 %vm509_vm1, %v1541_v25 }
 0x4c2   :  { %v1703_v19 = vpop.f32.mrf.mxu0 }
 0x4c3   :  { %v1617_v35 = vpop.f32.mrf.mxu1  ;;  %v1704_v13 = vadd.f32 %v3232_v17, %v1703_v19 }
 0x4c4   :  { %v1618_v36 = vadd.f32 %v3240_v50, %v1617_v35 }
 0x4c5   :  { %v1741_v44 = vmul.f32 0.2, %v1704_v13 }
 0x4c6   :  { %v1768_v8 = vadd.f32 %v1752_v60, %v1618_v36 }
 0x4c7   :  { %v1757_v52 = vmax.f32 %v1704_v13, %v1741_v44 }
 0x4c8   :  { %2133 = vmatmul.msk.f32.vlgmr.msrb.gmra.mxu2 %vm509_vm1, %v1768_v8 }
 0x4ca   :  { %v1706_v49 = vpop.f32.mrf.mxu0 }
 0x4cb   :  { %v1620_v2 = vpop.f32.mrf.mxu1  ;;  %v1707_v32 = vadd.f32 %v3232_v17, %v1706_v49 }
 0x4cc   :  { %v1621_v33 = vadd.f32 %v3240_v50, %v1620_v2 }
 0x4cd   :  { %v1742_v42 = vmul.f32 0.2, %v1707_v32 }
 0x4ce   :  { %v1769_v30 = vadd.f32 %v1753_v15, %v1621_v33 }
 0x4cf   :  { %v1758_v20 = vmax.f32 %v1707_v32, %v1742_v42 }
 0x4d0   :  { %2134 = vmatmul.msk.f32.gmra.mxu2 %vm509_vm1, %v1769_v30 }
 0x4d2   :  { %v1709_v56 = vpop.f32.mrf.mxu0 }
 0x4d3   :  { %v1623_v40 = vpop.f32.mrf.mxu1  ;;  %v1710_v53 = vadd.f32 %v3232_v17, %v1709_v56 }
 0x4d4   :  { %v1624_v29 = vadd.f32 %v3240_v50, %v1623_v40 }
 0x4d5   :  { %v1743_v3 = vmul.f32 0.2, %v1710_v53 }
 0x4d6   :  { %v1770_v16 = vadd.f32 %v1754_v61, %v1624_v29 }
 0x4d7   :  { %v1759_v54 = vmax.f32 %v1710_v53, %v1743_v3 }
 0x4d8   :  { %2135 = vmatmul.msk.f32.gmra.mxu2 %vm509_vm1, %v1770_v16 }
 0x4da   :  { %v1712_v31 = vpop.f32.mrf.mxu0 }
 0x4db   :  { %v1626_v23 = vpop.f32.mrf.mxu1  ;;  %v1713_v18 = vadd.f32 %v3232_v17, %v1712_v31 }
 0x4dc   :  { %v1627_v11 = vadd.f32 %v3240_v50, %v1626_v23 }
 0x4dd   :  { %v1744_v43 = vmul.f32 0.2, %v1713_v18 }
 0x4de   :  { %v1771_v6 = vadd.f32 %v1755_v14, %v1627_v11 }
 0x4df   :  { %v1760_v10 = vmax.f32 %v1713_v18, %v1744_v43 }
 0x4e0   :  { %2136 = vmatmul.msk.f32.gmra.mxu2 %vm509_vm1, %v1771_v6 }
 0x4e2   :  { %v1715_v37 = vpop.f32.mrf.mxu0 }
 0x4e3   :  { %v1629_v4 = vpop.f32.mrf.mxu1  ;;  %v1716_v34 = vadd.f32 %v3232_v17, %v1715_v37 }
 0x4e4   :  { %v1630_v22 = vadd.f32 %v3240_v50, %v1629_v4 }
 0x4e5   :  { %v1745_v25 = vmul.f32 0.2, %v1716_v34 }
 0x4e6   :  { %v1772_v28 = vadd.f32 %v1756_v57, %v1630_v22 }
 0x4e7   :  { %v1761_v60 = vmax.f32 %v1716_v34, %v1745_v25 }
 0x4e8   :  { %2137 = vmatmul.msk.f32.gmra.mxu2 %vm509_vm1, %v1772_v28 }
 0x4ea   :  { %v1718_v24 = vpop.f32.mrf.mxu0 }
 0x4eb   :  { %v1632_v63 = vpop.f32.mrf.mxu1  ;;  %v1719_v21 = vadd.f32 %v3232_v17, %v1718_v24 }
 0x4ec   :  { %v1633_v5 = vadd.f32 %v3240_v50, %v1632_v63 }
 0x4ed   :  { %v1746_v8 = vmul.f32 0.2, %v1719_v21 }
 0x4ee   :  { %v1773_v58 = vadd.f32 %v1757_v52, %v1633_v5 }
 0x4ef   :  { %v1762_v2 = vmax.f32 %v1719_v21, %v1746_v8 }
 0x4f0   :  { %2138 = vmatmul.msk.f32.gmra.mxu2 %vm509_vm1, %v1773_v58 }
 0x4f2   :  { %v1721_v48 = vpop.f32.mrf.mxu0 }
 0x4f3   :  { %v1635_v1 = vpop.f32.mrf.mxu1  ;;  %v1722_v15 = vadd.f32 %v3232_v17, %v1721_v48 }
 0x4f4   :  { %v1636_v7 = vadd.f32 %v3240_v50, %v1635_v1 }
 0x4f5   :  { %v1747_v19 = vmul.f32 0.2, %v1722_v15 }
 0x4f6   :  { %v1774_v47 = vadd.f32 %v1758_v20, %v1636_v7  ;;  %v2175_v7 = vld [vmem:[%s3301_s6 + $0x10] ss:$0 sm:$0xff]  ;;  %s2202_s6 = smov [#allocation2]  }
 0x4f7   :  { %v1763_v40 = vmax.f32 %v1722_v15, %v1747_v19  ;;  %s1927_s0 = sshll.u32 %s2202_s6, 4  ;;  %s1928_s0 = int_to_ptr.vmem [resolvable:$true] %s1927_s0 }
 0x4f8   :  { %2139 = vmatmul.msk.f32.gmra.mxu2 %vm509_vm1, %v1774_v47 }
 0x4fa   :  { %v1724_v33 = vpop.f32.mrf.mxu0 }
 0x4fb   :  { %v1638_v0 = vpop.f32.mrf.mxu1  ;;  %v1725_v61 = vadd.f32 %v3232_v17, %v1724_v33 }
 0x4fc   :  { %v1639_v62 = vadd.f32 %v3240_v50, %v1638_v0 }
 0x4fd   :  { %v1748_v26 = vmul.f32 0.2, %v1725_v61 }
 0x4fe   :  { %v1775_v9 = vadd.f32 %v1759_v54, %v1639_v62 }
 0x4ff   :  { %v1764_v23 = vmax.f32 %v1725_v61, %v1748_v26 }
 0x500   :  { %2140 = vmatmul.msk.f32.gmra.mxu2 %vm509_vm1, %v1775_v9 }
 0x502   :  { %v1727_v16 = vpop.f32.mrf.mxu0 }
 0x503   :  { %v1641_v38 = vpop.f32.mrf.mxu1  ;;  %v1728_v14 = vadd.f32 %v3232_v17, %v1727_v16 }
 0x504   :  { %v1642_v55 = vadd.f32 %v3240_v50, %v1641_v38 }
 0x505   :  { %v1749_v6 = vmul.f32 0.2, %v1728_v14 }
 0x506   :  { %v1776_v12 = vadd.f32 %v1760_v10, %v1642_v55 }
 0x507   :  { %v1765_v4 = vmax.f32 %v1728_v14, %v1749_v6 }
 0x508   :  { %2141 = vmatmul.msk.f32.gmra.mxu2 %vm509_vm1, %v1776_v12 }
 0x50a   :  { %v1730_v46 = vpop.f32.mrf.mxu0 }
 0x50b   :  { %v1644_v35 = vpop.f32.mrf.mxu1  ;;  %v1731_v57 = vadd.f32 %v3232_v17, %v1730_v46 }
 0x50c   :  { %v1645_v36 = vadd.f32 %v3240_v50, %v1644_v35 }
 0x50d   :  { %v1750_v28 = vmul.f32 0.2, %v1731_v57 }
 0x50e   :  { %v1777_v59 = vadd.f32 %v1761_v60, %v1645_v36 }
 0x50f   :  { %v1766_v52 = vmax.f32 %v1731_v57, %v1750_v28 }
 0x510   :  { %2142 = vmatmul.msk.f32.gmra.mxu2 %vm509_vm1, %v1777_v59 }
 0x512   :  { %v1733_v44 = vpop.f32.mrf.mxu0 }
 0x513   :  { %v1647_v41 = vpop.f32.mrf.mxu1  ;;  %v1734_v5 = vadd.f32 %v3232_v17, %v1733_v44 }
 0x514   :  { %v1648_v39 = vadd.f32 %v3240_v50, %v1647_v41 }
 0x515   :  { %v1751_v58 = vmul.f32 0.2, %v1734_v5 }
 0x516   :  { %v1778_v30 = vadd.f32 %v1762_v2, %v1648_v39 }
 0x517   :  { %v1767_v1 = vmax.f32 %v1734_v5, %v1751_v58 }
 0x518   :  { %2143 = vmatmul.msk.f32.gmra.mxu2 %vm509_vm1, %v1778_v30 }
 0x51b   :  { %v1650_v27 = vpop.f32.mrf.mxu1 }
 0x51c   :  { %v1651_v51 = vadd.f32 %v3240_v50, %v1650_v27 }
 0x51e   :  { %v1779_v29 = vadd.f32 %v1763_v40, %v1651_v51 }
 0x520   :  { %2144 = vmatmul.msk.f32.gmra.mxu2 %vm509_vm1, %v1779_v29 }
 0x523   :  { %v1653_v49 = vpop.f32.mrf.mxu1 }
 0x524   :  { %v1654_v45 = vadd.f32 %v3240_v50, %v1653_v49 }
 0x526   :  { %v1780_v11 = vadd.f32 %v1764_v23, %v1654_v45 }
 0x528   :  { %2145 = vmatmul.msk.f32.gmra.mxu2 %vm509_vm1, %v1780_v11 }
 0x52b   :  { %v1656_v56 = vpop.f32.mrf.mxu1 }
 0x52c   :  { %v1657_v13 = vadd.f32 %v3240_v50, %v1656_v56 }
 0x52e   :  { %v1781_v22 = vadd.f32 %v1765_v4, %v1657_v13 }
 0x530   :  { %2146 = vmatmul.msk.f32.gmra.mxu2 %vm509_vm1, %v1781_v22 }
 0x533   :  { %v1659_v63 = vpop.f32.mrf.mxu1 }
 0x534   :  { %v1660_v32 = vadd.f32 %v3240_v50, %v1659_v63 }
 0x536   :  { %v1782_v31 = vadd.f32 %v1766_v52, %v1660_v32 }
 0x538   :  { %2147 = vmatmul.msk.f32.gmra.mxu2 %vm509_vm1, %v1782_v31 }
 0x53d   :  { %v1662_v42 = vpop.f32.mrf.mxu1 }
 0x53e   :  { %v1663_v20 = vadd.f32 %v3240_v50, %v1662_v42 }
 0x540   :  { %v1783_v53 = vadd.f32 %v1767_v1, %v1663_v20 }
 0x542   :  { %2148 = vmatmul.msk.f32.gmra.mxu2 %vm509_vm1, %v1783_v53 }
 0x54b   :  { %v1859_v47 = vpop.f32.mrf.mxu2 }
 0x54c   :  { %v1860_v37 = vadd.f32 %v2175_v7, %v1859_v47 }
 0x54e   :  { %1907 = vst [vmem:[#allocation2] sm:$0xff] %v1860_v37 }
 0x553   :  { %v1862_v3 = vpop.f32.mrf.mxu2 }
 0x554   :  { %v1863_v17 = vadd.f32 %v2175_v7, %v1862_v3 }
 0x556   :  { %1908 = vst [vmem:[#allocation2 + $0x8] sm:$0xff] %v1863_v17 }
 0x55b   :  { %v1865_v0 = vpop.f32.mrf.mxu2 }
 0x55c   :  { %v1866_v54 = vadd.f32 %v2175_v7, %v1865_v0 }
 0x55e   :  { %1909 = vst [vmem:[#allocation2 + $0x10] sm:$0xff] %v1866_v54 }
 0x563   :  { %v1868_v18 = vpop.f32.mrf.mxu2 }
 0x564   :  { %v1869_v62 = vadd.f32 %v2175_v7, %v1868_v18 }
 0x566   :  { %1910 = vst [vmem:[#allocation2 + $0x18] sm:$0xff] %v1869_v62 }
 0x56b   :  { %v1871_v50 = vpop.f32.mrf.mxu2 }
 0x56c   :  { %v1872_v9 = vadd.f32 %v2175_v7, %v1871_v50 }
 0x56e   :  { %1911 = vst [vmem:[#allocation2 + $0x20] sm:$0xff] %v1872_v9 }
 0x573   :  { %v1874_v43 = vpop.f32.mrf.mxu2 }
 0x574   :  { %v1875_v24 = vadd.f32 %v2175_v7, %v1874_v43 }
 0x576   :  { %1912 = vst [vmem:[#allocation2 + $0x28] sm:$0xff] %v1875_v24 }
 0x57b   :  { %v1877_v38 = vpop.f32.mrf.mxu2 }
 0x57c   :  { %v1878_v10 = vadd.f32 %v2175_v7, %v1877_v38 }
 0x57e   :  { %1913 = vst [vmem:[#allocation2 + $0x30] sm:$0xff] %v1878_v10 }
 0x583   :  { %v1880_v34 = vpop.f32.mrf.mxu2 }
 0x584   :  { %v1881_v55 = vadd.f32 %v2175_v7, %v1880_v34 }
 0x586   :  { %1914 = vst [vmem:[#allocation2 + $0x38] sm:$0xff] %v1881_v55 }
 0x58b   :  { %v1883_v12 = vpop.f32.mrf.mxu2 }
 0x58c   :  { %v1884_v25 = vadd.f32 %v2175_v7, %v1883_v12 }
 0x58e   :  { %1915 = vst [vmem:[#allocation2 + $0x40] sm:$0xff] %v1884_v25 }
 0x593   :  { %v1886_v48 = vpop.f32.mrf.mxu2 }
 0x594   :  { %v1887_v35 = vadd.f32 %v2175_v7, %v1886_v48 }
 0x596   :  { %1916 = vst [vmem:[#allocation2 + $0x48] sm:$0xff] %v1887_v35 }
 0x59b   :  { %v1889_v60 = vpop.f32.mrf.mxu2 }
 0x59c   :  { %v1890_v21 = vadd.f32 %v2175_v7, %v1889_v60 }
 0x59e   :  { %1917 = vst [vmem:[#allocation2 + $0x50] sm:$0xff] %v1890_v21 }
 0x5a3   :  { %v1892_v36 = vpop.f32.mrf.mxu2 }
 0x5a4   :  { %v1893_v59 = vadd.f32 %v2175_v7, %v1892_v36 }
 0x5a6   :  { %1918 = vst [vmem:[#allocation2 + $0x58] sm:$0xff] %v1893_v59 }
 0x5ab   :  { %v1895_v8 = vpop.f32.mrf.mxu2 }
 0x5ac   :  { %v1896_v41 = vadd.f32 %v2175_v7, %v1895_v8 }
 0x5ae   :  { %1919 = vst [vmem:[#allocation2 + $0x60] sm:$0xff] %v1896_v41 }
 0x5b3   :  { %v1898_v2 = vpop.f32.mrf.mxu2 }
 0x5b4   :  { %v1899_v15 = vadd.f32 %v2175_v7, %v1898_v2 }
 0x5b6   :  { %1920 = vst [vmem:[#allocation2 + $0x68] sm:$0xff] %v1899_v15 }
 0x5bb   :  { %v1901_v39 = vpop.f32.mrf.mxu2 }
 0x5bc   :  { %v1902_v33 = vadd.f32 %v2175_v7, %v1901_v39 }
 0x5be   :  { %1921 = vst [vmem:[#allocation2 + $0x70] sm:$0xff] %v1902_v33 }
 0x5c5   :  { %v1904_v30 = vpop.f32.mrf.mxu2 }
 0x5c6   :  { %v1905_v19 = vadd.f32 %v2175_v7, %v1904_v30 }
 0x5c8   :  { %1922 = vst [vmem:[#allocation2 + $0x78] sm:$0xff] %v1905_v19 }
 0x5c9   :  { %1935 = dma.vmem_to_hbm [thread:$0]  %s1928_s0, 2048, %s1930_s19, [#allocation3], %s2203_s20, %s2203_s20, %s2204_s2  }
 0x5ca   :  { %2200 = dma.done.wait [#allocation3], 2048  }
 0x5cb   :  { %2201 = vsyncadd [#allocation3], 4294965248 }
 0x5cc   :  { %1940 = vsyncpa [#allocation3], 1 }

</bundles_post_ra>
